<compile_context>
chip_gen: v7x
topology: tpu7x:2x2x1
jax: 0.10.0
libtpu: 0.0.40
codegen_flags: <defaults>
</compile_context>

<pallas_src>
import jax
import jax.numpy as jnp
import numpy as np
from jax.experimental import pallas as pl
from jax.experimental.pallas import tpu as pltpu

_NEG = -1e30  # bias for the 118 padded logit lanes


def _mnist_kernel(x_ref, we1_ref, wo1_ref, b1_ref, we2_ref, wo2_ref, b2_ref,
                  fw1_ref, fb1_ref, fw2_ref, fb2_ref, out_ref):
    f32 = jnp.float32
    B = x_ref.shape[0]

    # ---- conv1 (1 -> 10, k=5): 5 row-shifted banded matmuls per column parity.
    # acc_e[b*24 + h, jo*10 + c] == conv1[b, c, h, 2*jo]   (acc_o -> odd columns)
    acc_e = jnp.zeros((B * 24, 120), f32)
    acc_o = jnp.zeros((B * 24, 120), f32)
    for di in range(5):
        xs = x_ref[:, di:di + 24, :].reshape(B * 24, 28)
        acc_e = acc_e + jnp.dot(xs, we1_ref[di], preferred_element_type=f32)
        acc_o = acc_o + jnp.dot(xs, wo1_ref[di], preferred_element_type=f32)
    # width max-pool (even vs odd columns) + bias + ReLU: all element-wise.
    a1 = jnp.maximum(jnp.maximum(acc_e, acc_o) + b1_ref[...], 0.0)    # (B*24, 120)
    # height max-pool: rows (b, 2r) vs (b, 2r+1), register-resident.
    p1 = jnp.max(a1.reshape(B, 12, 2, 120), axis=2)                   # (B, 12, 120)

    # ---- conv2 (10 -> 20, k=5): same banded scheme with K = 12*10 = 120.
    # acc2_e[b*8 + h, q*20 + c] == conv2[b, c, h, 2*q]
    acc2_e = jnp.zeros((B * 8, 80), f32)
    acc2_o = jnp.zeros((B * 8, 80), f32)
    for di in range(5):
        ps = p1[:, di:di + 8, :].reshape(B * 8, 120)
        acc2_e = acc2_e + jnp.dot(ps, we2_ref[di], preferred_element_type=f32)
        acc2_o = acc2_o + jnp.dot(ps, wo2_ref[di], preferred_element_type=f32)
    # TODO(synk): conv2_drop (p=0.25) and post-fc1 dropout are eval-mode identity (no RNG).
    a2 = jnp.maximum(jnp.maximum(acc2_e, acc2_o) + b2_ref[...], 0.0)  # (B*8, 80)
    p2 = jnp.max(a2.reshape(B, 4, 2, 80), axis=2)                     # (B, 4, 80)

    # ---- fc1 with the (h, w, c) flatten folded into 4 accumulated matmuls.
    acc_h = jnp.zeros((B, 50), f32)
    for r in range(4):
        acc_h = acc_h + jnp.dot(p2[:, r:r + 1, :].reshape(B, 80), fw1_ref[r],
                                preferred_element_type=f32)
    hid = jnp.maximum(acc_h + fb1_ref[...], 0.0)                      # (B, 50)

    # ---- fc2 (padded to 128 lanes) + log-softmax; padded lanes carry -1e30 bias.
    logits = jnp.dot(hid, fw2_ref[...], preferred_element_type=f32) + fb2_ref[...]
    m = jnp.max(logits, axis=-1, keepdims=True)
    z = logits - m
    lse = jnp.log(jnp.sum(jnp.exp(z), axis=-1, keepdims=True))
    out_ref[...] = z - lse                                            # (B, 128)


def _band_weights(w, in_w):
    """Fold the horizontal taps of a 5x5 conv into banded matmul weights.

    w: (cout, cin, 5, 5).  Returns (even, odd), each of shape
    (5, in_w * cin, ((in_w - 4) // 2) * cout); rows are ordered (j_in, cin) and
    columns (j_out, cout).  `even` produces output column 2*j_out, `odd` 2*j_out+1.
    """
    cout, cin = int(w.shape[0]), int(w.shape[1])
    half = (in_w - 4) // 2
    sel_e = np.zeros((5, in_w, half), np.float32)
    sel_o = np.zeros((5, in_w, half), np.float32)
    for dj in range(5):
        for q in range(half):
            sel_e[dj, 2 * q + dj, q] = 1.0
            sel_o[dj, 2 * q + 1 + dj, q] = 1.0

    def build(sel):
        # band[di, j_in, cin, j_out, cout] = sum_dj sel[dj, j_in, j_out] * w[cout, cin, di, dj]
        band = jnp.einsum('xjq,ocdx->djcqo', jnp.asarray(sel), w.astype(jnp.float32))
        return band.reshape(5, in_w * cin, half * cout)

    return build(sel_e), build(sel_o)


def mnist_forward(x, params):
    """x: (N, 1, 28, 28) float32 (NCHW, like PyTorch). Returns (N, 10) log-probs."""
    conv1_w, conv1_b, conv2_w, conv2_b, fc1_w, fc1_b, fc2_w, fc2_b = params
    n = x.shape[0]

    # images per grid step: multiple of 8, capped so intermediates stay small.
    bb = min(64, max(8, ((n + 7) // 8) * 8))
    n_pad = ((n + bb - 1) // bb) * bb

    x2 = x[:, 0].astype(jnp.float32)                                  # (N, 28, 28)
    if n_pad != n:
        x2 = jnp.pad(x2, ((0, n_pad - n), (0, 0), (0, 0)))

    # ---- weight layout prep (cheap, once per call; stays VMEM-resident) ----
    we1, wo1 = _band_weights(conv1_w, 28)                             # (5, 28, 120) x2
    we2, wo2 = _band_weights(conv2_w, 12)                             # (5, 120, 80) x2
    b1t = jnp.tile(conv1_b.astype(jnp.float32), 12).reshape(1, 120)
    b2t = jnp.tile(conv2_b.astype(jnp.float32), 4).reshape(1, 80)
    # fc1 expects PyTorch flatten order (c, h, w); reorder to our (h, w, c) and
    # split the h axis so the kernel folds the flatten into 4 matmuls.
    fw1 = jnp.transpose(fc1_w.reshape(50, 20, 4, 4), (2, 3, 1, 0)).reshape(4, 80, 50)
    fb1 = fc1_b.reshape(1, 50)
    # fc2 padded to 128 lanes for a lane-dense output store.
    fw2 = jnp.zeros((50, 128), jnp.float32).at[:, :10].set(fc2_w.T)
    fb2 = jnp.full((1, 128), _NEG, jnp.float32).at[0, :10].set(fc2_b)

    def full(shape):
        zeros = (0,) * len(shape)
        return pl.BlockSpec(shape, lambda b: zeros)

    out = pl.pallas_call(
        _mnist_kernel,
        out_shape=jax.ShapeDtypeStruct((n_pad, 128), jnp.float32),
        grid_spec=pltpu.PrefetchScalarGridSpec(
            num_scalar_prefetch=0,
            grid=(n_pad // bb,),
            in_specs=[
                pl.BlockSpec((bb, 28, 28), lambda b: (b, 0, 0)),          # raw images
                full((5, 28, 120)), full((5, 28, 120)), full((1, 120)),   # conv1 bands + bias
                full((5, 120, 80)), full((5, 120, 80)), full((1, 80)),    # conv2 bands + bias
                full((4, 80, 50)), full((1, 50)),                         # fc1
                full((50, 128)), full((1, 128)),                          # fc2 (padded)
            ],
            out_specs=pl.BlockSpec((bb, 128), lambda b: (b, 0)),
        ),
        compiler_params=pltpu.CompilerParams(
            dimension_semantics=("parallel",)),
    )(x2, we1, wo1, b1t, we2, wo2, b2t, fw1, fb1, fw2, fb2)
    return out[:n, :10]


def mnist_forward_ref(x, params):
    """Pure-JAX reference matching the PyTorch forward (eval mode)."""
    conv1_w, conv1_b, conv2_w, conv2_b, fc1_w, fc1_b, fc2_w, fc2_b = params
    n = x.shape[0]
    dn = ("NCHW", "OIHW", "NCHW")
    c1 = jax.lax.conv_general_dilated(x, conv1_w, (1, 1), "VALID",
                                      dimension_numbers=dn) + conv1_b[None, :, None, None]
    p1 = jnp.max(c1.reshape(n, 10, 12, 2, 12, 2), axis=(3, 5))
    a1 = jnp.maximum(p1, 0.0)
    c2 = jax.lax.conv_general_dilated(a1, conv2_w, (1, 1), "VALID",
                                      dimension_numbers=dn) + conv2_b[None, :, None, None]
    p2 = jnp.max(c2.reshape(n, 20, 4, 2, 4, 2), axis=(3, 5))
    a2 = jnp.maximum(p2, 0.0)
    flat = a2.reshape(n, 320)
    h = jnp.maximum(flat @ fc1_w.T + fc1_b, 0.0)
    logits = h @ fc2_w.T + fc2_b
    return jax.nn.log_softmax(logits, axis=1)


def init_params(key):
    """Deterministic PyTorch-style uniform(-1/sqrt(fan_in), 1/sqrt(fan_in)) init."""
    def uniform(k, shape, fan_in):
        bound = 1.0 / np.sqrt(fan_in)
        return jax.random.uniform(k, shape, jnp.float32, -bound, bound)

    ks = jax.random.split(key, 8)
    conv1_w = uniform(ks[0], (10, 1, 5, 5), 1 * 5 * 5)
    conv1_b = uniform(ks[1], (10,), 1 * 5 * 5)
    conv2_w = uniform(ks[2], (20, 10, 5, 5), 10 * 5 * 5)
    conv2_b = uniform(ks[3], (20,), 10 * 5 * 5)
    fc1_w = uniform(ks[4], (50, 320), 320)
    fc1_b = uniform(ks[5], (50,), 320)
    fc2_w = uniform(ks[6], (10, 50), 50)
    fc2_b = uniform(ks[7], (10,), 50)
    return (conv1_w, conv1_b, conv2_w, conv2_b, fc1_w, fc1_b, fc2_w, fc2_b)


if __name__ == "__main__":
    key = jax.random.PRNGKey(0)
    pkey, xkey = jax.random.split(key)
    params = init_params(pkey)
    x = jax.random.normal(xkey, (2, 1, 28, 28), dtype=jnp.float32)

    out = jax.jit(mnist_forward)(x, params)
    out = jax.block_until_ready(out)
    assert out.shape == (2, 10)

    ref = mnist_forward_ref(x, params)
    np.testing.assert_allclose(np.asarray(out), np.asarray(ref), atol=1e-3, rtol=1e-3)

    print("KERNEL_OK")
</pallas_src>

<mosaic_0001>
module attributes {stable_mosaic.version = 11 : i64} {
  func.func @_mnist_kernel(%arg0: i32, %arg1: memref<8x28x28xf32, #tpu.memory_space<vmem>>, %arg2: memref<5x28x120xf32, #tpu.memory_space<vmem>>, %arg3: memref<5x28x120xf32, #tpu.memory_space<vmem>>, %arg4: memref<1x120xf32, #tpu.memory_space<vmem>>, %arg5: memref<5x120x80xf32, #tpu.memory_space<vmem>>, %arg6: memref<5x120x80xf32, #tpu.memory_space<vmem>>, %arg7: memref<1x80xf32, #tpu.memory_space<vmem>>, %arg8: memref<4x80x50xf32, #tpu.memory_space<vmem>>, %arg9: memref<1x50xf32, #tpu.memory_space<vmem>>, %arg10: memref<50x128xf32, #tpu.memory_space<vmem>>, %arg11: memref<1x128xf32, #tpu.memory_space<vmem>>, %arg12: memref<8x128xf32, #tpu.memory_space<vmem>>) attributes {dimension_semantics = [#tpu.dimension_semantics<parallel>], iteration_bounds = array<i64: 1>, scalar_prefetch = 0 : i64, scratch_operands = 0 : i64, tpu.core_type = #tpu.core_type<tc>, window_params = [{transform_indices = @transform_0, window_bounds = array<i64: 8, 28, 28>}, {pipeline_mode = #tpu.pipeline_mode<synchronous>, transform_indices = @transform_1, window_bounds = array<i64: 5, 28, 120>}, {pipeline_mode = #tpu.pipeline_mode<synchronous>, transform_indices = @transform_2, window_bounds = array<i64: 5, 28, 120>}, {pipeline_mode = #tpu.pipeline_mode<synchronous>, transform_indices = @transform_3, window_bounds = array<i64: 1, 120>}, {pipeline_mode = #tpu.pipeline_mode<synchronous>, transform_indices = @transform_4, window_bounds = array<i64: 5, 120, 80>}, {pipeline_mode = #tpu.pipeline_mode<synchronous>, transform_indices = @transform_5, window_bounds = array<i64: 5, 120, 80>}, {pipeline_mode = #tpu.pipeline_mode<synchronous>, transform_indices = @transform_6, window_bounds = array<i64: 1, 80>}, {pipeline_mode = #tpu.pipeline_mode<synchronous>, transform_indices = @transform_7, window_bounds = array<i64: 4, 80, 50>}, {pipeline_mode = #tpu.pipeline_mode<synchronous>, transform_indices = @transform_8, window_bounds = array<i64: 1, 50>}, {pipeline_mode = #tpu.pipeline_mode<synchronous>, transform_indices = @transform_9, window_bounds = array<i64: 50, 128>}, {pipeline_mode = #tpu.pipeline_mode<synchronous>, transform_indices = @transform_10, window_bounds = array<i64: 1, 128>}, {transform_indices = @transform_11, window_bounds = array<i64: 8, 128>}]} {
    %cst = arith.constant 0.000000e+00 : f32
    %0 = vector.broadcast %cst : f32 to vector<192x120xf32>
    %cst_0 = arith.constant 0.000000e+00 : f32
    %1 = vector.broadcast %cst_0 : f32 to vector<192x120xf32>
    %c0 = arith.constant 0 : index
    %c0_1 = arith.constant 0 : index
    %c0_2 = arith.constant 0 : index
    %2 = vector.load %arg1[%c0, %c0_1, %c0_2] : memref<8x28x28xf32, #tpu.memory_space<vmem>>, vector<8x24x28xf32>
    %3 = vector.shape_cast %2 : vector<8x24x28xf32> to vector<192x28xf32>
    %c0_3 = arith.constant 0 : index
    %c0_4 = arith.constant 0 : index
    %c0_5 = arith.constant 0 : index
    %4 = vector.load %arg2[%c0_3, %c0_4, %c0_5] : memref<5x28x120xf32, #tpu.memory_space<vmem>>, vector<1x28x120xf32>
    %5 = vector.shape_cast %4 : vector<1x28x120xf32> to vector<28x120xf32>
    %cst_6 = arith.constant dense<0.000000e+00> : vector<192x120xf32>
    %6 = tpu.matmul %3, %5, %cst_6 {dimension_numbers = #tpu.dot_dimension_numbers<[1], [0], [0], [1], [0, 0, 1, 1], [], []>} : vector<192x28xf32>, vector<28x120xf32>, vector<192x120xf32> -> vector<192x120xf32>
    %7 = arith.addf %0, %6 : vector<192x120xf32>
    %c0_7 = arith.constant 0 : index
    %c0_8 = arith.constant 0 : index
    %c0_9 = arith.constant 0 : index
    %8 = vector.load %arg3[%c0_7, %c0_8, %c0_9] : memref<5x28x120xf32, #tpu.memory_space<vmem>>, vector<1x28x120xf32>
    %9 = vector.shape_cast %8 : vector<1x28x120xf32> to vector<28x120xf32>
    %cst_10 = arith.constant dense<0.000000e+00> : vector<192x120xf32>
    %10 = tpu.matmul %3, %9, %cst_10 {dimension_numbers = #tpu.dot_dimension_numbers<[1], [0], [0], [1], [0, 0, 1, 1], [], []>} : vector<192x28xf32>, vector<28x120xf32>, vector<192x120xf32> -> vector<192x120xf32>
    %11 = arith.addf %1, %10 : vector<192x120xf32>
    %c0_11 = arith.constant 0 : index
    %c1 = arith.constant 1 : index
    %c0_12 = arith.constant 0 : index
    %12 = vector.load %arg1[%c0_11, %c1, %c0_12] : memref<8x28x28xf32, #tpu.memory_space<vmem>>, vector<8x24x28xf32>
    %13 = vector.shape_cast %12 : vector<8x24x28xf32> to vector<192x28xf32>
    %c1_13 = arith.constant 1 : index
    %c0_14 = arith.constant 0 : index
    %c0_15 = arith.constant 0 : index
    %14 = vector.load %arg2[%c1_13, %c0_14, %c0_15] : memref<5x28x120xf32, #tpu.memory_space<vmem>>, vector<1x28x120xf32>
    %15 = vector.shape_cast %14 : vector<1x28x120xf32> to vector<28x120xf32>
    %cst_16 = arith.constant dense<0.000000e+00> : vector<192x120xf32>
    %16 = tpu.matmul %13, %15, %cst_16 {dimension_numbers = #tpu.dot_dimension_numbers<[1], [0], [0], [1], [0, 0, 1, 1], [], []>} : vector<192x28xf32>, vector<28x120xf32>, vector<192x120xf32> -> vector<192x120xf32>
    %17 = arith.addf %7, %16 : vector<192x120xf32>
    %c1_17 = arith.constant 1 : index
    %c0_18 = arith.constant 0 : index
    %c0_19 = arith.constant 0 : index
    %18 = vector.load %arg3[%c1_17, %c0_18, %c0_19] : memref<5x28x120xf32, #tpu.memory_space<vmem>>, vector<1x28x120xf32>
    %19 = vector.shape_cast %18 : vector<1x28x120xf32> to vector<28x120xf32>
    %cst_20 = arith.constant dense<0.000000e+00> : vector<192x120xf32>
    %20 = tpu.matmul %13, %19, %cst_20 {dimension_numbers = #tpu.dot_dimension_numbers<[1], [0], [0], [1], [0, 0, 1, 1], [], []>} : vector<192x28xf32>, vector<28x120xf32>, vector<192x120xf32> -> vector<192x120xf32>
    %21 = arith.addf %11, %20 : vector<192x120xf32>
    %c0_21 = arith.constant 0 : index
    %c2 = arith.constant 2 : index
    %c0_22 = arith.constant 0 : index
    %22 = vector.load %arg1[%c0_21, %c2, %c0_22] : memref<8x28x28xf32, #tpu.memory_space<vmem>>, vector<8x24x28xf32>
    %23 = vector.shape_cast %22 : vector<8x24x28xf32> to vector<192x28xf32>
    %c2_23 = arith.constant 2 : index
    %c0_24 = arith.constant 0 : index
    %c0_25 = arith.constant 0 : index
    %24 = vector.load %arg2[%c2_23, %c0_24, %c0_25] : memref<5x28x120xf32, #tpu.memory_space<vmem>>, vector<1x28x120xf32>
    %25 = vector.shape_cast %24 : vector<1x28x120xf32> to vector<28x120xf32>
    %cst_26 = arith.constant dense<0.000000e+00> : vector<192x120xf32>
    %26 = tpu.matmul %23, %25, %cst_26 {dimension_numbers = #tpu.dot_dimension_numbers<[1], [0], [0], [1], [0, 0, 1, 1], [], []>} : vector<192x28xf32>, vector<28x120xf32>, vector<192x120xf32> -> vector<192x120xf32>
    %27 = arith.addf %17, %26 : vector<192x120xf32>
    %c2_27 = arith.constant 2 : index
    %c0_28 = arith.constant 0 : index
    %c0_29 = arith.constant 0 : index
    %28 = vector.load %arg3[%c2_27, %c0_28, %c0_29] : memref<5x28x120xf32, #tpu.memory_space<vmem>>, vector<1x28x120xf32>
    %29 = vector.shape_cast %28 : vector<1x28x120xf32> to vector<28x120xf32>
    %cst_30 = arith.constant dense<0.000000e+00> : vector<192x120xf32>
    %30 = tpu.matmul %23, %29, %cst_30 {dimension_numbers = #tpu.dot_dimension_numbers<[1], [0], [0], [1], [0, 0, 1, 1], [], []>} : vector<192x28xf32>, vector<28x120xf32>, vector<192x120xf32> -> vector<192x120xf32>
    %31 = arith.addf %21, %30 : vector<192x120xf32>
    %c0_31 = arith.constant 0 : index
    %c3 = arith.constant 3 : index
    %c0_32 = arith.constant 0 : index
    %32 = vector.load %arg1[%c0_31, %c3, %c0_32] : memref<8x28x28xf32, #tpu.memory_space<vmem>>, vector<8x24x28xf32>
    %33 = vector.shape_cast %32 : vector<8x24x28xf32> to vector<192x28xf32>
    %c3_33 = arith.constant 3 : index
    %c0_34 = arith.constant 0 : index
    %c0_35 = arith.constant 0 : index
    %34 = vector.load %arg2[%c3_33, %c0_34, %c0_35] : memref<5x28x120xf32, #tpu.memory_space<vmem>>, vector<1x28x120xf32>
    %35 = vector.shape_cast %34 : vector<1x28x120xf32> to vector<28x120xf32>
    %cst_36 = arith.constant dense<0.000000e+00> : vector<192x120xf32>
    %36 = tpu.matmul %33, %35, %cst_36 {dimension_numbers = #tpu.dot_dimension_numbers<[1], [0], [0], [1], [0, 0, 1, 1], [], []>} : vector<192x28xf32>, vector<28x120xf32>, vector<192x120xf32> -> vector<192x120xf32>
    %37 = arith.addf %27, %36 : vector<192x120xf32>
    %c3_37 = arith.constant 3 : index
    %c0_38 = arith.constant 0 : index
    %c0_39 = arith.constant 0 : index
    %38 = vector.load %arg3[%c3_37, %c0_38, %c0_39] : memref<5x28x120xf32, #tpu.memory_space<vmem>>, vector<1x28x120xf32>
    %39 = vector.shape_cast %38 : vector<1x28x120xf32> to vector<28x120xf32>
    %cst_40 = arith.constant dense<0.000000e+00> : vector<192x120xf32>
    %40 = tpu.matmul %33, %39, %cst_40 {dimension_numbers = #tpu.dot_dimension_numbers<[1], [0], [0], [1], [0, 0, 1, 1], [], []>} : vector<192x28xf32>, vector<28x120xf32>, vector<192x120xf32> -> vector<192x120xf32>
    %41 = arith.addf %31, %40 : vector<192x120xf32>
    %c0_41 = arith.constant 0 : index
    %c4 = arith.constant 4 : index
    %c0_42 = arith.constant 0 : index
    %42 = vector.load %arg1[%c0_41, %c4, %c0_42] : memref<8x28x28xf32, #tpu.memory_space<vmem>>, vector<8x24x28xf32>
    %43 = vector.shape_cast %42 : vector<8x24x28xf32> to vector<192x28xf32>
    %c4_43 = arith.constant 4 : index
    %c0_44 = arith.constant 0 : index
    %c0_45 = arith.constant 0 : index
    %44 = vector.load %arg2[%c4_43, %c0_44, %c0_45] : memref<5x28x120xf32, #tpu.memory_space<vmem>>, vector<1x28x120xf32>
    %45 = vector.shape_cast %44 : vector<1x28x120xf32> to vector<28x120xf32>
    %cst_46 = arith.constant dense<0.000000e+00> : vector<192x120xf32>
    %46 = tpu.matmul %43, %45, %cst_46 {dimension_numbers = #tpu.dot_dimension_numbers<[1], [0], [0], [1], [0, 0, 1, 1], [], []>} : vector<192x28xf32>, vector<28x120xf32>, vector<192x120xf32> -> vector<192x120xf32>
    %47 = arith.addf %37, %46 : vector<192x120xf32>
    %c4_47 = arith.constant 4 : index
    %c0_48 = arith.constant 0 : index
    %c0_49 = arith.constant 0 : index
    %48 = vector.load %arg3[%c4_47, %c0_48, %c0_49] : memref<5x28x120xf32, #tpu.memory_space<vmem>>, vector<1x28x120xf32>
    %49 = vector.shape_cast %48 : vector<1x28x120xf32> to vector<28x120xf32>
    %cst_50 = arith.constant dense<0.000000e+00> : vector<192x120xf32>
    %50 = tpu.matmul %43, %49, %cst_50 {dimension_numbers = #tpu.dot_dimension_numbers<[1], [0], [0], [1], [0, 0, 1, 1], [], []>} : vector<192x28xf32>, vector<28x120xf32>, vector<192x120xf32> -> vector<192x120xf32>
    %51 = arith.addf %41, %50 : vector<192x120xf32>
    %52 = arith.maximumf %47, %51 : vector<192x120xf32>
    %c0_51 = arith.constant 0 : index
    %c0_52 = arith.constant 0 : index
    %53 = vector.load %arg4[%c0_51, %c0_52] : memref<1x120xf32, #tpu.memory_space<vmem>>, vector<1x120xf32>
    %54 = vector.broadcast %53 : vector<1x120xf32> to vector<192x120xf32>
    %55 = arith.addf %52, %54 : vector<192x120xf32>
    %cst_53 = arith.constant 0.000000e+00 : f32
    %56 = vector.broadcast %cst_53 : f32 to vector<192x120xf32>
    %57 = arith.maximumf %55, %56 : vector<192x120xf32>
    %58 = vector.shape_cast %57 : vector<192x120xf32> to vector<8x12x2x120xf32>
    %cst_54 = arith.constant dense<0xFF800000> : vector<8x12x120xf32>
    %59 = vector.multi_reduction <maximumf>, %58, %cst_54 [2] : vector<8x12x2x120xf32> to vector<8x12x120xf32>
    %cst_55 = arith.constant 0.000000e+00 : f32
    %60 = vector.broadcast %cst_55 : f32 to vector<64x80xf32>
    %cst_56 = arith.constant 0.000000e+00 : f32
    %61 = vector.broadcast %cst_56 : f32 to vector<64x80xf32>
    %62 = vector.extract_strided_slice %59 {offsets = [0, 0, 0], sizes = [8, 8, 120], strides = [1, 1, 1]} : vector<8x12x120xf32> to vector<8x8x120xf32>
    %63 = vector.shape_cast %62 : vector<8x8x120xf32> to vector<64x120xf32>
    %c0_57 = arith.constant 0 : index
    %c0_58 = arith.constant 0 : index
    %c0_59 = arith.constant 0 : index
    %64 = vector.load %arg5[%c0_57, %c0_58, %c0_59] : memref<5x120x80xf32, #tpu.memory_space<vmem>>, vector<1x120x80xf32>
    %65 = vector.shape_cast %64 : vector<1x120x80xf32> to vector<120x80xf32>
    %cst_60 = arith.constant dense<0.000000e+00> : vector<64x80xf32>
    %66 = tpu.matmul %63, %65, %cst_60 {dimension_numbers = #tpu.dot_dimension_numbers<[1], [0], [0], [1], [0, 0, 1, 1], [], []>} : vector<64x120xf32>, vector<120x80xf32>, vector<64x80xf32> -> vector<64x80xf32>
    %67 = arith.addf %60, %66 : vector<64x80xf32>
    %c0_61 = arith.constant 0 : index
    %c0_62 = arith.constant 0 : index
    %c0_63 = arith.constant 0 : index
    %68 = vector.load %arg6[%c0_61, %c0_62, %c0_63] : memref<5x120x80xf32, #tpu.memory_space<vmem>>, vector<1x120x80xf32>
    %69 = vector.shape_cast %68 : vector<1x120x80xf32> to vector<120x80xf32>
    %cst_64 = arith.constant dense<0.000000e+00> : vector<64x80xf32>
    %70 = tpu.matmul %63, %69, %cst_64 {dimension_numbers = #tpu.dot_dimension_numbers<[1], [0], [0], [1], [0, 0, 1, 1], [], []>} : vector<64x120xf32>, vector<120x80xf32>, vector<64x80xf32> -> vector<64x80xf32>
    %71 = arith.addf %61, %70 : vector<64x80xf32>
    %72 = vector.extract_strided_slice %59 {offsets = [0, 1, 0], sizes = [8, 8, 120], strides = [1, 1, 1]} : vector<8x12x120xf32> to vector<8x8x120xf32>
    %73 = vector.shape_cast %72 : vector<8x8x120xf32> to vector<64x120xf32>
    %c1_65 = arith.constant 1 : index
    %c0_66 = arith.constant 0 : index
    %c0_67 = arith.constant 0 : index
    %74 = vector.load %arg5[%c1_65, %c0_66, %c0_67] : memref<5x120x80xf32, #tpu.memory_space<vmem>>, vector<1x120x80xf32>
    %75 = vector.shape_cast %74 : vector<1x120x80xf32> to vector<120x80xf32>
    %cst_68 = arith.constant dense<0.000000e+00> : vector<64x80xf32>
    %76 = tpu.matmul %73, %75, %cst_68 {dimension_numbers = #tpu.dot_dimension_numbers<[1], [0], [0], [1], [0, 0, 1, 1], [], []>} : vector<64x120xf32>, vector<120x80xf32>, vector<64x80xf32> -> vector<64x80xf32>
    %77 = arith.addf %67, %76 : vector<64x80xf32>
    %c1_69 = arith.constant 1 : index
    %c0_70 = arith.constant 0 : index
    %c0_71 = arith.constant 0 : index
    %78 = vector.load %arg6[%c1_69, %c0_70, %c0_71] : memref<5x120x80xf32, #tpu.memory_space<vmem>>, vector<1x120x80xf32>
    %79 = vector.shape_cast %78 : vector<1x120x80xf32> to vector<120x80xf32>
    %cst_72 = arith.constant dense<0.000000e+00> : vector<64x80xf32>
    %80 = tpu.matmul %73, %79, %cst_72 {dimension_numbers = #tpu.dot_dimension_numbers<[1], [0], [0], [1], [0, 0, 1, 1], [], []>} : vector<64x120xf32>, vector<120x80xf32>, vector<64x80xf32> -> vector<64x80xf32>
    %81 = arith.addf %71, %80 : vector<64x80xf32>
    %82 = vector.extract_strided_slice %59 {offsets = [0, 2, 0], sizes = [8, 8, 120], strides = [1, 1, 1]} : vector<8x12x120xf32> to vector<8x8x120xf32>
    %83 = vector.shape_cast %82 : vector<8x8x120xf32> to vector<64x120xf32>
    %c2_73 = arith.constant 2 : index
    %c0_74 = arith.constant 0 : index
    %c0_75 = arith.constant 0 : index
    %84 = vector.load %arg5[%c2_73, %c0_74, %c0_75] : memref<5x120x80xf32, #tpu.memory_space<vmem>>, vector<1x120x80xf32>
    %85 = vector.shape_cast %84 : vector<1x120x80xf32> to vector<120x80xf32>
    %cst_76 = arith.constant dense<0.000000e+00> : vector<64x80xf32>
    %86 = tpu.matmul %83, %85, %cst_76 {dimension_numbers = #tpu.dot_dimension_numbers<[1], [0], [0], [1], [0, 0, 1, 1], [], []>} : vector<64x120xf32>, vector<120x80xf32>, vector<64x80xf32> -> vector<64x80xf32>
    %87 = arith.addf %77, %86 : vector<64x80xf32>
    %c2_77 = arith.constant 2 : index
    %c0_78 = arith.constant 0 : index
    %c0_79 = arith.constant 0 : index
    %88 = vector.load %arg6[%c2_77, %c0_78, %c0_79] : memref<5x120x80xf32, #tpu.memory_space<vmem>>, vector<1x120x80xf32>
    %89 = vector.shape_cast %88 : vector<1x120x80xf32> to vector<120x80xf32>
    %cst_80 = arith.constant dense<0.000000e+00> : vector<64x80xf32>
    %90 = tpu.matmul %83, %89, %cst_80 {dimension_numbers = #tpu.dot_dimension_numbers<[1], [0], [0], [1], [0, 0, 1, 1], [], []>} : vector<64x120xf32>, vector<120x80xf32>, vector<64x80xf32> -> vector<64x80xf32>
    %91 = arith.addf %81, %90 : vector<64x80xf32>
    %92 = vector.extract_strided_slice %59 {offsets = [0, 3, 0], sizes = [8, 8, 120], strides = [1, 1, 1]} : vector<8x12x120xf32> to vector<8x8x120xf32>
    %93 = vector.shape_cast %92 : vector<8x8x120xf32> to vector<64x120xf32>
    %c3_81 = arith.constant 3 : index
    %c0_82 = arith.constant 0 : index
    %c0_83 = arith.constant 0 : index
    %94 = vector.load %arg5[%c3_81, %c0_82, %c0_83] : memref<5x120x80xf32, #tpu.memory_space<vmem>>, vector<1x120x80xf32>
    %95 = vector.shape_cast %94 : vector<1x120x80xf32> to vector<120x80xf32>
    %cst_84 = arith.constant dense<0.000000e+00> : vector<64x80xf32>
    %96 = tpu.matmul %93, %95, %cst_84 {dimension_numbers = #tpu.dot_dimension_numbers<[1], [0], [0], [1], [0, 0, 1, 1], [], []>} : vector<64x120xf32>, vector<120x80xf32>, vector<64x80xf32> -> vector<64x80xf32>
    %97 = arith.addf %87, %96 : vector<64x80xf32>
    %c3_85 = arith.constant 3 : index
    %c0_86 = arith.constant 0 : index
    %c0_87 = arith.constant 0 : index
    %98 = vector.load %arg6[%c3_85, %c0_86, %c0_87] : memref<5x120x80xf32, #tpu.memory_space<vmem>>, vector<1x120x80xf32>
    %99 = vector.shape_cast %98 : vector<1x120x80xf32> to vector<120x80xf32>
    %cst_88 = arith.constant dense<0.000000e+00> : vector<64x80xf32>
    %100 = tpu.matmul %93, %99, %cst_88 {dimension_numbers = #tpu.dot_dimension_numbers<[1], [0], [0], [1], [0, 0, 1, 1], [], []>} : vector<64x120xf32>, vector<120x80xf32>, vector<64x80xf32> -> vector<64x80xf32>
    %101 = arith.addf %91, %100 : vector<64x80xf32>
    %102 = vector.extract_strided_slice %59 {offsets = [0, 4, 0], sizes = [8, 8, 120], strides = [1, 1, 1]} : vector<8x12x120xf32> to vector<8x8x120xf32>
    %103 = vector.shape_cast %102 : vector<8x8x120xf32> to vector<64x120xf32>
    %c4_89 = arith.constant 4 : index
    %c0_90 = arith.constant 0 : index
    %c0_91 = arith.constant 0 : index
    %104 = vector.load %arg5[%c4_89, %c0_90, %c0_91] : memref<5x120x80xf32, #tpu.memory_space<vmem>>, vector<1x120x80xf32>
    %105 = vector.shape_cast %104 : vector<1x120x80xf32> to vector<120x80xf32>
    %cst_92 = arith.constant dense<0.000000e+00> : vector<64x80xf32>
    %106 = tpu.matmul %103, %105, %cst_92 {dimension_numbers = #tpu.dot_dimension_numbers<[1], [0], [0], [1], [0, 0, 1, 1], [], []>} : vector<64x120xf32>, vector<120x80xf32>, vector<64x80xf32> -> vector<64x80xf32>
    %107 = arith.addf %97, %106 : vector<64x80xf32>
    %c4_93 = arith.constant 4 : index
    %c0_94 = arith.constant 0 : index
    %c0_95 = arith.constant 0 : index
    %108 = vector.load %arg6[%c4_93, %c0_94, %c0_95] : memref<5x120x80xf32, #tpu.memory_space<vmem>>, vector<1x120x80xf32>
    %109 = vector.shape_cast %108 : vector<1x120x80xf32> to vector<120x80xf32>
    %cst_96 = arith.constant dense<0.000000e+00> : vector<64x80xf32>
    %110 = tpu.matmul %103, %109, %cst_96 {dimension_numbers = #tpu.dot_dimension_numbers<[1], [0], [0], [1], [0, 0, 1, 1], [], []>} : vector<64x120xf32>, vector<120x80xf32>, vector<64x80xf32> -> vector<64x80xf32>
    %111 = arith.addf %101, %110 : vector<64x80xf32>
    %112 = arith.maximumf %107, %111 : vector<64x80xf32>
    %c0_97 = arith.constant 0 : index
    %c0_98 = arith.constant 0 : index
    %113 = vector.load %arg7[%c0_97, %c0_98] : memref<1x80xf32, #tpu.memory_space<vmem>>, vector<1x80xf32>
    %114 = vector.broadcast %113 : vector<1x80xf32> to vector<64x80xf32>
    %115 = arith.addf %112, %114 : vector<64x80xf32>
    %cst_99 = arith.constant 0.000000e+00 : f32
    %116 = vector.broadcast %cst_99 : f32 to vector<64x80xf32>
    %117 = arith.maximumf %115, %116 : vector<64x80xf32>
    %118 = vector.shape_cast %117 : vector<64x80xf32> to vector<8x4x2x80xf32>
    %cst_100 = arith.constant dense<0xFF800000> : vector<8x4x80xf32>
    %119 = vector.multi_reduction <maximumf>, %118, %cst_100 [2] : vector<8x4x2x80xf32> to vector<8x4x80xf32>
    %cst_101 = arith.constant 0.000000e+00 : f32
    %120 = vector.broadcast %cst_101 : f32 to vector<8x50xf32>
    %121 = vector.extract_strided_slice %119 {offsets = [0, 0, 0], sizes = [8, 1, 80], strides = [1, 1, 1]} : vector<8x4x80xf32> to vector<8x1x80xf32>
    %122 = vector.shape_cast %121 : vector<8x1x80xf32> to vector<8x80xf32>
    %c0_102 = arith.constant 0 : index
    %c0_103 = arith.constant 0 : index
    %c0_104 = arith.constant 0 : index
    %123 = vector.load %arg8[%c0_102, %c0_103, %c0_104] : memref<4x80x50xf32, #tpu.memory_space<vmem>>, vector<1x80x50xf32>
    %124 = vector.shape_cast %123 : vector<1x80x50xf32> to vector<80x50xf32>
    %cst_105 = arith.constant dense<0.000000e+00> : vector<8x50xf32>
    %125 = tpu.matmul %122, %124, %cst_105 {dimension_numbers = #tpu.dot_dimension_numbers<[1], [0], [0], [1], [0, 0, 1, 1], [], []>} : vector<8x80xf32>, vector<80x50xf32>, vector<8x50xf32> -> vector<8x50xf32>
    %126 = arith.addf %120, %125 : vector<8x50xf32>
    %127 = vector.extract_strided_slice %119 {offsets = [0, 1, 0], sizes = [8, 1, 80], strides = [1, 1, 1]} : vector<8x4x80xf32> to vector<8x1x80xf32>
    %128 = vector.shape_cast %127 : vector<8x1x80xf32> to vector<8x80xf32>
    %c1_106 = arith.constant 1 : index
    %c0_107 = arith.constant 0 : index
    %c0_108 = arith.constant 0 : index
    %129 = vector.load %arg8[%c1_106, %c0_107, %c0_108] : memref<4x80x50xf32, #tpu.memory_space<vmem>>, vector<1x80x50xf32>
    %130 = vector.shape_cast %129 : vector<1x80x50xf32> to vector<80x50xf32>
    %cst_109 = arith.constant dense<0.000000e+00> : vector<8x50xf32>
    %131 = tpu.matmul %128, %130, %cst_109 {dimension_numbers = #tpu.dot_dimension_numbers<[1], [0], [0], [1], [0, 0, 1, 1], [], []>} : vector<8x80xf32>, vector<80x50xf32>, vector<8x50xf32> -> vector<8x50xf32>
    %132 = arith.addf %126, %131 : vector<8x50xf32>
    %133 = vector.extract_strided_slice %119 {offsets = [0, 2, 0], sizes = [8, 1, 80], strides = [1, 1, 1]} : vector<8x4x80xf32> to vector<8x1x80xf32>
    %134 = vector.shape_cast %133 : vector<8x1x80xf32> to vector<8x80xf32>
    %c2_110 = arith.constant 2 : index
    %c0_111 = arith.constant 0 : index
    %c0_112 = arith.constant 0 : index
    %135 = vector.load %arg8[%c2_110, %c0_111, %c0_112] : memref<4x80x50xf32, #tpu.memory_space<vmem>>, vector<1x80x50xf32>
    %136 = vector.shape_cast %135 : vector<1x80x50xf32> to vector<80x50xf32>
    %cst_113 = arith.constant dense<0.000000e+00> : vector<8x50xf32>
    %137 = tpu.matmul %134, %136, %cst_113 {dimension_numbers = #tpu.dot_dimension_numbers<[1], [0], [0], [1], [0, 0, 1, 1], [], []>} : vector<8x80xf32>, vector<80x50xf32>, vector<8x50xf32> -> vector<8x50xf32>
    %138 = arith.addf %132, %137 : vector<8x50xf32>
    %139 = vector.extract_strided_slice %119 {offsets = [0, 3, 0], sizes = [8, 1, 80], strides = [1, 1, 1]} : vector<8x4x80xf32> to vector<8x1x80xf32>
    %140 = vector.shape_cast %139 : vector<8x1x80xf32> to vector<8x80xf32>
    %c3_114 = arith.constant 3 : index
    %c0_115 = arith.constant 0 : index
    %c0_116 = arith.constant 0 : index
    %141 = vector.load %arg8[%c3_114, %c0_115, %c0_116] : memref<4x80x50xf32, #tpu.memory_space<vmem>>, vector<1x80x50xf32>
    %142 = vector.shape_cast %141 : vector<1x80x50xf32> to vector<80x50xf32>
    %cst_117 = arith.constant dense<0.000000e+00> : vector<8x50xf32>
    %143 = tpu.matmul %140, %142, %cst_117 {dimension_numbers = #tpu.dot_dimension_numbers<[1], [0], [0], [1], [0, 0, 1, 1], [], []>} : vector<8x80xf32>, vector<80x50xf32>, vector<8x50xf32> -> vector<8x50xf32>
    %144 = arith.addf %138, %143 : vector<8x50xf32>
    %c0_118 = arith.constant 0 : index
    %c0_119 = arith.constant 0 : index
    %145 = vector.load %arg9[%c0_118, %c0_119] : memref<1x50xf32, #tpu.memory_space<vmem>>, vector<1x50xf32>
    %146 = vector.broadcast %145 : vector<1x50xf32> to vector<8x50xf32>
    %147 = arith.addf %144, %146 : vector<8x50xf32>
    %cst_120 = arith.constant 0.000000e+00 : f32
    %148 = vector.broadcast %cst_120 : f32 to vector<8x50xf32>
    %149 = arith.maximumf %147, %148 : vector<8x50xf32>
    %c0_121 = arith.constant 0 : index
    %c0_122 = arith.constant 0 : index
    %150 = vector.load %arg10[%c0_121, %c0_122] : memref<50x128xf32, #tpu.memory_space<vmem>>, vector<50x128xf32>
    %cst_123 = arith.constant dense<0.000000e+00> : vector<8x128xf32>
    %151 = tpu.matmul %149, %150, %cst_123 {dimension_numbers = #tpu.dot_dimension_numbers<[1], [0], [0], [1], [0, 0, 1, 1], [], []>} : vector<8x50xf32>, vector<50x128xf32>, vector<8x128xf32> -> vector<8x128xf32>
    %c0_124 = arith.constant 0 : index
    %c0_125 = arith.constant 0 : index
    %152 = vector.load %arg11[%c0_124, %c0_125] : memref<1x128xf32, #tpu.memory_space<vmem>>, vector<1x128xf32>
    %153 = vector.broadcast %152 : vector<1x128xf32> to vector<8x128xf32>
    %154 = arith.addf %151, %153 : vector<8x128xf32>
    %cst_126 = arith.constant dense<0xFF800000> : vector<8xf32>
    %155 = vector.multi_reduction <maximumf>, %154, %cst_126 [1] : vector<8x128xf32> to vector<8xf32>
    %156 = vector.shape_cast %155 : vector<8xf32> to vector<8x1xf32>
    %157 = vector.broadcast %156 : vector<8x1xf32> to vector<8x128xf32>
    %158 = arith.subf %154, %157 : vector<8x128xf32>
    %159 = math.exp %158 : vector<8x128xf32>
    %cst_127 = arith.constant dense<0.000000e+00> : vector<8xf32>
    %160 = vector.multi_reduction <add>, %159, %cst_127 [1] : vector<8x128xf32> to vector<8xf32>
    %161 = vector.shape_cast %160 : vector<8xf32> to vector<8x1xf32>
    %162 = math.log %161 : vector<8x1xf32>
    %163 = vector.broadcast %162 : vector<8x1xf32> to vector<8x128xf32>
    %164 = arith.subf %158, %163 : vector<8x128xf32>
    %c0_128 = arith.constant 0 : index
    %c0_129 = arith.constant 0 : index
    %165 = vector.load %arg12[%c0_128, %c0_129] : memref<8x128xf32, #tpu.memory_space<vmem>>, vector<8x128xf32>
    tpu.vector_store %arg12[%c0_128, %c0_129], %164 {strides = array<i32>} : memref<8x128xf32, #tpu.memory_space<vmem>>, vector<8x128xf32>,
    return
  }
  func.func @transform_0(%arg0: i32) -> (i32, i32, i32) {
    %c0_i32 = arith.constant 0 : i32
    %c0_i32_0 = arith.constant 0 : i32
    %c0_i32_1 = arith.constant 0 : i32
    return %arg0, %c0_i32, %c0_i32_0 : i32, i32, i32
  }
  func.func @transform_1(%arg0: i32) -> (i32, i32, i32) {
    %c0_i32 = arith.constant 0 : i32
    %c0_i32_0 = arith.constant 0 : i32
    %c0_i32_1 = arith.constant 0 : i32
    %c0_i32_2 = arith.constant 0 : i32
    return %c0_i32, %c0_i32_0, %c0_i32_1 : i32, i32, i32
  }
  func.func @transform_2(%arg0: i32) -> (i32, i32, i32) {
    %c0_i32 = arith.constant 0 : i32
    %c0_i32_0 = arith.constant 0 : i32
    %c0_i32_1 = arith.constant 0 : i32
    %c0_i32_2 = arith.constant 0 : i32
    return %c0_i32, %c0_i32_0, %c0_i32_1 : i32, i32, i32
  }
  func.func @transform_3(%arg0: i32) -> (i32, i32) {
    %c0_i32 = arith.constant 0 : i32
    %c0_i32_0 = arith.constant 0 : i32
    %c0_i32_1 = arith.constant 0 : i32
    return %c0_i32, %c0_i32_0 : i32, i32
  }
  func.func @transform_4(%arg0: i32) -> (i32, i32, i32) {
    %c0_i32 = arith.constant 0 : i32
    %c0_i32_0 = arith.constant 0 : i32
    %c0_i32_1 = arith.constant 0 : i32
    %c0_i32_2 = arith.constant 0 : i32
    return %c0_i32, %c0_i32_0, %c0_i32_1 : i32, i32, i32
  }
  func.func @transform_5(%arg0: i32) -> (i32, i32, i32) {
    %c0_i32 = arith.constant 0 : i32
    %c0_i32_0 = arith.constant 0 : i32
    %c0_i32_1 = arith.constant 0 : i32
    %c0_i32_2 = arith.constant 0 : i32
    return %c0_i32, %c0_i32_0, %c0_i32_1 : i32, i32, i32
  }
  func.func @transform_6(%arg0: i32) -> (i32, i32) {
    %c0_i32 = arith.constant 0 : i32
    %c0_i32_0 = arith.constant 0 : i32
    %c0_i32_1 = arith.constant 0 : i32
    return %c0_i32, %c0_i32_0 : i32, i32
  }
  func.func @transform_7(%arg0: i32) -> (i32, i32, i32) {
    %c0_i32 = arith.constant 0 : i32
    %c0_i32_0 = arith.constant 0 : i32
    %c0_i32_1 = arith.constant 0 : i32
    %c0_i32_2 = arith.constant 0 : i32
    return %c0_i32, %c0_i32_0, %c0_i32_1 : i32, i32, i32
  }
  func.func @transform_8(%arg0: i32) -> (i32, i32) {
    %c0_i32 = arith.constant 0 : i32
    %c0_i32_0 = arith.constant 0 : i32
    %c0_i32_1 = arith.constant 0 : i32
    return %c0_i32, %c0_i32_0 : i32, i32
  }
  func.func @transform_9(%arg0: i32) -> (i32, i32) {
    %c0_i32 = arith.constant 0 : i32
    %c0_i32_0 = arith.constant 0 : i32
    %c0_i32_1 = arith.constant 0 : i32
    return %c0_i32, %c0_i32_0 : i32, i32
  }
  func.func @transform_10(%arg0: i32) -> (i32, i32) {
    %c0_i32 = arith.constant 0 : i32
    %c0_i32_0 = arith.constant 0 : i32
    %c0_i32_1 = arith.constant 0 : i32
    return %c0_i32, %c0_i32_0 : i32, i32
  }
  func.func @transform_11(%arg0: i32) -> (i32, i32) {
    %c0_i32 = arith.constant 0 : i32
    %c0_i32_0 = arith.constant 0 : i32
    return %arg0, %c0_i32 : i32, i32
  }
}

</mosaic_0001>

<bundles_post_ra>
// kernel: tile.13
= control target key start
LH: loop header
LB: loop body
LE: loop exit
PB: predicated region body
PF: predicated region fallthrough
CT: control target
= control target key end

     0   :  { %s28_s0 = inlined_call_operand.vmem [shape: f32[10], index: 0, kind: input, shape index: {}]   ;;  %s29_s1 = inlined_call_operand.vmem [shape: f32[12,10], index: 1, kind: output, shape index: {}]  }
   0x1   :  { %v4_v0 = vld [vmem:[%s28_s0] ss:$0 sm:$0xff] }
   0x2   :  { %5 = vst [vmem:[%s29_s1] sm:$0xff] %v4_v0  ;;  %8 = vst [vmem:[%s29_s1 + $0x8] sm:$0xff] %v4_v0 }

// kernel: tile.14
= control target key start
LH: loop header
LB: loop body
LE: loop exit
PB: predicated region body
PF: predicated region fallthrough
CT: control target
= control target key end

     0   :  { %s99_s10 = smov 110   ;;  %s100_s11 = smov 90   ;;  %vm3_vm0 = vcmask 80896   ;;  %vm9_vm1 = vcmask 982896   ;;  %vm15_vm2 = vcmask 900896   ;;  %vm21_vm3 = vcmask 818896   ;;  %s159_s0 = inlined_call_operand.vmem [shape: f32[12,10], index: 0, kind: input, shape index: {}]   ;;  %s160_s1 = inlined_call_operand.vmem [shape: f32[1,120], index: 1, kind: output, shape index: {}]  }
   0x1   :  { %v77_v0 = vld [vmem:[%s159_s0 + $0xb] sm:$0x1]   ;;  %v79_v1 = vld [vmem:[%s159_s0 + $0x9] sm:$0x1]   ;;  %v78_v2 = vld [vmem:[%s159_s0 + $0xa] sm:$0x1]  }
   0x2   :  { %7 = vrot.lane.b32.xlu0 %v77_v0, %s99_s10  ;;  %19 = vrot.lane.b32.xlu1 %v79_v1, %s100_s11  ;;  %v80_v3 = vld [vmem:[%s159_s0 + $0x8] sm:$0x1]   ;;  %s101_s16 = smov 100   ;;  %s102_s17 = smov 80   ;;  %v81_v4 = vld [vmem:[%s159_s0 + $0x7] sm:$0x1]  }
   0x3   :  { %v2_v5 = vld [vmem:[%s159_s0] sm:$0x1]   ;;  %v82_v6 = vld [vmem:[%s159_s0 + $0x6] sm:$0x1]   ;;  %s103_s24 = smov 70   ;;  %s104_s25 = smov 60  }
   0x4   :  { %4 = vst.msk [vmem:[#allocation0] sm:$0x1] %vm3_vm0, %v2_v5   ;;  %v83_v7 = vld [vmem:[%s159_s0 + $0x5] sm:$0x1]   ;;  %v84_v8 = vld [vmem:[%s159_s0 + $0x4] sm:$0x1]  }
   0x5   :  { %s105_s30 = smov 50   ;;  %s106_s2 = smov 40   ;;  %v85_v9 = vld [vmem:[%s159_s0 + $0x3] sm:$0x1]   ;;  %v86_v10 = vld [vmem:[%s159_s0 + $0x2] sm:$0x1]  }
   0x6   :  { %13 = vrot.lane.b32.xlu0 %v78_v2, %s101_s16  ;;  %25 = vrot.lane.b32.xlu1 %v80_v3, %s102_s17  ;;  %s107_s7 = smov 30   ;;  %s108_s8 = smov 20   ;;  %v87_v11 = vld [vmem:[%s159_s0 + $0x1] sm:$0x1]   ;;  %vm27_vm4 = vcmask 736896   ;;  %vm33_vm5 = vcmask 654896  }
   0x7   :  { %s109_s0 = smov 10   ;;  %vm39_vm6 = vcmask 572896   ;;  %vm45_vm7 = vcmask 490896   ;;  %vm51_vm8 = vcmask 408896   ;;  %vm57_vm9 = vcmask 326896  }
   0x8   :  { %vm63_vm10 = vcmask 244896   ;;  %vm69_vm11 = vcmask 162896  }
   0xa   :  { %31 = vrot.lane.b32.xlu0 %v81_v4, %s103_s24  ;;  %37 = vrot.lane.b32.xlu1 %v82_v6, %s104_s25 }
   0xe   :  { %43 = vrot.lane.b32.xlu0 %v83_v7, %s105_s30  ;;  %49 = vrot.lane.b32.xlu1 %v84_v8, %s106_s2 }
  0x12   :  { %55 = vrot.lane.b32.xlu0 %v85_v9, %s107_s7  ;;  %61 = vrot.lane.b32.xlu1 %v86_v10, %s108_s8 }
  0x16   :  { %67 = vrot.lane.b32.xlu0 %v87_v11, %s109_s0 }
  0x74   :  { %v8_v12 = vpop.permute.xlu0 %7   ;;  %v20_v13 = vpop.permute.xlu1 %19  }
  0x75   :  { %10 = vst.msk [vmem:[#allocation0] sm:$0x1] %vm9_vm1, %v8_v12  }
  0x78   :  { %v14_v14 = vpop.permute.xlu0 %13   ;;  %v26_v15 = vpop.permute.xlu1 %25  }
  0x79   :  { %16 = vst.msk [vmem:[#allocation0] sm:$0x1] %vm15_vm2, %v14_v14  }
  0x7a   :  { %22 = vst.msk [vmem:[#allocation0] sm:$0x1] %vm21_vm3, %v20_v13  }
  0x7b   :  { %28 = vst.msk [vmem:[#allocation0] sm:$0x1] %vm27_vm4, %v26_v15  }
  0x7c   :  { %v32_v16 = vpop.permute.xlu0 %31   ;;  %v38_v17 = vpop.permute.xlu1 %37  }
  0x7d   :  { %34 = vst.msk [vmem:[#allocation0] sm:$0x1] %vm33_vm5, %v32_v16  }
  0x7e   :  { %40 = vst.msk [vmem:[#allocation0] sm:$0x1] %vm39_vm6, %v38_v17  }
  0x80   :  { %v44_v18 = vpop.permute.xlu0 %43   ;;  %v50_v19 = vpop.permute.xlu1 %49  }
  0x81   :  { %46 = vst.msk [vmem:[#allocation0] sm:$0x1] %vm45_vm7, %v44_v18  }
  0x82   :  { %52 = vst.msk [vmem:[#allocation0] sm:$0x1] %vm51_vm8, %v50_v19  }
  0x84   :  { %v56_v20 = vpop.permute.xlu0 %55   ;;  %v62_v21 = vpop.permute.xlu1 %61  }
  0x85   :  { %58 = vst.msk [vmem:[#allocation0] sm:$0x1] %vm57_vm9, %v56_v20  }
  0x86   :  { %64 = vst.msk [vmem:[#allocation0] sm:$0x1] %vm63_vm10, %v62_v21  }
  0x88   :  { %v68_v22 = vpop.permute.xlu0 %67  }
  0x89   :  { %70 = vst.msk [vmem:[#allocation0] sm:$0x1] %vm69_vm11, %v68_v22  }
  0x90   :  { %v74_v23 = vld [vmem:[#allocation0] sm:$0x1] }
  0x91   :  { %76 = vst [vmem:[%s160_s1] sm:$0x1] %v74_v23 }

// kernel: tile.18
= control target key start
LH: loop header
LB: loop body
LE: loop exit
PB: predicated region body
PF: predicated region fallthrough
CT: control target
= control target key end

     0   :  { %s22_s0 = inlined_call_operand.vmem [shape: f32[20], index: 0, kind: input, shape index: {}]   ;;  %s23_s1 = inlined_call_operand.vmem [shape: f32[4,20], index: 1, kind: output, shape index: {}]  }
   0x1   :  { %v4_v0 = vld [vmem:[%s22_s0] ss:$0 sm:$0xff] }
   0x2   :  { %5 = vst [vmem:[%s23_s1] sm:$0xf] %v4_v0 }

// kernel: tile.19
= control target key start
LH: loop header
LB: loop body
LE: loop exit
PB: predicated region body
PF: predicated region fallthrough
CT: control target
= control target key end

     0   :  { %vm7_vm0 = vcmask 162816   ;;  %s37_s8 = smov 20   ;;  %s38_s9 = smov 40   ;;  %vm13_vm1 = vcmask 654816   ;;  %vm19_vm2 = vcmask 490816   ;;  %vm25_vm3 = vcmask 326816   ;;  %s55_s0 = inlined_call_operand.vmem [shape: f32[4,20], index: 0, kind: input, shape index: {}]   ;;  %s56_s1 = inlined_call_operand.vmem [shape: f32[1,80], index: 1, kind: output, shape index: {}]  }
   0x1   :  { %v4_v0 = vld [vmem:[%s55_s0] sm:$0xf]  ;;  %s36_s0 = smov 60  }
   0x2   :  { %5 = vst [vmem:[#allocation1] sm:$0xf] %v4_v0 }
   0x9   :  { %v10_v1 = vld [vmem:[#allocation1 + $0x3] sm:$0x1]   ;;  %v22_v2 = vld [vmem:[#allocation1 + $0x1] sm:$0x1]   ;;  %v6_v3 = vld [vmem:[#allocation1] sm:$0x1]  }
   0xa   :  { %11 = vrot.lane.b32.xlu0 %v10_v1, %s36_s0  ;;  %23 = vrot.lane.b32.xlu1 %v22_v2, %s37_s8  ;;  %v16_v4 = vld [vmem:[#allocation1 + $0x2] sm:$0x1]   ;;  %8 = vst.msk [vmem:[#allocation0] sm:$0x1] %vm7_vm0, %v6_v3  }
   0xe   :  { %17 = vrot.lane.b32.xlu0 %v16_v4, %s38_s9 }
  0x7c   :  { %v12_v5 = vpop.permute.xlu0 %11   ;;  %v24_v6 = vpop.permute.xlu1 %23  }
  0x7d   :  { %14 = vst.msk [vmem:[#allocation0] sm:$0x1] %vm13_vm1, %v12_v5  }
  0x80   :  { %v18_v7 = vpop.permute.xlu0 %17  }
  0x81   :  { %20 = vst.msk [vmem:[#allocation0] sm:$0x1] %vm19_vm2, %v18_v7  }
  0x82   :  { %26 = vst.msk [vmem:[#allocation0] sm:$0x1] %vm25_vm3, %v24_v6  }
  0x89   :  { %v30_v8 = vld [vmem:[#allocation0] sm:$0x1] }
  0x8a   :  { %32 = vst [vmem:[%s56_s1] sm:$0x1] %v30_v8 }

// kernel: mnist_forward.1
= control target key start
LH: loop header
LB: loop body
LE: loop exit
PB: predicated region body
PF: predicated region fallthrough
CT: control target
= control target key end

     0   :  { %vm172_vm0 = vcmask 1043456   ;;  %vm9302_vm1 = vmmov 1   ;;  %vm99_vm3 = vcmask 228352   ;;  %vm3199_vm4 = vcmask 975872   ;;  %s12551_s1 = inlined_call_operand.vmem [shape: f32[5,28,120], index: 1, kind: input, shape index: {}]   ;;  %s12552_s2 = inlined_call_operand.vmem [shape: f32[5,28,120], index: 2, kind: input, shape index: {}]   ;;  %s12553_s0 = inlined_call_operand.vmem [shape: f32[8,28,28], index: 0, kind: input, shape index: {}]   ;;  %s12554_s4 = inlined_call_operand.vmem [shape: f32[5,120,80], index: 4, kind: input, shape index: {}]   ;;  %s12555_s5 = inlined_call_operand.vmem [shape: f32[5,120,80], index: 5, kind: input, shape index: {}]   ;;  %s12556_s3 = inlined_call_operand.vmem [shape: f32[1,120], index: 3, kind: input, shape index: {}]   ;;  %s12557_s7 = inlined_call_operand.vmem [shape: f32[4,80,50], index: 7, kind: input, shape index: {}]   ;;  %s12558_s6 = inlined_call_operand.vmem [shape: f32[1,80], index: 6, kind: input, shape index: {}]   ;;  %s12559_s9 = inlined_call_operand.vmem [shape: f32[50,128], index: 9, kind: input, shape index: {}]   ;;  %s12560_s8 = inlined_call_operand.vmem [shape: f32[1,50], index: 8, kind: input, shape index: {}]   ;;  %s12561_s10 = inlined_call_operand.vmem [shape: f32[1,128], index: 10, kind: input, shape index: {}]   ;;  %s12562_s11 = inlined_call_operand.vmem [shape: f32[8,128], index: 11, kind: output, shape index: {}]  }
   0x1   :  { %v6534_v0 = vld [vmem:[%s12551_s1 + $0x20] sm:$0xff]  ;;  %v6535_v1 = vld [vmem:[%s12551_s1 + $0x28] sm:$0xff]  ;;  %v6536_v5 = vld [vmem:[%s12551_s1 + $0x30] sm:$0xff]  ;;  %vm3982_vm5 = vcmask 1041409   ;;  %vm3984_vm6 = vcmask 1042434   ;;  %vm3986_vm7 = vcmask 1043459  }
   0x2   :  { %v6588_v2 = vld [vmem:[%s12552_s2 + $0x20] sm:$0xff]  ;;  %v8587_v3 = vpack.c.bf16 %v6535_v1, %v6534_v0  ;;  %v6589_v4 = vld [vmem:[%s12552_s2 + $0x28] sm:$0xff]  ;;  %v6537_v6 = vld [vmem:[%s12551_s1 + $0x38] sm:$0xf]  ;;  %vm3988_vm8 = vcmask 1044484   ;;  %vm3990_vm9 = vcmask 1045509  }
   0x3   :  { %v8607_v7 = vpack.c.bf16 %v6589_v4, %v6588_v2  ;;  %v8591_v8 = vpack.c.bf16 %v6537_v6, %v6536_v5  ;;  %vm9385_vm2 = vmpackc.low %vm172_vm0, %vm9302_vm1  ;;  %v6590_v10 = vld [vmem:[%s12552_s2 + $0x30] sm:$0xff]  ;;  %v6591_v11 = vld [vmem:[%s12552_s2 + $0x38] sm:$0xf]  ;;  %vm3992_vm10 = vcmask 1046534   ;;  %vm3994_vm11 = vcmask 1047559  }
   0x4   :  { %8588 = vmatprep.subr.bf16.mxu0 %v8587_v3  ;;  %v8611_v12 = vpack.c.bf16 %v6591_v11, %v6590_v10  ;;  %v70_v13 = vld [vmem:[%s12553_s0 + $0x1] sm:$0xff]  ;;  %v71_v20 = vld [vmem:[%s12553_s0 + $0x9] sm:$0xff]  ;;  %v65_v22 = vld [vmem:[%s12551_s1 + $0x18] sm:$0xf]  ;;  %vm4045_vm12 = vcmask 982016   ;;  %vm9305_vm13 = vmmov 0  }
   0x5   :  { %v62_v14 = vld [vmem:[%s12551_s1] sm:$0xff]  ;;  %8608 = vmatprep.subr.bf16.mxu1 %v8607_v7  ;;  %8590 = vmatpush3.bf16.msra.mxu0 %v8587_v3  ;;  %v63_v15 = vld [vmem:[%s12551_s1 + $0x8] sm:$0xff]  ;;  %v64_v21 = vld [vmem:[%s12551_s1 + $0x10] sm:$0xff]  ;;  %vm5799_vm14 = vcmask 648192   ;;  %vm6060_vm15 = vcmask 654336   ;;  %vm6445_vm0 = vcmask 1041408  }
   0x6   :  { %v66_v16 = vld [vmem:[%s12552_s2] sm:$0xff]  ;;  %v67_v17 = vld [vmem:[%s12552_s2 + $0x8] sm:$0xff]  ;;  %8610 = vmatpush3.bf16.msra.mxu1 %v8607_v7  ;;  %8593 = vmatprep.subr.msk.bf16.mxu0 %vm9385_vm2, %v8591_v8  ;;  %v8597_v18 = vpack.c.bf16 %v63_v15, %v62_v14  ;;  %v68_v23 = vld [vmem:[%s12552_s2 + $0x10] sm:$0xff]  ;;  %v8601_v25 = vpack.c.bf16 %v65_v22, %v64_v21  ;;  %vm6441_vm1 = vcmask 408576  }
   0x7   :  { %8613 = vmatprep.subr.msk.bf16.mxu1 %vm9385_vm2, %v8611_v12  ;;  %7626 = vmatprep.mubr.msk.f32.mxu0 %vm99_vm3, %v70_v13  ;;  %v8617_v19 = vpack.c.bf16 %v67_v17, %v66_v16  ;;  %v72_v24 = vld [vmem:[%s12553_s0 + $0x11] sm:$0xff]  ;;  %v73_v28 = vld [vmem:[%s12553_s0 + $0x21] sm:$0xff]  ;;  %v74_v29 = vld [vmem:[%s12553_s0 + $0x29] sm:$0xff] }
   0x8   :  { %7714 = vmatprep.mubr.msk.f32.mxu1 %vm99_vm3, %v70_v13  ;;  %v69_v26 = vld [vmem:[%s12552_s2 + $0x18] sm:$0xf]  ;;  %v6642_v30 = vld [vmem:[%s12551_s1 + $0x40] sm:$0xff]  ;;  %v6643_v31 = vld [vmem:[%s12551_s1 + $0x48] sm:$0xff] }
   0x9   :  { %8596 = vmatpush3.bf16.msk.msra.mxu0 %vm9385_vm2, %v8591_v8  ;;  %v8621_v27 = vpack.c.bf16 %v69_v26, %v68_v23  ;;  %v9459_v32 = vpack.c.bf16 %v6643_v31, %v6642_v30  ;;  %v6671_v33 = vld [vmem:[%s12552_s2 + $0x40] sm:$0xff]  ;;  %v6672_v34 = vld [vmem:[%s12552_s2 + $0x48] sm:$0xff]  ;;  %v75_v35 = vld [vmem:[%s12553_s0 + $0x31] sm:$0xff] }
   0xa   :  { %8616 = vmatpush3.bf16.msk.msra.mxu1 %vm9385_vm2, %v8611_v12  ;;  %8598 = vmatprep.subr.bf16.mxu0 %v8597_v18  ;;  %v9472_v36 = vpack.c.bf16 %v6672_v34, %v6671_v33  ;;  %v76_v37 = vld [vmem:[%s12553_s0 + $0x41] sm:$0xff]  ;;  %v77_v38 = vld [vmem:[%s12553_s0 + $0x49] sm:$0xff]  ;;  %v78_v39 = vld [vmem:[%s12553_s0 + $0x51] sm:$0xff] }
   0xb   :  { %8618 = vmatprep.subr.bf16.mxu1 %v8617_v19  ;;  %v79_v40 = vld [vmem:[%s12553_s0 + $0x61] sm:$0xff]  ;;  %v80_v41 = vld [vmem:[%s12553_s0 + $0x69] sm:$0xff]  ;;  %v81_v42 = vld [vmem:[%s12553_s0 + $0x71] sm:$0xff] }
   0xc   :  { %7627 = vmatmul.mubr.msk.f32.vlgmr.msra.gmra.mrb[0].mxu0 %vm99_vm3, %v71_v20  ;;  %v82_v43 = vld [vmem:[%s12553_s0 + $0x81] sm:$0xff]  ;;  %v83_v44 = vld [vmem:[%s12553_s0 + $0x89] sm:$0xff]  ;;  %v84_v45 = vld [vmem:[%s12553_s0 + $0x91] sm:$0xff] }
   0xd   :  { %7715 = vmatmul.mubr.msk.f32.vlgmr.msra.gmra.mrb[0].mxu1 %vm99_vm3, %v71_v20  ;;  %8600 = vmatpush3.bf16.msra.mxu0 %v8597_v18  ;;  %v85_v46 = vld [vmem:[%s12553_s0 + $0xa1] sm:$0xff]  ;;  %v86_v47 = vld [vmem:[%s12553_s0 + $0xa9] sm:$0xff]  ;;  %v87_v48 = vld [vmem:[%s12553_s0 + $0xb1] sm:$0xff] }
   0xe   :  { %8620 = vmatpush3.bf16.msra.mxu1 %v8617_v19  ;;  %7629 = vmatprep.mubr.msk.f32.mxu0 %vm99_vm3, %v72_v24  ;;  %v88_v49 = vld [vmem:[%s12553_s0 + $0xc1] sm:$0xff]  ;;  %v89_v50 = vld [vmem:[%s12553_s0 + $0xc9] sm:$0xff]  ;;  %v90_v51 = vld [vmem:[%s12553_s0 + $0xd1] sm:$0xff] }
   0xf   :  { %7717 = vmatprep.mubr.msk.f32.mxu1 %vm99_vm3, %v72_v24  ;;  %8603 = vmatprep.subr.msk.bf16.mxu0 %vm9385_vm2, %v8601_v25  ;;  %v91_v52 = vld [vmem:[%s12553_s0 + $0xe1] sm:$0xff]  ;;  %v92_v53 = vld [vmem:[%s12553_s0 + $0xe9] sm:$0xff]  ;;  %v93_v54 = vld [vmem:[%s12553_s0 + $0xf1] sm:$0xff] }
  0x10   :  { %7630 = vmatmul.mubr.msk.f32.gmra.mrb[2].mxu0 %vm99_vm3, %v73_v28  ;;  %8623 = vmatprep.subr.msk.bf16.mxu1 %vm9385_vm2, %v8621_v27  ;;  %v38_v55 = vld [vmem:[%s12553_s0] sm:$0xff]  ;;  %v6644_v56 = vld [vmem:[%s12551_s1 + $0x50] sm:$0xff]  ;;  %v6645_v57 = vld [vmem:[%s12551_s1 + $0x58] sm:$0xf] }
  0x11   :  { %7718 = vmatmul.mubr.msk.f32.gmra.mrb[2].mxu1 %vm99_vm3, %v73_v28  ;;  %7632 = vmatprep.mubr.msk.f32.mxu0 %vm99_vm3, %v74_v29  ;;  %v39_v58 = vld [vmem:[%s12553_s0 + $0x8] sm:$0xff]  ;;  %v6673_v59 = vld [vmem:[%s12552_s2 + $0x50] sm:$0xff]  ;;  %v6674_v60 = vld [vmem:[%s12552_s2 + $0x58] sm:$0xf]  ;;  %v8631_v62 = vpack.c.bf16 %v6645_v57, %v6644_v56 }
  0x12   :  { %7720 = vmatprep.mubr.msk.f32.mxu1 %vm99_vm3, %v74_v29  ;;  %8606 = vmatpush3.bf16.msk.msra.mxu0 %vm9385_vm2, %v8601_v25  ;;  %v40_v61 = vld [vmem:[%s12553_s0 + $0x10] sm:$0xff]  ;;  %v8641_v63 = vpack.c.bf16 %v6674_v60, %v6673_v59  ;;  %v6700_v0 = vld [vmem:[%s12551_s1 + $0x60] sm:$0xff]  ;;  %v6701_v1 = vld [vmem:[%s12551_s1 + $0x68] sm:$0xff] }
  0x13   :  { %8626 = vmatpush3.bf16.msk.msra.mxu1 %vm9385_vm2, %v8621_v27  ;;  %8628 = vmatprep.subr.bf16.mxu0 %v9459_v32  ;;  %v41_v2 = vld [vmem:[%s12553_s0 + $0x20] sm:$0xff]  ;;  %v6730_v4 = vld [vmem:[%s12552_s2 + $0x68] sm:$0xff]  ;;  %v9622_v6 = vpack.c.bf16 %v6701_v1, %v6700_v0  ;;  %v43_v8 = vld [vmem:[%s12553_s0 + $0x30] sm:$0xff] }
  0x14   :  { %7633 = vmatmul.mubr.msk.f32.gmra.mrb[4].mxu0 %vm99_vm3, %v75_v35  ;;  %8638 = vmatprep.subr.bf16.mxu1 %v9472_v36  ;;  %v6729_v3 = vld [vmem:[%s12552_s2 + $0x60] sm:$0xff]  ;;  %v42_v5 = vld [vmem:[%s12553_s0 + $0x28] sm:$0xff]  ;;  %v46_v12 = vld [vmem:[%s12553_s0 + $0x50] sm:$0xff] }
  0x15   :  { %7721 = vmatmul.mubr.msk.f32.gmra.mrb[4].mxu1 %vm99_vm3, %v75_v35  ;;  %7635 = vmatprep.mubr.msk.f32.mxu0 %vm99_vm3, %v76_v37  ;;  %v9627_v7 = vpack.c.bf16 %v6730_v4, %v6729_v3  ;;  %v44_v10 = vld [vmem:[%s12553_s0 + $0x40] sm:$0xff]  ;;  %v45_v11 = vld [vmem:[%s12553_s0 + $0x48] sm:$0xff]  ;;  %v49_v15 = vld [vmem:[%s12553_s0 + $0x70] sm:$0xff] }
  0x16   :  { %7723 = vmatprep.mubr.msk.f32.mxu1 %vm99_vm3, %v76_v37  ;;  %v47_v13 = vld [vmem:[%s12553_s0 + $0x60] sm:$0xff]  ;;  %v48_v14 = vld [vmem:[%s12553_s0 + $0x68] sm:$0xff]  ;;  %v52_v18 = vld [vmem:[%s12553_s0 + $0x90] sm:$0xff] }
  0x17   :  { %v50_v16 = vld [vmem:[%s12553_s0 + $0x80] sm:$0xff]  ;;  %v51_v17 = vld [vmem:[%s12553_s0 + $0x88] sm:$0xff]  ;;  %v55_v21 = vld [vmem:[%s12553_s0 + $0xb0] sm:$0xff] }
  0x18   :  { %7636 = vmatmul.mubr.msk.f32.gmra.mrb[6].mxu0 %vm99_vm3, %v77_v38  ;;  %v53_v19 = vld [vmem:[%s12553_s0 + $0xa0] sm:$0xff]  ;;  %v54_v20 = vld [vmem:[%s12553_s0 + $0xa8] sm:$0xff]  ;;  %v58_v24 = vld [vmem:[%s12553_s0 + $0xd0] sm:$0xff] }
  0x19   :  { %7724 = vmatmul.mubr.msk.f32.gmra.mrb[6].mxu1 %vm99_vm3, %v77_v38  ;;  %7638 = vmatprep.mubr.msk.f32.mxu0 %vm99_vm3, %v78_v39  ;;  %v56_v22 = vld [vmem:[%s12553_s0 + $0xc0] sm:$0xff]  ;;  %v57_v23 = vld [vmem:[%s12553_s0 + $0xc8] sm:$0xff]  ;;  %v61_v27 = vld [vmem:[%s12553_s0 + $0xf0] sm:$0xff] }
  0x1a   :  { %7726 = vmatprep.mubr.msk.f32.mxu1 %vm99_vm3, %v78_v39  ;;  %v59_v25 = vld [vmem:[%s12553_s0 + $0xe0] sm:$0xff]  ;;  %v60_v26 = vld [vmem:[%s12553_s0 + $0xe8] sm:$0xff]  ;;  %v6702_v29 = vld [vmem:[%s12551_s1 + $0x70] sm:$0xff] }
  0x1b   :  { %v1002_v28 = vld [vmem:[%s12553_s0 + $0x2] sm:$0xff]  ;;  %v6703_v30 = vld [vmem:[%s12551_s1 + $0x78] sm:$0xf]  ;;  %v1003_v31 = vld [vmem:[%s12553_s0 + $0xa] sm:$0xff] }
  0x1c   :  { %7639 = vmatmul.mubr.msk.f32.gmra.mrb[8].mxu0 %vm99_vm3, %v79_v40  ;;  %v6732_v33 = vld [vmem:[%s12552_s2 + $0x78] sm:$0xf]  ;;  %v8651_v35 = vpack.c.bf16 %v6703_v30, %v6702_v29  ;;  %v6758_v37 = vld [vmem:[%s12551_s1 + $0x80] sm:$0xff]  ;;  %v6759_v38 = vld [vmem:[%s12551_s1 + $0x88] sm:$0xff] }
  0x1d   :  { %7727 = vmatmul.mubr.msk.f32.gmra.mrb[8].mxu1 %vm99_vm3, %v79_v40  ;;  %7641 = vmatprep.mubr.msk.f32.mxu0 %vm99_vm3, %v80_v41  ;;  %v1004_v34 = vld [vmem:[%s12553_s0 + $0x12] sm:$0xff]  ;;  %v1005_v39 = vld [vmem:[%s12553_s0 + $0x22] sm:$0xff]  ;;  %v1018_v56 = vld [vmem:[%s12553_s0 + $0xaa] sm:$0xff] }
  0x1e   :  { %7729 = vmatprep.mubr.msk.f32.mxu1 %vm99_vm3, %v80_v41  ;;  %v6787_v40 = vld [vmem:[%s12552_s2 + $0x80] sm:$0xff]  ;;  %v6788_v41 = vld [vmem:[%s12552_s2 + $0x88] sm:$0xff]  ;;  %v1019_v57 = vld [vmem:[%s12553_s0 + $0xb2] sm:$0xff] }
  0x1f   :  { %v1021_v59 = vld [vmem:[%s12553_s0 + $0xca] sm:$0xff]  ;;  %v1022_v60 = vld [vmem:[%s12553_s0 + $0xd2] sm:$0xff] }
  0x20   :  { %7642 = vmatmul.mubr.msk.f32.gmra.mrb[10].mxu0 %vm99_vm3, %v81_v42  ;;  %v1532_v0 = vld [vmem:[%s12553_s0 + $0x3] sm:$0xff]  ;;  %v6760_v1 = vld [vmem:[%s12551_s1 + $0x90] sm:$0xff] }
  0x21   :  { %7730 = vmatmul.mubr.msk.f32.gmra.mrb[10].mxu1 %vm99_vm3, %v81_v42  ;;  %7644 = vmatprep.mubr.msk.f32.mxu0 %vm99_vm3, %v82_v43  ;;  %v1006_v42 = vld [vmem:[%s12553_s0 + $0x2a] sm:$0xff]  ;;  %v1540_v9 = vld [vmem:[%s12553_s0 + $0x53] sm:$0xff] }
  0x22   :  { %7732 = vmatprep.mubr.msk.f32.mxu1 %vm99_vm3, %v82_v43  ;;  %v9782_v43 = vpack.c.bf16 %v6759_v38, %v6758_v37  ;;  %v1533_v3 = vld [vmem:[%s12553_s0 + $0xb] sm:$0xff]  ;;  %v1549_v29 = vld [vmem:[%s12553_s0 + $0xb3] sm:$0xff]  ;;  %v1550_v30 = vld [vmem:[%s12553_s0 + $0xc3] sm:$0xff] }
  0x23   :  { %v6789_v4 = vld [vmem:[%s12552_s2 + $0x90] sm:$0xff] }
  0x24   :  { %7645 = vmatmul.mubr.msk.f32.gmra.mrb[12].mxu0 %vm99_vm3, %v83_v44  ;;  %v2063_v37 = vld [vmem:[%s12553_s0 + $0xc] sm:$0xff]  ;;  %v2064_v38 = vld [vmem:[%s12553_s0 + $0x14] sm:$0xff] }
  0x25   :  { %7733 = vmatmul.mubr.msk.f32.gmra.mrb[12].mxu1 %vm99_vm3, %v83_v44  ;;  %7647 = vmatprep.mubr.msk.f32.mxu0 %vm99_vm3, %v84_v45  ;;  %v9787_v44 = vpack.c.bf16 %v6788_v41, %v6787_v40  ;;  %v2066_v40 = vld [vmem:[%s12553_s0 + $0x2c] sm:$0xff]  ;;  %v2067_v41 = vld [vmem:[%s12553_s0 + $0x34] sm:$0xff] }
  0x26   :  { %7735 = vmatprep.mubr.msk.f32.mxu1 %vm99_vm3, %v84_v45  ;;  %v1007_v45 = vld [vmem:[%s12553_s0 + $0x32] sm:$0xff] }
  0x28   :  { %7648 = vmatmul.mubr.msk.f32.gmra.mrb[14].mxu0 %vm99_vm3, %v85_v46 }
  0x29   :  { %7736 = vmatmul.mubr.msk.f32.gmra.mrb[14].mxu1 %vm99_vm3, %v85_v46  ;;  %7650 = vmatprep.mubr.msk.f32.mxu0 %vm99_vm3, %v86_v47  ;;  %v1008_v46 = vld [vmem:[%s12553_s0 + $0x42] sm:$0xff] }
  0x2a   :  { %7738 = vmatprep.mubr.msk.f32.mxu1 %vm99_vm3, %v86_v47  ;;  %v1009_v47 = vld [vmem:[%s12553_s0 + $0x4a] sm:$0xff] }
  0x2c   :  { %7651 = vmatmul.mubr.msk.f32.gmra.mrb[16].mxu0 %vm99_vm3, %v87_v48 }
  0x2d   :  { %7739 = vmatmul.mubr.msk.f32.gmra.mrb[16].mxu1 %vm99_vm3, %v87_v48  ;;  %7653 = vmatprep.mubr.msk.f32.mxu0 %vm99_vm3, %v88_v49  ;;  %v1010_v48 = vld [vmem:[%s12553_s0 + $0x52] sm:$0xff] }
  0x2e   :  { %7741 = vmatprep.mubr.msk.f32.mxu1 %vm99_vm3, %v88_v49  ;;  %v1011_v49 = vld [vmem:[%s12553_s0 + $0x62] sm:$0xff] }
  0x30   :  { %7654 = vmatmul.mubr.msk.f32.gmra.mrb[18].mxu0 %vm99_vm3, %v89_v50 }
  0x31   :  { %7742 = vmatmul.mubr.msk.f32.gmra.mrb[18].mxu1 %vm99_vm3, %v89_v50  ;;  %7656 = vmatprep.mubr.msk.f32.mxu0 %vm99_vm3, %v90_v51  ;;  %v1012_v50 = vld [vmem:[%s12553_s0 + $0x6a] sm:$0xff] }
  0x32   :  { %7744 = vmatprep.mubr.msk.f32.mxu1 %vm99_vm3, %v90_v51  ;;  %v1013_v51 = vld [vmem:[%s12553_s0 + $0x72] sm:$0xff] }
  0x34   :  { %7657 = vmatmul.mubr.msk.f32.gmra.mrb[20].mxu0 %vm99_vm3, %v91_v52 }
  0x35   :  { %7745 = vmatmul.mubr.msk.f32.gmra.mrb[20].mxu1 %vm99_vm3, %v91_v52  ;;  %7659 = vmatprep.mubr.msk.f32.mxu0 %vm99_vm3, %v92_v53  ;;  %v1014_v52 = vld [vmem:[%s12553_s0 + $0x82] sm:$0xff] }
  0x36   :  { %7747 = vmatprep.mubr.msk.f32.mxu1 %vm99_vm3, %v92_v53  ;;  %v1015_v53 = vld [vmem:[%s12553_s0 + $0x8a] sm:$0xff] }
  0x38   :  { %7660 = vmatmul.mubr.msk.f32.gmra.mrb[22].mxu0 %vm99_vm3, %v93_v54 }
  0x39   :  { %7748 = vmatmul.mubr.msk.f32.gmra.mrb[22].mxu1 %vm99_vm3, %v93_v54  ;;  %7670 = vmatprep.mubr.msk.f32.mxu0 %vm99_vm3, %v38_v55  ;;  %v1016_v54 = vld [vmem:[%s12553_s0 + $0x92] sm:$0xff] }
  0x3a   :  { %7758 = vmatprep.mubr.msk.f32.mxu1 %vm99_vm3, %v38_v55  ;;  %v1017_v55 = vld [vmem:[%s12553_s0 + $0xa2] sm:$0xff] }
  0x3c   :  { %7671 = vmatmul.mubr.msk.f32.vlgmr.msra.gmra.mrb[0].mxu0 %vm99_vm3, %v39_v58 }
  0x3d   :  { %7759 = vmatmul.mubr.msk.f32.vlgmr.msra.gmra.mrb[0].mxu1 %vm99_vm3, %v39_v58  ;;  %8630 = vmatpush3.bf16.msra.mxu0 %v9459_v32  ;;  %v6731_v32 = vld [vmem:[%s12552_s2 + $0x70] sm:$0xff]  ;;  %v1020_v58 = vld [vmem:[%s12553_s0 + $0xc2] sm:$0xff] }
  0x3e   :  { %8640 = vmatpush3.bf16.msra.mxu1 %v9472_v36  ;;  %7673 = vmatprep.mubr.msk.f32.mxu0 %vm99_vm3, %v40_v61  ;;  %v8661_v36 = vpack.c.bf16 %v6732_v33, %v6731_v32  ;;  %v1552_v32 = vld [vmem:[%s12553_s0 + $0xd3] sm:$0xff]  ;;  %v1553_v33 = vld [vmem:[%s12553_s0 + $0xe3] sm:$0xff] }
  0x3f   :  { %7761 = vmatprep.mubr.msk.f32.mxu1 %vm99_vm3, %v40_v61  ;;  %8633 = vmatprep.subr.msk.bf16.mxu0 %vm9385_vm2, %v8631_v62  ;;  %v1023_v61 = vld [vmem:[%s12553_s0 + $0xe2] sm:$0xff] }
  0x40   :  { %7674 = vmatmul.mubr.msk.f32.gmra.mrb[2].mxu0 %vm99_vm3, %v41_v2  ;;  %8643 = vmatprep.subr.msk.bf16.mxu1 %vm9385_vm2, %v8641_v63 }
  0x41   :  { %7762 = vmatmul.mubr.msk.f32.gmra.mrb[2].mxu1 %vm99_vm3, %v41_v2  ;;  %7676 = vmatprep.mubr.msk.f32.mxu0 %vm99_vm3, %v42_v5  ;;  %v6761_v2 = vld [vmem:[%s12551_s1 + $0x98] sm:$0xf] }
  0x42   :  { %7764 = vmatprep.mubr.msk.f32.mxu1 %vm99_vm3, %v42_v5  ;;  %8636 = vmatpush3.bf16.msk.msra.mxu0 %vm9385_vm2, %v8631_v62  ;;  %v1024_v62 = vld [vmem:[%s12553_s0 + $0xea] sm:$0xff]  ;;  %v6790_v5 = vld [vmem:[%s12552_s2 + $0x98] sm:$0xf] }
  0x43   :  { %8646 = vmatpush3.bf16.msk.msra.mxu1 %vm9385_vm2, %v8641_v63  ;;  %8648 = vmatprep.subr.bf16.mxu0 %v9622_v6  ;;  %v1025_v63 = vld [vmem:[%s12553_s0 + $0xf2] sm:$0xff] }
  0x44   :  { %7677 = vmatmul.mubr.msk.f32.gmra.mrb[4].mxu0 %vm99_vm3, %v43_v8  ;;  %8658 = vmatprep.subr.bf16.mxu1 %v9627_v7 }
  0x45   :  { %7765 = vmatmul.mubr.msk.f32.gmra.mrb[4].mxu1 %vm99_vm3, %v43_v8  ;;  %7679 = vmatprep.mubr.msk.f32.mxu0 %vm99_vm3, %v44_v10  ;;  %v8681_v8 = vpack.c.bf16 %v6790_v5, %v6789_v4  ;;  %v6852_v4 = vld [vmem:[%s12555_s5 + $0x98] sm:$0xff] }
  0x46   :  { %7767 = vmatprep.mubr.msk.f32.mxu1 %vm99_vm3, %v44_v10  ;;  %v6817_v10 = vld [vmem:[%s12554_s4 + $0x78] sm:$0xff] }
  0x48   :  { %7680 = vmatmul.mubr.msk.f32.gmra.mrb[6].mxu0 %vm99_vm3, %v45_v11 }
  0x49   :  { %7768 = vmatmul.mubr.msk.f32.gmra.mrb[6].mxu1 %vm99_vm3, %v45_v11  ;;  %7682 = vmatprep.mubr.msk.f32.mxu0 %vm99_vm3, %v46_v12  ;;  %v6818_v11 = vld [vmem:[%s12554_s4 + $0x80] sm:$0xff] }
  0x4a   :  { %7770 = vmatprep.mubr.msk.f32.mxu1 %vm99_vm3, %v46_v12  ;;  %v1535_v12 = vld [vmem:[%s12553_s0 + $0x23] sm:$0xff] }
  0x4c   :  { %7683 = vmatmul.mubr.msk.f32.gmra.mrb[8].mxu0 %vm99_vm3, %v47_v13 }
  0x4d   :  { %7771 = vmatmul.mubr.msk.f32.gmra.mrb[8].mxu1 %vm99_vm3, %v47_v13  ;;  %7685 = vmatprep.mubr.msk.f32.mxu0 %vm99_vm3, %v48_v14  ;;  %v6848_v13 = vld [vmem:[%s12555_s5 + $0x78] sm:$0xff] }
  0x4e   :  { %7773 = vmatprep.mubr.msk.f32.mxu1 %vm99_vm3, %v48_v14  ;;  %v6849_v14 = vld [vmem:[%s12555_s5 + $0x80] sm:$0xff] }
  0x50   :  { %7686 = vmatmul.mubr.msk.f32.gmra.mrb[10].mxu0 %vm99_vm3, %v49_v15 }
  0x51   :  { %7774 = vmatmul.mubr.msk.f32.gmra.mrb[10].mxu1 %vm99_vm3, %v49_v15  ;;  %7688 = vmatprep.mubr.msk.f32.mxu0 %vm99_vm3, %v50_v16  ;;  %v1536_v15 = vld [vmem:[%s12553_s0 + $0x2b] sm:$0xff] }
  0x52   :  { %7776 = vmatprep.mubr.msk.f32.mxu1 %vm99_vm3, %v50_v16  ;;  %v9942_v16 = vpack.c.bf16 %v6818_v11, %v6817_v10  ;;  %v6824_v10 = vld [vmem:[%s12554_s4 + $0xb0] sm:$0xff]  ;;  %v6854_v11 = vld [vmem:[%s12555_s5 + $0xa8] sm:$0xff] }
  0x54   :  { %7689 = vmatmul.mubr.msk.f32.gmra.mrb[12].mxu0 %vm99_vm3, %v51_v17 }
  0x55   :  { %7777 = vmatmul.mubr.msk.f32.gmra.mrb[12].mxu1 %vm99_vm3, %v51_v17  ;;  %7691 = vmatprep.mubr.msk.f32.mxu0 %vm99_vm3, %v52_v18  ;;  %v9947_v17 = vpack.c.bf16 %v6849_v14, %v6848_v13  ;;  %v6855_v13 = vld [vmem:[%s12555_s5 + $0xb0] sm:$0xff] }
  0x56   :  { %7779 = vmatprep.mubr.msk.f32.mxu1 %vm99_vm3, %v52_v18  ;;  %v1537_v18 = vld [vmem:[%s12553_s0 + $0x33] sm:$0xff]  ;;  %v8755_v14 = vpack.c.bf16 %v6855_v13, %v6854_v11 }
  0x58   :  { %7692 = vmatmul.mubr.msk.f32.gmra.mrb[14].mxu0 %vm99_vm3, %v53_v19 }
  0x59   :  { %7780 = vmatmul.mubr.msk.f32.gmra.mrb[14].mxu1 %vm99_vm3, %v53_v19  ;;  %7694 = vmatprep.mubr.msk.f32.mxu0 %vm99_vm3, %v54_v20  ;;  %v1538_v19 = vld [vmem:[%s12553_s0 + $0x43] sm:$0xff] }
  0x5a   :  { %7782 = vmatprep.mubr.msk.f32.mxu1 %vm99_vm3, %v54_v20  ;;  %v1539_v20 = vld [vmem:[%s12553_s0 + $0x4b] sm:$0xff] }
  0x5c   :  { %7695 = vmatmul.mubr.msk.f32.gmra.mrb[16].mxu0 %vm99_vm3, %v55_v21 }
  0x5d   :  { %7783 = vmatmul.mubr.msk.f32.gmra.mrb[16].mxu1 %vm99_vm3, %v55_v21  ;;  %7697 = vmatprep.mubr.msk.f32.mxu0 %vm99_vm3, %v56_v22  ;;  %v1541_v21 = vld [vmem:[%s12553_s0 + $0x63] sm:$0xff] }
  0x5e   :  { %7785 = vmatprep.mubr.msk.f32.mxu1 %vm99_vm3, %v56_v22  ;;  %v1542_v22 = vld [vmem:[%s12553_s0 + $0x6b] sm:$0xff] }
  0x60   :  { %7698 = vmatmul.mubr.msk.f32.gmra.mrb[18].mxu0 %vm99_vm3, %v57_v23 }
  0x61   :  { %7786 = vmatmul.mubr.msk.f32.gmra.mrb[18].mxu1 %vm99_vm3, %v57_v23  ;;  %7700 = vmatprep.mubr.msk.f32.mxu0 %vm99_vm3, %v58_v24  ;;  %v1543_v23 = vld [vmem:[%s12553_s0 + $0x73] sm:$0xff] }
  0x62   :  { %7788 = vmatprep.mubr.msk.f32.mxu1 %vm99_vm3, %v58_v24  ;;  %v1544_v24 = vld [vmem:[%s12553_s0 + $0x83] sm:$0xff] }
  0x64   :  { %7701 = vmatmul.mubr.msk.f32.gmra.mrb[20].mxu0 %vm99_vm3, %v59_v25 }
  0x65   :  { %7789 = vmatmul.mubr.msk.f32.gmra.mrb[20].mxu1 %vm99_vm3, %v59_v25  ;;  %7703 = vmatprep.mubr.msk.f32.mxu0 %vm99_vm3, %v60_v26  ;;  %v1545_v25 = vld [vmem:[%s12553_s0 + $0x8b] sm:$0xff] }
  0x66   :  { %7791 = vmatprep.mubr.msk.f32.mxu1 %vm99_vm3, %v60_v26  ;;  %v1546_v26 = vld [vmem:[%s12553_s0 + $0x93] sm:$0xff] }
  0x68   :  { %7704 = vmatmul.mubr.msk.f32.gmra.mrb[22].mxu0 %vm99_vm3, %v61_v27 }
  0x69   :  { %7792 = vmatmul.mubr.msk.f32.gmra.mrb[22].mxu1 %vm99_vm3, %v61_v27  ;;  %7802 = vmatprep.mubr.msk.f32.mxu0 %vm99_vm3, %v1002_v28  ;;  %v1547_v27 = vld [vmem:[%s12553_s0 + $0xa3] sm:$0xff] }
  0x6a   :  { %7846 = vmatprep.mubr.msk.f32.mxu1 %vm99_vm3, %v1002_v28  ;;  %v1548_v28 = vld [vmem:[%s12553_s0 + $0xab] sm:$0xff] }
  0x6c   :  { %7803 = vmatmul.mubr.msk.f32.vlgmr.msra.gmra.mrb[0].mxu0 %vm99_vm3, %v1003_v31 }
  0x6d   :  { %7847 = vmatmul.mubr.msk.f32.vlgmr.msra.gmra.mrb[0].mxu1 %vm99_vm3, %v1003_v31  ;;  %8650 = vmatpush3.bf16.msra.mxu0 %v9622_v6  ;;  %v1534_v6 = vld [vmem:[%s12553_s0 + $0x13] sm:$0xff]  ;;  %v1551_v31 = vld [vmem:[%s12553_s0 + $0xcb] sm:$0xff] }
  0x6e   :  { %8660 = vmatpush3.bf16.msra.mxu1 %v9627_v7  ;;  %7805 = vmatprep.mubr.msk.f32.mxu0 %vm99_vm3, %v1004_v34  ;;  %v8671_v7 = vpack.c.bf16 %v6761_v2, %v6760_v1  ;;  %v6821_v2 = vld [vmem:[%s12554_s4 + $0x98] sm:$0xff] }
  0x6f   :  { %7849 = vmatprep.mubr.msk.f32.mxu1 %vm99_vm3, %v1004_v34  ;;  %8653 = vmatprep.subr.msk.bf16.mxu0 %vm9385_vm2, %v8651_v35  ;;  %v1554_v34 = vld [vmem:[%s12553_s0 + $0xeb] sm:$0xff] }
  0x70   :  { %7806 = vmatmul.mubr.msk.f32.gmra.mrb[2].mxu0 %vm99_vm3, %v1005_v39  ;;  %8663 = vmatprep.subr.msk.bf16.mxu1 %vm9385_vm2, %v8661_v36 }
  0x71   :  { %7850 = vmatmul.mubr.msk.f32.gmra.mrb[2].mxu1 %vm99_vm3, %v1005_v39  ;;  %7808 = vmatprep.mubr.msk.f32.mxu0 %vm99_vm3, %v1006_v42  ;;  %v2065_v39 = vld [vmem:[%s12553_s0 + $0x24] sm:$0xff] }
  0x72   :  { %7852 = vmatprep.mubr.msk.f32.mxu1 %vm99_vm3, %v1006_v42  ;;  %8656 = vmatpush3.bf16.msk.msra.mxu0 %vm9385_vm2, %v8651_v35  ;;  %v1555_v35 = vld [vmem:[%s12553_s0 + $0xf3] sm:$0xff]  ;;  %v2068_v42 = vld [vmem:[%s12553_s0 + $0x44] sm:$0xff] }
  0x73   :  { %8666 = vmatpush3.bf16.msk.msra.mxu1 %vm9385_vm2, %v8661_v36  ;;  %8668 = vmatprep.subr.bf16.mxu0 %v9782_v43  ;;  %v2062_v36 = vld [vmem:[%s12553_s0 + $0x4] sm:$0xff] }
  0x74   :  { %7809 = vmatmul.mubr.msk.f32.gmra.mrb[4].mxu0 %vm99_vm3, %v1007_v45  ;;  %8678 = vmatprep.subr.bf16.mxu1 %v9787_v44 }
  0x75   :  { %7853 = vmatmul.mubr.msk.f32.gmra.mrb[4].mxu1 %vm99_vm3, %v1007_v45  ;;  %7811 = vmatprep.mubr.msk.f32.mxu0 %vm99_vm3, %v1008_v46  ;;  %v2071_v45 = vld [vmem:[%s12553_s0 + $0x64] sm:$0xff] }
  0x76   :  { %7855 = vmatprep.mubr.msk.f32.mxu1 %vm99_vm3, %v1008_v46  ;;  %v2072_v46 = vld [vmem:[%s12553_s0 + $0x6c] sm:$0xff] }
  0x78   :  { %7812 = vmatmul.mubr.msk.f32.gmra.mrb[6].mxu0 %vm99_vm3, %v1009_v47 }
  0x79   :  { %7856 = vmatmul.mubr.msk.f32.gmra.mrb[6].mxu1 %vm99_vm3, %v1009_v47  ;;  %7814 = vmatprep.mubr.msk.f32.mxu0 %vm99_vm3, %v1010_v48  ;;  %v2073_v47 = vld [vmem:[%s12553_s0 + $0x74] sm:$0xff] }
  0x7a   :  { %7858 = vmatprep.mubr.msk.f32.mxu1 %vm99_vm3, %v1010_v48  ;;  %v2074_v48 = vld [vmem:[%s12553_s0 + $0x84] sm:$0xff] }
  0x7c   :  { %7815 = vmatmul.mubr.msk.f32.gmra.mrb[8].mxu0 %vm99_vm3, %v1011_v49 }
  0x7d   :  { %7859 = vmatmul.mubr.msk.f32.gmra.mrb[8].mxu1 %vm99_vm3, %v1011_v49  ;;  %7817 = vmatprep.mubr.msk.f32.mxu0 %vm99_vm3, %v1012_v50  ;;  %v2075_v49 = vld [vmem:[%s12553_s0 + $0x8c] sm:$0xff] }
  0x7e   :  { %7861 = vmatprep.mubr.msk.f32.mxu1 %vm99_vm3, %v1012_v50  ;;  %v2076_v50 = vld [vmem:[%s12553_s0 + $0x94] sm:$0xff] }
  0x80   :  { %7818 = vmatmul.mubr.msk.f32.gmra.mrb[10].mxu0 %vm99_vm3, %v1013_v51 }
  0x81   :  { %7862 = vmatmul.mubr.msk.f32.gmra.mrb[10].mxu1 %vm99_vm3, %v1013_v51  ;;  %7820 = vmatprep.mubr.msk.f32.mxu0 %vm99_vm3, %v1014_v52  ;;  %v2077_v51 = vld [vmem:[%s12553_s0 + $0xa4] sm:$0xff] }
  0x82   :  { %7864 = vmatprep.mubr.msk.f32.mxu1 %vm99_vm3, %v1014_v52  ;;  %v2078_v52 = vld [vmem:[%s12553_s0 + $0xac] sm:$0xff] }
  0x84   :  { %7821 = vmatmul.mubr.msk.f32.gmra.mrb[12].mxu0 %vm99_vm3, %v1015_v53 }
  0x85   :  { %7865 = vmatmul.mubr.msk.f32.gmra.mrb[12].mxu1 %vm99_vm3, %v1015_v53  ;;  %7823 = vmatprep.mubr.msk.f32.mxu0 %vm99_vm3, %v1016_v54  ;;  %v2079_v53 = vld [vmem:[%s12553_s0 + $0xb4] sm:$0xff] }
  0x86   :  { %7867 = vmatprep.mubr.msk.f32.mxu1 %vm99_vm3, %v1016_v54  ;;  %v2080_v54 = vld [vmem:[%s12553_s0 + $0xc4] sm:$0xff] }
  0x88   :  { %7824 = vmatmul.mubr.msk.f32.gmra.mrb[14].mxu0 %vm99_vm3, %v1017_v55 }
  0x89   :  { %7868 = vmatmul.mubr.msk.f32.gmra.mrb[14].mxu1 %vm99_vm3, %v1017_v55  ;;  %7826 = vmatprep.mubr.msk.f32.mxu0 %vm99_vm3, %v1018_v56  ;;  %v2081_v55 = vld [vmem:[%s12553_s0 + $0xcc] sm:$0xff] }
  0x8a   :  { %7870 = vmatprep.mubr.msk.f32.mxu1 %vm99_vm3, %v1018_v56  ;;  %v2082_v56 = vld [vmem:[%s12553_s0 + $0xd4] sm:$0xff] }
  0x8c   :  { %7827 = vmatmul.mubr.msk.f32.gmra.mrb[16].mxu0 %vm99_vm3, %v1019_v57 }
  0x8d   :  { %7871 = vmatmul.mubr.msk.f32.gmra.mrb[16].mxu1 %vm99_vm3, %v1019_v57  ;;  %7829 = vmatprep.mubr.msk.f32.mxu0 %vm99_vm3, %v1020_v58  ;;  %v2083_v57 = vld [vmem:[%s12553_s0 + $0xe4] sm:$0xff] }
  0x8e   :  { %7873 = vmatprep.mubr.msk.f32.mxu1 %vm99_vm3, %v1020_v58  ;;  %v2084_v58 = vld [vmem:[%s12553_s0 + $0xec] sm:$0xff] }
  0x90   :  { %7830 = vmatmul.mubr.msk.f32.gmra.mrb[18].mxu0 %vm99_vm3, %v1021_v59 }
  0x91   :  { %7874 = vmatmul.mubr.msk.f32.gmra.mrb[18].mxu1 %vm99_vm3, %v1021_v59  ;;  %7832 = vmatprep.mubr.msk.f32.mxu0 %vm99_vm3, %v1022_v60  ;;  %v2085_v59 = vld [vmem:[%s12553_s0 + $0xf4] sm:$0xff] }
  0x92   :  { %7876 = vmatprep.mubr.msk.f32.mxu1 %vm99_vm3, %v1022_v60  ;;  %v6819_v60 = vld [vmem:[%s12554_s4 + $0x88] sm:$0xff] }
  0x94   :  { %7833 = vmatmul.mubr.msk.f32.gmra.mrb[20].mxu0 %vm99_vm3, %v1023_v61 }
  0x95   :  { %7877 = vmatmul.mubr.msk.f32.gmra.mrb[20].mxu1 %vm99_vm3, %v1023_v61  ;;  %7835 = vmatprep.mubr.msk.f32.mxu0 %vm99_vm3, %v1024_v62  ;;  %v6820_v61 = vld [vmem:[%s12554_s4 + $0x90] sm:$0xff] }
  0x96   :  { %7879 = vmatprep.mubr.msk.f32.mxu1 %vm99_vm3, %v1024_v62  ;;  %v6850_v62 = vld [vmem:[%s12555_s5 + $0x88] sm:$0xff] }
  0x98   :  { %7836 = vmatmul.mubr.msk.f32.gmra.mrb[22].mxu0 %vm99_vm3, %v1025_v63 }
  0x99   :  { %7880 = vmatmul.mubr.msk.f32.gmra.mrb[22].mxu1 %vm99_vm3, %v1025_v63  ;;  %7890 = vmatprep.mubr.msk.f32.mxu0 %vm99_vm3, %v1532_v0  ;;  %v8691_v63 = vpack.c.bf16 %v6820_v61, %v6819_v60 }
  0x9a   :  { %7934 = vmatprep.mubr.msk.f32.mxu1 %vm99_vm3, %v1532_v0  ;;  %v6851_v0 = vld [vmem:[%s12555_s5 + $0x90] sm:$0xff] }
  0x9b   :  { %v8747_v1 = vpack.c.bf16 %v6851_v0, %v6850_v62 }
  0x9c   :  { %7891 = vmatmul.mubr.msk.f32.vlgmr.msra.gmra.mrb[0].mxu0 %vm99_vm3, %v1533_v3 }
  0x9d   :  { %7935 = vmatmul.mubr.msk.f32.vlgmr.msra.gmra.mrb[0].mxu1 %vm99_vm3, %v1533_v3  ;;  %8670 = vmatpush3.bf16.msra.mxu0 %v9782_v43  ;;  %v2069_v43 = vld [vmem:[%s12553_s0 + $0x4c] sm:$0xff]  ;;  %v6822_v3 = vld [vmem:[%s12554_s4 + $0xa0] sm:$0xff] }
  0x9e   :  { %8680 = vmatpush3.bf16.msra.mxu1 %v9787_v44  ;;  %7893 = vmatprep.mubr.msk.f32.mxu0 %vm99_vm3, %v1534_v6  ;;  %v2070_v44 = vld [vmem:[%s12553_s0 + $0x54] sm:$0xff]  ;;  %v8695_v5 = vpack.c.bf16 %v6822_v3, %v6821_v2 }
  0x9f   :  { %7937 = vmatprep.mubr.msk.f32.mxu1 %vm99_vm3, %v1534_v6  ;;  %8673 = vmatprep.subr.msk.bf16.mxu0 %vm9385_vm2, %v8671_v7  ;;  %v6853_v6 = vld [vmem:[%s12555_s5 + $0xa0] sm:$0xff] }
  0xa0   :  { %7894 = vmatmul.mubr.msk.f32.gmra.mrb[2].mxu0 %vm99_vm3, %v1535_v12  ;;  %8683 = vmatprep.subr.msk.bf16.mxu1 %vm9385_vm2, %v8681_v8 }
  0xa1   :  { %7938 = vmatmul.mubr.msk.f32.gmra.mrb[2].mxu1 %vm99_vm3, %v1535_v12  ;;  %7896 = vmatprep.mubr.msk.f32.mxu0 %vm99_vm3, %v1536_v15 }
  0xa2   :  { %7940 = vmatprep.mubr.msk.f32.mxu1 %vm99_vm3, %v1536_v15  ;;  %8676 = vmatpush3.bf16.msk.msra.mxu0 %vm9385_vm2, %v8671_v7  ;;  %v8751_v7 = vpack.c.bf16 %v6853_v6, %v6852_v4  ;;  %v6825_v15 = vld [vmem:[%s12554_s4 + $0xb8] sm:$0xff] }
  0xa3   :  { %8686 = vmatpush3.bf16.msk.msra.mxu1 %vm9385_vm2, %v8681_v8  ;;  %8688 = vmatprep.subr.bf16.mxu0 %v9942_v16  ;;  %v6823_v8 = vld [vmem:[%s12554_s4 + $0xa8] sm:$0xff] }
  0xa4   :  { %7897 = vmatmul.mubr.msk.f32.gmra.mrb[4].mxu0 %vm99_vm3, %v1537_v18  ;;  %8744 = vmatprep.subr.bf16.mxu1 %v9947_v17  ;;  %v8699_v12 = vpack.c.bf16 %v6824_v10, %v6823_v8 }
  0xa5   :  { %7941 = vmatmul.mubr.msk.f32.gmra.mrb[4].mxu1 %vm99_vm3, %v1537_v18  ;;  %7899 = vmatprep.mubr.msk.f32.mxu0 %vm99_vm3, %v1538_v19 }
  0xa6   :  { %7943 = vmatprep.mubr.msk.f32.mxu1 %vm99_vm3, %v1538_v19  ;;  %v6857_v19 = vld [vmem:[%s12555_s5 + $0xc0] sm:$0xff] }
  0xa8   :  { %7900 = vmatmul.mubr.msk.f32.gmra.mrb[6].mxu0 %vm99_vm3, %v1539_v20 }
  0xa9   :  { %7944 = vmatmul.mubr.msk.f32.gmra.mrb[6].mxu1 %vm99_vm3, %v1539_v20  ;;  %7902 = vmatprep.mubr.msk.f32.mxu0 %vm99_vm3, %v1540_v9 }
  0xaa   :  { %7946 = vmatprep.mubr.msk.f32.mxu1 %vm99_vm3, %v1540_v9  ;;  %v6827_v9 = vld [vmem:[%s12554_s4 + $0xc8] sm:$0xff] }
  0xac   :  { %7903 = vmatmul.mubr.msk.f32.gmra.mrb[8].mxu0 %vm99_vm3, %v1541_v21 }
  0xad   :  { %7947 = vmatmul.mubr.msk.f32.gmra.mrb[8].mxu1 %vm99_vm3, %v1541_v21  ;;  %7905 = vmatprep.mubr.msk.f32.mxu0 %vm99_vm3, %v1542_v22  ;;  %v6828_v21 = vld [vmem:[%s12554_s4 + $0xd0] sm:$0xff] }
  0xae   :  { %7949 = vmatprep.mubr.msk.f32.mxu1 %vm99_vm3, %v1542_v22  ;;  %v6858_v22 = vld [vmem:[%s12555_s5 + $0xc8] sm:$0xff] }
  0xb0   :  { %7906 = vmatmul.mubr.msk.f32.gmra.mrb[10].mxu0 %vm99_vm3, %v1543_v23 }
  0xb1   :  { %7950 = vmatmul.mubr.msk.f32.gmra.mrb[10].mxu1 %vm99_vm3, %v1543_v23  ;;  %7908 = vmatprep.mubr.msk.f32.mxu0 %vm99_vm3, %v1544_v24  ;;  %v8707_v23 = vpack.c.bf16 %v6828_v21, %v6827_v9 }
  0xb2   :  { %7952 = vmatprep.mubr.msk.f32.mxu1 %vm99_vm3, %v1544_v24  ;;  %v6859_v24 = vld [vmem:[%s12555_s5 + $0xd0] sm:$0xff] }
  0xb4   :  { %7909 = vmatmul.mubr.msk.f32.gmra.mrb[12].mxu0 %vm99_vm3, %v1545_v25 }
  0xb5   :  { %7953 = vmatmul.mubr.msk.f32.gmra.mrb[12].mxu1 %vm99_vm3, %v1545_v25  ;;  %7911 = vmatprep.mubr.msk.f32.mxu0 %vm99_vm3, %v1546_v26  ;;  %v8763_v25 = vpack.c.bf16 %v6859_v24, %v6858_v22 }
  0xb6   :  { %7955 = vmatprep.mubr.msk.f32.mxu1 %vm99_vm3, %v1546_v26  ;;  %v6829_v26 = vld [vmem:[%s12554_s4 + $0xd8] sm:$0xff] }
  0xb8   :  { %7912 = vmatmul.mubr.msk.f32.gmra.mrb[14].mxu0 %vm99_vm3, %v1547_v27 }
  0xb9   :  { %7956 = vmatmul.mubr.msk.f32.gmra.mrb[14].mxu1 %vm99_vm3, %v1547_v27  ;;  %7914 = vmatprep.mubr.msk.f32.mxu0 %vm99_vm3, %v1548_v28  ;;  %v6830_v27 = vld [vmem:[%s12554_s4 + $0xe0] sm:$0xff] }
  0xba   :  { %7958 = vmatprep.mubr.msk.f32.mxu1 %vm99_vm3, %v1548_v28  ;;  %v6860_v28 = vld [vmem:[%s12555_s5 + $0xd8] sm:$0xff] }
  0xbc   :  { %7915 = vmatmul.mubr.msk.f32.gmra.mrb[16].mxu0 %vm99_vm3, %v1549_v29 }
  0xbd   :  { %7959 = vmatmul.mubr.msk.f32.gmra.mrb[16].mxu1 %vm99_vm3, %v1549_v29  ;;  %7917 = vmatprep.mubr.msk.f32.mxu0 %vm99_vm3, %v1550_v30  ;;  %v8711_v29 = vpack.c.bf16 %v6830_v27, %v6829_v26 }
  0xbe   :  { %7961 = vmatprep.mubr.msk.f32.mxu1 %vm99_vm3, %v1550_v30  ;;  %v6861_v30 = vld [vmem:[%s12555_s5 + $0xe0] sm:$0xff] }
  0xc0   :  { %7918 = vmatmul.mubr.msk.f32.gmra.mrb[18].mxu0 %vm99_vm3, %v1551_v31 }
  0xc1   :  { %7962 = vmatmul.mubr.msk.f32.gmra.mrb[18].mxu1 %vm99_vm3, %v1551_v31  ;;  %7920 = vmatprep.mubr.msk.f32.mxu0 %vm99_vm3, %v1552_v32  ;;  %v9303_v31 = vmov 1983009808  }
  0xc2   :  { %7964 = vmatprep.mubr.msk.f32.mxu1 %vm99_vm3, %v1552_v32  ;;  %v2697_v32 = vunpack.c.l.s4 %v9303_v31 }
  0xc4   :  { %7921 = vmatmul.mubr.msk.f32.gmra.mrb[20].mxu0 %vm99_vm3, %v1553_v33 }
  0xc5   :  { %7965 = vmatmul.mubr.msk.f32.gmra.mrb[20].mxu1 %vm99_vm3, %v1553_v33  ;;  %7923 = vmatprep.mubr.msk.f32.mxu0 %vm99_vm3, %v1554_v34  ;;  %v2699_v33 = vlaneseq }
  0xc6   :  { %7967 = vmatprep.mubr.msk.f32.mxu1 %vm99_vm3, %v1554_v34  ;;  %v8767_v34 = vpack.c.bf16 %v6861_v30, %v6860_v28 }
  0xc8   :  { %7924 = vmatmul.mubr.msk.f32.gmra.mrb[22].mxu0 %vm99_vm3, %v1555_v35 }
  0xc9   :  { %7968 = vmatmul.mubr.msk.f32.gmra.mrb[22].mxu1 %vm99_vm3, %v1555_v35  ;;  %7978 = vmatprep.mubr.msk.f32.mxu0 %vm99_vm3, %v2062_v36 }
  0xca   :  { %8022 = vmatprep.mubr.msk.f32.mxu1 %vm99_vm3, %v2062_v36  ;;  %v2698_v36 = vunpack.c.0.s8 %v2697_v32 }
  0xcc   :  { %7979 = vmatmul.mubr.msk.f32.vlgmr.msra.gmra.mrb[0].mxu0 %vm99_vm3, %v2063_v37 }
  0xcd   :  { %8023 = vmatmul.mubr.msk.f32.vlgmr.msra.gmra.mrb[0].mxu1 %vm99_vm3, %v2063_v37  ;;  %7981 = vmatprep.mubr.msk.f32.mxu0 %vm99_vm3, %v2064_v38  ;;  %v2700_v37 = vshrl.u32 %v2699_v33, 7 }
  0xce   :  { %8025 = vmatprep.mubr.msk.f32.mxu1 %vm99_vm3, %v2064_v38  ;;  %8690 = vmatpush3.bf16.msra.mxu0 %v9942_v16  ;;  %v6826_v16 = vld [vmem:[%s12554_s4 + $0xc0] sm:$0xff] }
  0xcf   :  { %8746 = vmatpush3.bf16.msra.mxu1 %v9947_v17  ;;  %8692 = vmatprep.subr.bf16.mxu0 %v8691_v63  ;;  %v6856_v17 = vld [vmem:[%s12555_s5 + $0xb8] sm:$0xff]  ;;  %v8703_v18 = vpack.c.bf16 %v6826_v16, %v6825_v15 }
  0xd0   :  { %7982 = vmatmul.mubr.msk.f32.gmra.mrb[2].mxu0 %vm99_vm3, %v2065_v39  ;;  %8748 = vmatprep.subr.bf16.mxu1 %v8747_v1  ;;  %v8759_v20 = vpack.c.bf16 %v6857_v19, %v6856_v17 }
  0xd1   :  { %8026 = vmatmul.mubr.msk.f32.gmra.mrb[2].mxu1 %vm99_vm3, %v2065_v39  ;;  %7984 = vmatprep.mubr.msk.f32.mxu0 %vm99_vm3, %v2066_v40  ;;  %v10250_v39 = vld [vmem:[%s12556_s3] ss:$0 sm:$0xff] }
  0xd2   :  { %8028 = vmatprep.mubr.msk.f32.mxu1 %vm99_vm3, %v2066_v40  ;;  %8694 = vmatpush3.bf16.msra.mxu0 %v8691_v63 }
  0xd3   :  { %8750 = vmatpush3.bf16.msra.mxu1 %v8747_v1  ;;  %8696 = vmatprep.subr.bf16.mxu0 %v8695_v5 }
  0xd4   :  { %7985 = vmatmul.mubr.msk.f32.gmra.mrb[4].mxu0 %vm99_vm3, %v2067_v41  ;;  %8752 = vmatprep.subr.bf16.mxu1 %v8751_v7 }
  0xd5   :  { %8029 = vmatmul.mubr.msk.f32.gmra.mrb[4].mxu1 %vm99_vm3, %v2067_v41  ;;  %7987 = vmatprep.mubr.msk.f32.mxu0 %vm99_vm3, %v2068_v42 }
  0xd6   :  { %8031 = vmatprep.mubr.msk.f32.mxu1 %vm99_vm3, %v2068_v42  ;;  %8698 = vmatpush3.bf16.msra.mxu0 %v8695_v5 }
  0xd7   :  { %8754 = vmatpush3.bf16.msra.mxu1 %v8751_v7  ;;  %8700 = vmatprep.subr.bf16.mxu0 %v8699_v12 }
  0xd8   :  { %7988 = vmatmul.mubr.msk.f32.gmra.mrb[6].mxu0 %vm99_vm3, %v2069_v43  ;;  %8756 = vmatprep.subr.bf16.mxu1 %v8755_v14 }
  0xd9   :  { %8032 = vmatmul.mubr.msk.f32.gmra.mrb[6].mxu1 %vm99_vm3, %v2069_v43  ;;  %7990 = vmatprep.mubr.msk.f32.mxu0 %vm99_vm3, %v2070_v44 }
  0xda   :  { %8034 = vmatprep.mubr.msk.f32.mxu1 %vm99_vm3, %v2070_v44  ;;  %8702 = vmatpush3.bf16.msra.mxu0 %v8699_v12 }
  0xdb   :  { %8758 = vmatpush3.bf16.msra.mxu1 %v8755_v14  ;;  %8704 = vmatprep.subr.bf16.mxu0 %v8703_v18 }
  0xdc   :  { %7991 = vmatmul.mubr.msk.f32.gmra.mrb[8].mxu0 %vm99_vm3, %v2071_v45  ;;  %8760 = vmatprep.subr.bf16.mxu1 %v8759_v20 }
  0xdd   :  { %8035 = vmatmul.mubr.msk.f32.gmra.mrb[8].mxu1 %vm99_vm3, %v2071_v45  ;;  %7993 = vmatprep.mubr.msk.f32.mxu0 %vm99_vm3, %v2072_v46  ;;  %v10253_v45 = vsub.s32 %v2698_v36, %v2700_v37 }
  0xde   :  { %8037 = vmatprep.mubr.msk.f32.mxu1 %vm99_vm3, %v2072_v46  ;;  %8706 = vmatpush3.bf16.msra.mxu0 %v8703_v18 }
  0xdf   :  { %8762 = vmatpush3.bf16.msra.mxu1 %v8759_v20  ;;  %8708 = vmatprep.subr.bf16.mxu0 %v8707_v23  ;;  %12687 = vst [vmem:[#allocation2_spill] sm:$0xff] %v10253_v45 }
  0xe0   :  { %7994 = vmatmul.mubr.msk.f32.gmra.mrb[10].mxu0 %vm99_vm3, %v2073_v47  ;;  %8764 = vmatprep.subr.bf16.mxu1 %v8763_v25 }
  0xe1   :  { %8038 = vmatmul.mubr.msk.f32.gmra.mrb[10].mxu1 %vm99_vm3, %v2073_v47  ;;  %7996 = vmatprep.mubr.msk.f32.mxu0 %vm99_vm3, %v2074_v48 }
  0xe2   :  { %8040 = vmatprep.mubr.msk.f32.mxu1 %vm99_vm3, %v2074_v48  ;;  %8710 = vmatpush3.bf16.msra.mxu0 %v8707_v23 }
  0xe3   :  { %8766 = vmatpush3.bf16.msra.mxu1 %v8763_v25  ;;  %8712 = vmatprep.subr.bf16.mxu0 %v8711_v29 }
  0xe4   :  { %7997 = vmatmul.mubr.msk.f32.gmra.mrb[12].mxu0 %vm99_vm3, %v2075_v49  ;;  %8768 = vmatprep.subr.bf16.mxu1 %v8767_v34 }
  0xe5   :  { %8041 = vmatmul.mubr.msk.f32.gmra.mrb[12].mxu1 %vm99_vm3, %v2075_v49  ;;  %7999 = vmatprep.mubr.msk.f32.mxu0 %vm99_vm3, %v2076_v50 }
  0xe6   :  { %8043 = vmatprep.mubr.msk.f32.mxu1 %vm99_vm3, %v2076_v50  ;;  %8714 = vmatpush3.bf16.msra.mxu0 %v8711_v29 }
  0xe7   :  { %8770 = vmatpush3.bf16.msra.mxu1 %v8767_v34 }
  0xe8   :  { %8000 = vmatmul.mubr.msk.f32.gmra.mrb[14].mxu0 %vm99_vm3, %v2077_v51 }
  0xe9   :  { %8044 = vmatmul.mubr.msk.f32.gmra.mrb[14].mxu1 %vm99_vm3, %v2077_v51  ;;  %8002 = vmatprep.mubr.msk.f32.mxu0 %vm99_vm3, %v2078_v52 }
  0xea   :  { %8046 = vmatprep.mubr.msk.f32.mxu1 %vm99_vm3, %v2078_v52 }
  0xec   :  { %8003 = vmatmul.mubr.msk.f32.gmra.mrb[16].mxu0 %vm99_vm3, %v2079_v53 }
  0xed   :  { %8047 = vmatmul.mubr.msk.f32.gmra.mrb[16].mxu1 %vm99_vm3, %v2079_v53  ;;  %8005 = vmatprep.mubr.msk.f32.mxu0 %vm99_vm3, %v2080_v54 }
  0xee   :  { %8049 = vmatprep.mubr.msk.f32.mxu1 %vm99_vm3, %v2080_v54 }
  0xf0   :  { %8006 = vmatmul.mubr.msk.f32.gmra.mrb[18].mxu0 %vm99_vm3, %v2081_v55 }
  0xf1   :  { %8050 = vmatmul.mubr.msk.f32.gmra.mrb[18].mxu1 %vm99_vm3, %v2081_v55  ;;  %8008 = vmatprep.mubr.msk.f32.mxu0 %vm99_vm3, %v2082_v56 }
  0xf2   :  { %8052 = vmatprep.mubr.msk.f32.mxu1 %vm99_vm3, %v2082_v56 }
  0xf4   :  { %8009 = vmatmul.mubr.msk.f32.gmra.mrb[20].mxu0 %vm99_vm3, %v2083_v57 }
  0xf5   :  { %8053 = vmatmul.mubr.msk.f32.gmra.mrb[20].mxu1 %vm99_vm3, %v2083_v57  ;;  %8011 = vmatprep.mubr.msk.f32.mxu0 %vm99_vm3, %v2084_v58 }
  0xf6   :  { %8055 = vmatprep.mubr.msk.f32.mxu1 %vm99_vm3, %v2084_v58 }
  0xf8   :  { %8012 = vmatmul.mubr.msk.f32.gmra.mrb[22].mxu0 %vm99_vm3, %v2085_v59 }
  0xf9   :  { %8056 = vmatmul.mubr.msk.f32.gmra.mrb[22].mxu1 %vm99_vm3, %v2085_v59 }
 0x19f   :  { %v7980_v35 = vpop.f32.mrb[0].mxu0 }
 0x1a0   :  { %v8024_v38 = vpop.f32.mrb[0].mxu1  ;;  %v2232_v40 = vpop.f32.mrb[1].mxu0 }
 0x1a1   :  { %v2593_v41 = vmax.f32 %v7980_v35, %v8024_v38  ;;  %v2449_v42 = vpop.f32.mrb[1].mxu1 }
 0x1a2   :  { %v2592_v43 = vmax.f32 %v2232_v40, %v2449_v42 }
 0x1a3   :  { %v2624_v44 = vadd.f32 %v10250_v39, %v2593_v41  ;;  %v7983_v46 = vpop.f32.mrb[2].mxu0 }
 0x1a4   :  { %v2623_v47 = vadd.f32 %v10250_v39, %v2592_v43  ;;  %v8027_v48 = vpop.f32.mrb[2].mxu1  ;;  %v10256_v49 = vpop.f32.mrb[3].mxu0 }
 0x1a5   :  { %v2648_v50 = vmax.f32 %v2624_v44, 0.0  ;;  %v2595_v51 = vmax.f32 %v7983_v46, %v8027_v48  ;;  %v10258_v52 = vpop.f32.mrb[3].mxu1 }
 0x1a6   :  { %v2647_v53 = vmax.f32 %v2623_v47, 0.0  ;;  %v2594_v54 = vmax.f32 %v10256_v49, %v10258_v52 }
 0x1a7   :  { %v2712_v55 = vcombine.high %v2648_v50, %v2648_v50  ;;  %v2719_v56 = vrot.slane %v2648_v50, %v10253_v45  ;;  %v10263_v57 = vpop.f32.mrb[4].mxu0  ;;  %v2626_v22 = vadd.f32 %v10250_v39, %v2595_v51 }
 0x1a8   :  { %v2695_v58 = vcombine.high %v2647_v53, %v2647_v53  ;;  %v2702_v59 = vrot.slane %v2647_v53, %v10253_v45  ;;  %v10266_v60 = vpop.f32.mrb[4].mxu1  ;;  %v10268_v61 = vpop.f32.mrb[5].mxu0  ;;  %v2625_v51 = vadd.f32 %v10250_v39, %v2594_v54  ;;  %v6831_v54 = vld [vmem:[%s12554_s4 + $0xe8] sm:$0xff] }
 0x1a9   :  { %v2726_v62 = vrot.slane %v2712_v55, %v10253_v45  ;;  %v2727_v63 = vcombine.high %v2719_v56, %v2719_v56  ;;  %v3228_v0 = vsel %vm3199_vm4, %v2719_v56, -inf  ;;  %v10272_v1 = vpop.f32.mrb[5].mxu1  ;;  %v2650_v35 = vmax.f32 %v2626_v22, 0.0  ;;  %8086 = vmatprep.subr.mxu0 %v6831_v54 }
 0x1aa   :  { %v3229_v2 = vrot.slane %v3228_v0, 4  ;;  %v2709_v3 = vrot.slane %v2695_v58, %v10253_v45  ;;  %v2710_v4 = vcombine.high %v2702_v59, %v2702_v59  ;;  %v3200_v5 = vsel %vm3199_vm4, %v2702_v59, -inf  ;;  %8087 = vmatpush3.msra.mxu0 %v6831_v54 }
 0x1ab   :  { %v2728_v6 = vcombine.high %v2726_v62, %v2726_v62  ;;  %v3235_v7 = vsel %vm3199_vm4, %v2727_v63, -inf  ;;  %v3242_v8 = vsel %vm3199_vm4, %v2726_v62, -inf  ;;  %v3201_v10 = vrot.slane %v3200_v5, 4  ;;  %v10278_v11 = vpop.f32.mrb[6].mxu0 }
 0x1ac   :  { %v3230_v12 = vmax.f32 %v3228_v0, %v3229_v2  ;;  %v3236_v13 = vrot.slane %v3235_v7, 4  ;;  %v3243_v14 = vrot.slane %v3242_v8, 4  ;;  %v10280_v15 = vpop.f32.mrb[6].mxu1  ;;  %v10282_v16 = vpop.f32.mrb[7].mxu0  ;;  %v3207_v19 = vsel %vm3199_vm4, %v2710_v4, -inf  ;;  %v6862_v4 = vld [vmem:[%s12555_s5 + $0xe8] sm:$0xff] }
 0x1ad   :  { %v3249_v17 = vsel %vm3199_vm4, %v2728_v6, -inf  ;;  %v3202_v18 = vmax.f32 %v3200_v5, %v3201_v10  ;;  %v3214_v20 = vsel %vm3199_vm4, %v2709_v3, -inf  ;;  %v10287_v9 = vpop.f32.mrb[7].mxu1  ;;  %v2711_v21 = vcombine.high %v2709_v3, %v2709_v3  ;;  %8170 = vmatprep.subr.mxu1 %v6862_v4 }
 0x1ae   :  { %v3231_v23 = vrot.slane %v3230_v12, 2  ;;  %v3250_v24 = vrot.slane %v3249_v17, 4  ;;  %v3208_v25 = vrot.slane %v3207_v19, 4  ;;  %v3237_v27 = vmax.f32 %v3235_v7, %v3236_v13  ;;  %8171 = vmatpush3.msra.mxu1 %v6862_v4 }
 0x1af   :  { %v10290_v26 = vpop.f32.mrb[8].mxu0  ;;  %v3215_v28 = vrot.slane %v3214_v20, 4  ;;  %v3244_v31 = vmax.f32 %v3242_v8, %v3243_v14  ;;  %v3203_v32 = vrot.slane %v3202_v18, 2  ;;  %v3221_v34 = vsel %vm3199_vm4, %v2711_v21, -inf }
 0x1b0   :  { %v10292_v29 = vpop.f32.mrb[8].mxu1  ;;  %v10294_v30 = vpop.f32.mrb[9].mxu0  ;;  %v3232_v36 = vmax.f32 %v3230_v12, %v3231_v23  ;;  %v3251_v37 = vmax.f32 %v3249_v17, %v3250_v24  ;;  %v3209_v38 = vmax.f32 %v3207_v19, %v3208_v25  ;;  %v3238_v41 = vrot.slane %v3237_v27, 2 }
 0x1b1   :  { %v10296_v33 = vpop.f32.mrb[9].mxu1  ;;  %v3216_v42 = vmax.f32 %v3214_v20, %v3215_v28  ;;  %v3245_v46 = vrot.slane %v3244_v31, 2  ;;  %v3204_v47 = vmax.f32 %v3202_v18, %v3203_v32  ;;  %v3222_v48 = vrot.slane %v3221_v34, 4 }
 0x1b2   :  { %v2746_v50 = vcombine.high %v2650_v35, %v2650_v35  ;;  %v3233_v52 = vrot.slane %v3232_v36, 1  ;;  %v3252_v53 = vrot.slane %v3251_v37, 2  ;;  %v3210_v55 = vrot.slane %v3209_v38, 2 }
 0x1b3   :  { %v10299_v40 = vpop.f32.mrb[10].mxu0  ;;  %v2753_v56 = vrot.slane %v2650_v35, %v10253_v45  ;;  %v3239_v59 = vmax.f32 %v3237_v27, %v3238_v41  ;;  %v3217_v62 = vrot.slane %v3216_v42, 2  ;;  %v2597_v0 = vmax.f32 %v10263_v57, %v10266_v60 }
 0x1b4   :  { %v10301_v43 = vpop.f32.mrb[10].mxu1  ;;  %v10303_v44 = vpop.f32.mrb[11].mxu0  ;;  %v2760_v63 = vrot.slane %v2746_v50, %v10253_v45  ;;  %v3246_v5 = vmax.f32 %v3244_v31, %v3245_v46  ;;  %v3205_v6 = vrot.slane %v3204_v47, 1  ;;  %v3223_v7 = vmax.f32 %v3221_v34, %v3222_v48 }
 0x1b5   :  { %v10305_v49 = vpop.f32.mrb[11].mxu1  ;;  %v2761_v8 = vcombine.high %v2753_v56, %v2753_v56  ;;  %v3284_v60 = vsel %vm3199_vm4, %v2753_v56, -inf  ;;  %v10328_v13 = vmax.f32 %v2625_v51, 0.0  ;;  %v3253_v14 = vmax.f32 %v3251_v37, %v3252_v53 }
 0x1b6   :  { %v2762_v57 = vcombine.high %v2760_v63, %v2760_v63  ;;  %v3298_v12 = vsel %vm3199_vm4, %v2760_v63, -inf  ;;  %v3211_v17 = vmax.f32 %v3209_v38, %v3210_v55  ;;  %v3285_v18 = vrot.slane %v3284_v60, 4 }
 0x1b7   :  { %v10309_v58 = vpop.f32.mrb[12].mxu0  ;;  %v3291_v19 = vsel %vm3199_vm4, %v2761_v8, -inf  ;;  %v3218_v21 = vmax.f32 %v3216_v42, %v3217_v62  ;;  %v3299_v23 = vrot.slane %v3298_v12, 4  ;;  %v10338_v28 = vmax.f32 %v3232_v36, %v3233_v52 }
 0x1b8   :  { %v10314_v2 = vpop.f32.mrb[12].mxu1  ;;  %v10316_v3 = vpop.f32.mrb[13].mxu0  ;;  %v3292_v22 = vrot.slane %v3291_v19, 4  ;;  %v3305_v24 = vsel %vm3199_vm4, %v2762_v57, -inf  ;;  %v3240_v31 = vrot.slane %v3239_v59, 1  ;;  %v3224_v32 = vrot.slane %v3223_v7, 2 }
 0x1b9   :  { %v10324_v10 = vpop.f32.mrb[13].mxu1  ;;  %12688 = vst [vmem:[#allocation3_spill] sm:$0xff] %v10338_v28  ;;  %v3286_v34 = vmax.f32 %v3284_v60, %v3285_v18  ;;  %v3247_v37 = vrot.slane %v3246_v5, 1  ;;  %v3300_v41 = vmax.f32 %v3298_v12, %v3299_v23  ;;  %v10344_v42 = vrot.slane %v10328_v13, %v10253_v45 }
 0x1ba   :  { %v3293_v38 = vmax.f32 %v3291_v19, %v3292_v22  ;;  %v3254_v46 = vrot.slane %v3253_v14, 1  ;;  %v3212_v48 = vrot.slane %v3211_v17, 1  ;;  %v3306_v51 = vrot.slane %v3305_v24, 4 }
 0x1bb   :  { %v10331_v20 = vpop.f32.mrb[14].mxu0  ;;  %v3287_v50 = vrot.slane %v3286_v34, 2  ;;  %v3206_v36 = vmax.f32 %v3204_v47, %v3205_v6  ;;  %v3219_v52 = vrot.slane %v3218_v21, 1  ;;  %v3301_v56 = vrot.slane %v3300_v41, 2 }
 0x1bc   :  { %v10334_v25 = vpop.f32.mrb[14].mxu1  ;;  %v10336_v27 = vpop.f32.mrb[15].mxu0  ;;  %v3294_v55 = vrot.slane %v3293_v38, 2  ;;  %v10352_v54 = vmax.f32 %v3239_v59, %v3240_v31  ;;  %v3225_v4 = vmax.f32 %v3223_v7, %v3224_v32  ;;  %v2628_v57 = vadd.f32 %v10250_v39, %v2597_v0 }
 0x1bd   :  { %v10340_v35 = vpop.f32.mrb[15].mxu1  ;;  %v3288_v8 = vmax.f32 %v3286_v34, %v3287_v50  ;;  %v10357_v12 = vmax.f32 %v3246_v5, %v3247_v37  ;;  %v3302_v47 = vmax.f32 %v3300_v41, %v3301_v56  ;;  %v3256_v6 = vsel %vm3199_vm4, %v10344_v42, -inf }
 0x1be   :  { %12689 = vst [vmem:[#allocation4_spill] sm:$0xff] %v10352_v54  ;;  %v3295_v18 = vmax.f32 %v3293_v38, %v3294_v55  ;;  %v10361_v19 = vmax.f32 %v3253_v14, %v3254_v46  ;;  %v10363_v22 = vmax.f32 %v3211_v17, %v3212_v48  ;;  %v3307_v59 = vmax.f32 %v3305_v24, %v3306_v51 }
 0x1bf   :  { %v10346_v53 = vpop.f32.mrb[16].mxu0  ;;  %12690 = vst [vmem:[#allocation5_spill] sm:$0xff] %v10357_v12  ;;  %v3289_v23 = vrot.slane %v3288_v8, 1  ;;  %v10367_v7 = vmax.f32 %v3218_v21, %v3219_v52  ;;  %v3303_v32 = vrot.slane %v3302_v47, 1  ;;  %v2729_v5 = vcombine.high %v10328_v13, %v10328_v13 }
 0x1c0   :  { %v10348_v62 = vpop.f32.mrb[16].mxu1  ;;  %v10350_v63 = vpop.f32.mrb[17].mxu0  ;;  %12691 = vst [vmem:[#allocation6_spill] sm:$0xff] %v10361_v19  ;;  %12692 = vst [vmem:[#allocation7_spill] sm:$0xff] %v10363_v22  ;;  %v3296_v0 = vrot.slane %v3295_v18, 1  ;;  %v3226_v38 = vrot.slane %v3225_v4, 1  ;;  %v2596_v21 = vmax.f32 %v10268_v61, %v10272_v1  ;;  %v2599_v13 = vmax.f32 %v10278_v11, %v10280_v15 }
 0x1c1   :  { %v10355_v60 = vpop.f32.mrb[17].mxu1  ;;  %12694 = vst [vmem:[#allocation9_spill] sm:$0xff] %v10367_v7  ;;  %v3290_v14 = vmax.f32 %v3288_v8, %v3289_v23  ;;  %v3257_v41 = vrot.slane %v3256_v6, 4  ;;  %v2652_v17 = vmax.f32 %v2628_v57, 0.0  ;;  %v10379_v48 = vmax.f32 %v3302_v47, %v3303_v32 }
 0x1c2   :  { %v10377_v24 = vmax.f32 %v3295_v18, %v3296_v0  ;;  %v3308_v50 = vrot.slane %v3307_v59, 2  ;;  %v2744_v51 = vcombine.high %v10344_v42, %v10344_v42  ;;  %v10391_v8 = vrot.slane %v2729_v5, %v10253_v45 }
 0x1c3   :  { %v10365_v31 = vpop.f32.mrb[18].mxu0  ;;  %v2780_v52 = vcombine.high %v2652_v17, %v2652_v17  ;;  %v2787_v55 = vrot.slane %v2652_v17, %v10253_v45  ;;  %v2627_v57 = vadd.f32 %v10250_v39, %v2596_v21  ;;  %v2630_v61 = vadd.f32 %v10250_v39, %v2599_v13 }
 0x1c4   :  { %12693 = vst [vmem:[#allocation8_spill] sm:$0xff] %v10365_v31  ;;  %v10371_v34 = vpop.f32.mrb[18].mxu1  ;;  %v10373_v37 = vpop.f32.mrb[19].mxu0  ;;  %v4182_v56 = vsel %vm3982_vm5, %v10377_v24, %v3290_v14  ;;  %12698 = vst [vmem:[#allocation13_spill] sm:$0xff] %v10391_v8  ;;  %v3258_v11 = vmax.f32 %v3256_v6, %v3257_v41  ;;  %v10403_v32 = vmax.f32 %v3225_v4, %v3226_v38  ;;  %v3263_v17 = vsel %vm3199_vm4, %v2744_v51, -inf }
 0x1c5   :  { %12695 = vst [vmem:[#allocation10_spill] sm:$0xff] %v10371_v34  ;;  %12696 = vst [vmem:[#allocation11_spill] sm:$0xff] %v10373_v37  ;;  %v10375_v46 = vpop.f32.mrb[19].mxu1  ;;  %v10397_v1 = vsel %vm3984_vm6, %v10379_v48, %v4182_v56  ;;  %v2794_v15 = vrot.slane %v2780_v52, %v10253_v45  ;;  %v2795_v42 = vcombine.high %v2787_v55, %v2787_v55  ;;  %v3340_v18 = vsel %vm3199_vm4, %v2787_v55, -inf }
 0x1c6   :  { %12697 = vst [vmem:[#allocation12_spill] sm:$0xff] %v10375_v46  ;;  %12699 = vst [vmem:[#allocation14_spill] sm:$0xff] %v10397_v1  ;;  %v2651_v47 = vmax.f32 %v2627_v57, 0.0  ;;  %v2654_v23 = vmax.f32 %v2630_v61, 0.0  ;;  %v10407_v5 = vsel %vm3982_vm5, %v10363_v22, %v3206_v36  ;;  %v3309_v14 = vmax.f32 %v3307_v59, %v3308_v50 }
 0x1c7   :  { %12700 = vst [vmem:[#allocation15_spill] sm:$0xff] %v10403_v32  ;;  %12701 = vst [vmem:[#allocation16_spill] sm:$0xff] %v10407_v5  ;;  %v3270_v6 = vsel %vm3199_vm4, %v10391_v8, -inf  ;;  %v2796_v41 = vcombine.high %v2794_v15, %v2794_v15  ;;  %v3341_v55 = vrot.slane %v3340_v18, 4  ;;  %v3347_v4 = vsel %vm3199_vm4, %v2795_v42, -inf  ;;  %v10417_v36 = vpop.f32.mrb[20].mxu0 }
 0x1c8   :  { %v2763_v21 = vcombine.high %v2651_v47, %v2651_v47  ;;  %v2770_v13 = vrot.slane %v2651_v47, %v10253_v45  ;;  %v3354_v38 = vsel %vm3199_vm4, %v2794_v15, -inf  ;;  %12702 = vst [vmem:[#allocation17_spill] sm:$0xff] %v10417_v36  ;;  %v10419_v59 = vpop.f32.mrb[20].mxu1  ;;  %v3259_v50 = vrot.slane %v3258_v11, 2  ;;  %v10422_v61 = vpop.f32.mrb[21].mxu0 }
 0x1c9   :  { %12703 = vst [vmem:[#allocation18_spill] sm:$0xff] %v10419_v59  ;;  %v3264_v51 = vrot.slane %v3263_v17, 4  ;;  %v2814_v57 = vcombine.high %v2654_v23, %v2654_v23  ;;  %12704 = vst [vmem:[#allocation19_spill] sm:$0xff] %v10422_v61  ;;  %v10424_v47 = vpop.f32.mrb[21].mxu1  ;;  %v3310_v0 = vrot.slane %v3309_v14, 1  ;;  %v3271_v52 = vrot.slane %v3270_v6, 4 }
 0x1ca   :  { %v2777_v56 = vrot.slane %v2763_v21, %v10253_v45  ;;  %12705 = vst [vmem:[#allocation20_spill] sm:$0xff] %v10424_v47  ;;  %v2778_v8 = vcombine.high %v2770_v13, %v2770_v13  ;;  %v3312_v42 = vsel %vm3199_vm4, %v2770_v13, -inf  ;;  %v3348_v1 = vrot.slane %v3347_v4, 4 }
 0x1cb   :  { %v3355_v15 = vrot.slane %v3354_v38, 4  ;;  %v3361_v5 = vsel %vm3199_vm4, %v2796_v41, -inf  ;;  %v3342_v59 = vmax.f32 %v3340_v18, %v3341_v55  ;;  %v3313_v37 = vrot.slane %v3312_v42, 4  ;;  %v10430_v31 = vpop.f32.mrb[22].mxu0 }
 0x1cc   :  { %v2779_v36 = vcombine.high %v2777_v56, %v2777_v56  ;;  %v3319_v46 = vsel %vm3199_vm4, %v2778_v8, -inf  ;;  %v3326_v21 = vsel %vm3199_vm4, %v2777_v56, -inf  ;;  %12706 = vst [vmem:[#allocation21_spill] sm:$0xff] %v10430_v31  ;;  %v10432_v61 = vpop.f32.mrb[22].mxu1  ;;  %v10434_v47 = vmax.f32 %v3258_v11, %v3259_v50 }
 0x1cd   :  { %12707 = vst [vmem:[#allocation22_spill] sm:$0xff] %v10432_v61  ;;  %v3320_v34 = vrot.slane %v3319_v46, 4  ;;  %v2821_v13 = vrot.slane %v2654_v23, %v10253_v45  ;;  %v2828_v19 = vrot.slane %v2814_v57, %v10253_v45  ;;  %v3362_v12 = vrot.slane %v3361_v5, 4  ;;  %v10442_v57 = vpop.f32.mrb[23].mxu0 }
 0x1ce   :  { %v3314_v41 = vmax.f32 %v3312_v42, %v3313_v37  ;;  %v3327_v54 = vrot.slane %v3326_v21, 4  ;;  %v3333_v18 = vsel %vm3199_vm4, %v2779_v36, -inf  ;;  %v10439_v55 = vmax.f32 %v3263_v17, %v3264_v51  ;;  %12709 = vst [vmem:[#allocation24_spill] sm:$0xff] %v10442_v57  ;;  %v10444_v37 = vpop.f32.mrb[23].mxu1 }
 0x1cf   :  { %v3349_v8 = vmax.f32 %v3347_v4, %v3348_v1  ;;  %v3356_v56 = vmax.f32 %v3354_v38, %v3355_v15  ;;  %v3321_v28 = vmax.f32 %v3319_v46, %v3320_v34  ;;  %v3343_v31 = vrot.slane %v3342_v59, 2 }
 0x1d0   :  { %12708 = vst [vmem:[#allocation23_spill] sm:$0xff] %v10439_v55  ;;  %v3315_v32 = vrot.slane %v3314_v41, 2  ;;  %v3328_v61 = vmax.f32 %v3326_v21, %v3327_v54  ;;  %v3334_v11 = vrot.slane %v3333_v18, 4  ;;  %v2829_v7 = vcombine.high %v2821_v13, %v2821_v13 }
 0x1d1   :  { %v3322_v50 = vrot.slane %v3321_v28, 2  ;;  %v2830_v22 = vcombine.high %v2828_v19, %v2828_v19  ;;  %v3396_v23 = vsel %vm3199_vm4, %v2821_v13, -inf  ;;  %v10446_v42 = vmax.f32 %v3309_v14, %v3310_v0 }
 0x1d2   :  { %v10449_v1 = vmax.f32 %v3270_v6, %v3271_v52  ;;  %v3363_v34 = vmax.f32 %v3361_v5, %v3362_v12  ;;  %v3350_v46 = vrot.slane %v3349_v8, 2  ;;  %v3397_v4 = vrot.slane %v3396_v23, 4 }
 0x1d3   :  { %12710 = vst [vmem:[#allocation25_spill] sm:$0xff] %v10446_v42  ;;  %v3403_v54 = vsel %vm3199_vm4, %v2829_v7, -inf  ;;  %v3410_v38 = vsel %vm3199_vm4, %v2828_v19, -inf  ;;  %v3344_v36 = vmax.f32 %v3342_v59, %v3343_v31  ;;  %v3357_v51 = vrot.slane %v3356_v56, 2 }
 0x1d4   :  { %12711 = vst [vmem:[#allocation26_spill] sm:$0xff] %v10449_v1  ;;  %v3316_v15 = vmax.f32 %v3314_v41, %v3315_v32  ;;  %v3417_v21 = vsel %vm3199_vm4, %v2830_v22, -inf  ;;  %v3323_v13 = vmax.f32 %v3321_v28, %v3322_v50  ;;  %v3329_v55 = vrot.slane %v3328_v61, 2 }
 0x1d5   :  { %v3335_v0 = vmax.f32 %v3333_v18, %v3334_v11  ;;  %v3404_v14 = vrot.slane %v3403_v54, 4  ;;  %v10457_v6 = vsel %vm3982_vm5, %v10379_v48, %v10377_v24  ;;  %v10462_v12 = vsel %vm3982_vm5, %v10446_v42, %v10379_v48 }
 0x1d6   :  { %12712 = vst [vmem:[#allocation27_spill] sm:$0xff] %v10462_v12  ;;  %v3364_v19 = vrot.slane %v3363_v34, 2  ;;  %v3411_v31 = vrot.slane %v3410_v38, 4  ;;  %v10464_v7 = vmax.f32 %v3349_v8, %v3350_v46  ;;  %v3398_v32 = vmax.f32 %v3396_v23, %v3397_v4 }
 0x1d7   :  { %v3405_v22 = vmax.f32 %v3403_v54, %v3404_v14  ;;  %v3418_v28 = vrot.slane %v3417_v21, 4  ;;  %v3345_v5 = vrot.slane %v3344_v36, 1  ;;  %v10466_v52 = vmax.f32 %v3356_v56, %v3357_v51 }
 0x1d8   :  { %12713 = vst [vmem:[#allocation28_spill] sm:$0xff] %v10464_v7  ;;  %v3317_v59 = vrot.slane %v3316_v15, 1  ;;  %v12715_v24 = vmax.f32 %v10282_v16, %v10287_v9  ;;  %v3324_v18 = vrot.slane %v3323_v13, 1  ;;  %v10472_v11 = vmax.f32 %v3328_v61, %v3329_v55 }
 0x1d9   :  { %12714 = vst [vmem:[#allocation29_spill] sm:$0xff] %v10466_v52  ;;  %v3336_v48 = vrot.slane %v3335_v0, 2  ;;  %v2601_v8 = vmax.f32 %v10290_v26, %v10292_v29  ;;  %v10476_v50 = vmax.f32 %v3363_v34, %v3364_v19  ;;  %v3412_v23 = vmax.f32 %v3410_v38, %v3411_v31 }
 0x1da   :  { %v2629_v41 = vadd.f32 %v10250_v39, %v12715_v24  ;;  %v2600_v56 = vmax.f32 %v10294_v30, %v10296_v33  ;;  %v3399_v4 = vrot.slane %v3398_v32, 2  ;;  %v3406_v54 = vrot.slane %v3405_v22, 2 }
 0x1db   :  { %12716 = vst [vmem:[#allocation30_spill] sm:$0xff] %v10476_v50  ;;  %v3419_v51 = vmax.f32 %v3417_v21, %v3418_v28  ;;  %v2632_v16 = vadd.f32 %v10250_v39, %v2601_v8  ;;  %v10481_v9 = vmax.f32 %v3344_v36, %v3345_v5  ;;  %v10483_v61 = vmax.f32 %v3316_v15, %v3317_v59 }
 0x1dc   :  { %v2653_v46 = vmax.f32 %v2629_v41, 0.0  ;;  %v10486_v26 = vmax.f32 %v3323_v13, %v3324_v18  ;;  %v3331_v29 = vrot.slane %v10472_v11, 1  ;;  %v10489_v34 = vmax.f32 %v3335_v0, %v3336_v48 }
 0x1dd   :  { %12717 = vst [vmem:[#allocation31_spill] sm:$0xff] %v10481_v9  ;;  %12718 = vst [vmem:[#allocation32_spill] sm:$0xff] %v10483_v61  ;;  %v2656_v38 = vmax.f32 %v2632_v16, 0.0  ;;  %v3413_v30 = vrot.slane %v3412_v23, 2  ;;  %v3400_v36 = vmax.f32 %v3398_v32, %v3399_v4  ;;  %v10493_v31 = vmax.f32 %v3405_v22, %v3406_v54 }
 0x1de   :  { %v2797_v55 = vcombine.high %v2653_v46, %v2653_v46  ;;  %v2804_v14 = vrot.slane %v2653_v46, %v10253_v45  ;;  %12719 = vst [vmem:[#allocation33_spill] sm:$0xff] %v10486_v26  ;;  %v3420_v15 = vrot.slane %v3419_v51, 2  ;;  %v2631_v22 = vadd.f32 %v10250_v39, %v2600_v56 }
 0x1df   :  { %v2848_v24 = vcombine.high %v2656_v38, %v2656_v38  ;;  %v2855_v48 = vrot.slane %v2656_v38, %v10253_v45  ;;  %v3414_v8 = vmax.f32 %v3412_v23, %v3413_v30  ;;  %v10507_v57 = vmax.f32 %v10472_v11, %v3331_v29 }
 0x1e0   :  { %v2811_v33 = vrot.slane %v2797_v55, %v10253_v45  ;;  %v2812_v21 = vcombine.high %v2804_v14, %v2804_v14  ;;  %v3368_v19 = vsel %vm3199_vm4, %v2804_v14, -inf  ;;  %v3421_v50 = vmax.f32 %v3419_v51, %v3420_v15 }
 0x1e1   :  { %v3369_v28 = vrot.slane %v3368_v19, 4  ;;  %v2862_v32 = vrot.slane %v2848_v24, %v10253_v45  ;;  %v2863_v14 = vcombine.high %v2855_v48, %v2855_v48  ;;  %12720 = vst [vmem:[#allocation34_spill] sm:$0xff] %v10507_v57 }
 0x1e2   :  { %v2813_v5 = vcombine.high %v2811_v33, %v2811_v33  ;;  %v3375_v13 = vsel %vm3199_vm4, %v2812_v21, -inf  ;;  %v3382_v59 = vsel %vm3199_vm4, %v2811_v33, -inf  ;;  %v3452_v33 = vsel %vm3199_vm4, %v2855_v48, -inf }
 0x1e3   :  { %v3370_v0 = vmax.f32 %v3368_v19, %v3369_v28  ;;  %v3376_v41 = vrot.slane %v3375_v13, 4  ;;  %v3383_v18 = vrot.slane %v3382_v59, 4  ;;  %v2864_v21 = vcombine.high %v2862_v32, %v2862_v32 }
 0x1e4   :  { %v3389_v46 = vsel %vm3199_vm4, %v2813_v5, -inf  ;;  %v3466_v19 = vsel %vm3199_vm4, %v2862_v32, -inf  ;;  %v3453_v30 = vrot.slane %v3452_v33, 4  ;;  %v3459_v5 = vsel %vm3199_vm4, %v2863_v14, -inf }
 0x1e5   :  { %v3371_v4 = vrot.slane %v3370_v0, 2  ;;  %v3377_v54 = vmax.f32 %v3375_v13, %v3376_v41  ;;  %v3384_v16 = vmax.f32 %v3382_v59, %v3383_v18  ;;  %v3390_v55 = vrot.slane %v3389_v46, 4 }
 0x1e6   :  { %v3467_v24 = vrot.slane %v3466_v19, 4  ;;  %v3473_v56 = vsel %vm3199_vm4, %v2864_v21, -inf  ;;  %v2655_v41 = vmax.f32 %v2631_v22, 0.0  ;;  %v3454_v18 = vmax.f32 %v3452_v33, %v3453_v30 }
 0x1e7   :  { %v3372_v28 = vmax.f32 %v3370_v0, %v3371_v4  ;;  %v3378_v17 = vrot.slane %v3377_v54, 2  ;;  %v3385_v38 = vrot.slane %v3384_v16, 2  ;;  %v3391_v23 = vmax.f32 %v3389_v46, %v3390_v55 }
 0x1e8   :  { %v3460_v52 = vrot.slane %v3459_v5, 4  ;;  %v3468_v1 = vmax.f32 %v3466_v19, %v3467_v24  ;;  %v3474_v48 = vrot.slane %v3473_v56, 4  ;;  %v3338_v32 = vrot.slane %v10489_v34, 1 }
 0x1e9   :  { %v3379_v13 = vmax.f32 %v3377_v54, %v3378_v17  ;;  %v3392_v59 = vrot.slane %v3391_v23, 2  ;;  %v3386_v4 = vmax.f32 %v3384_v16, %v3385_v38  ;;  %v3401_v46 = vrot.slane %v3400_v36, 1 }
 0x1ea   :  { %v3373_v55 = vrot.slane %v3372_v28, 1  ;;  %v3455_v7 = vrot.slane %v3454_v18, 2  ;;  %v3461_v14 = vmax.f32 %v3459_v5, %v3460_v52  ;;  %v3469_v51 = vrot.slane %v3468_v1, 2 }
 0x1eb   :  { %v3380_v0 = vrot.slane %v3379_v13, 1  ;;  %v3393_v12 = vmax.f32 %v3391_v23, %v3392_v59  ;;  %v3475_v17 = vmax.f32 %v3473_v56, %v3474_v48  ;;  %v2838_v15 = vrot.slane %v2655_v41, %v10253_v45 }
 0x1ec   :  { %v3408_v22 = vrot.slane %v10493_v31, 1  ;;  %v3415_v54 = vrot.slane %v3414_v8, 1  ;;  %v3422_v21 = vrot.slane %v3421_v50, 1  ;;  %v2831_v33 = vcombine.high %v2655_v41, %v2655_v41 }
 0x1ed   :  { %v10511_v19 = vmax.f32 %v3379_v13, %v3380_v0  ;;  %v3387_v16 = vrot.slane %v3386_v4, 1  ;;  %v3394_v38 = vrot.slane %v3393_v12, 1  ;;  %v3462_v23 = vrot.slane %v3461_v14, 2 }
 0x1ee   :  { %v10514_v30 = vmax.f32 %v10489_v34, %v3338_v32  ;;  %v10516_v52 = vmax.f32 %v3400_v36, %v3401_v46  ;;  %v3374_v11 = vmax.f32 %v3372_v28, %v3373_v55  ;;  %v3456_v29 = vmax.f32 %v3454_v18, %v3455_v7 }
 0x1ef   :  { %v3470_v5 = vmax.f32 %v3468_v1, %v3469_v51  ;;  %v3476_v24 = vrot.slane %v3475_v17, 2  ;;  %v2846_v56 = vcombine.high %v2838_v15, %v2838_v15  ;;  %v3424_v59 = vsel %vm3199_vm4, %v2838_v15, -inf }
 0x1f0   :  { %12721 = vst [vmem:[#allocation35_spill] sm:$0xff] %v10514_v30  ;;  %v10520_v48 = vmax.f32 %v10493_v31, %v3408_v22  ;;  %v10522_v13 = vmax.f32 %v3414_v8, %v3415_v54  ;;  %v10524_v41 = vmax.f32 %v3421_v50, %v3422_v21  ;;  %v10527_v0 = vrot.slane %v2831_v33, %v10253_v45 }
 0x1f1   :  { %v10529_v34 = vmax.f32 %v3386_v4, %v3387_v16  ;;  %v10531_v36 = vmax.f32 %v3393_v12, %v3394_v38  ;;  %v10535_v1 = vsel %vm3982_vm5, %v10511_v19, %v3374_v11  ;;  %v3463_v7 = vmax.f32 %v3461_v14, %v3462_v23 }
 0x1f2   :  { %12722 = vst [vmem:[#allocation36_spill] sm:$0xff] %v10524_v41  ;;  %12723 = vst [vmem:[#allocation37_spill] sm:$0xff] %v10527_v0  ;;  %v3457_v28 = vrot.slane %v3456_v29, 1  ;;  %v3425_v18 = vrot.slane %v3424_v59, 4  ;;  %v2603_v31 = vmax.f32 %v10299_v40, %v10301_v43  ;;  %v2602_v50 = vmax.f32 %v10303_v44, %v10305_v49 }
 0x1f3   :  { %12724 = vst [vmem:[#allocation38_spill] sm:$0xff] %v10529_v34  ;;  %12725 = vst [vmem:[#allocation39_spill] sm:$0xff] %v10535_v1  ;;  %v3471_v8 = vrot.slane %v3470_v5, 1  ;;  %v3477_v32 = vmax.f32 %v3475_v17, %v3476_v24  ;;  %v3431_v4 = vsel %vm3199_vm4, %v2846_v56, -inf  ;;  %v2605_v12 = vmax.f32 %v10309_v58, %v10314_v2 }
 0x1f4   :  { %v3438_v46 = vsel %vm3199_vm4, %v10527_v0, -inf  ;;  %v2634_v55 = vadd.f32 %v10250_v39, %v2603_v31  ;;  %v2633_v14 = vadd.f32 %v10250_v39, %v2602_v50  ;;  %v2604_v40 = vmax.f32 %v10316_v3, %v10324_v10 }
 0x1f5   :  { %v3464_v43 = vrot.slane %v3463_v7, 1  ;;  %v2636_v44 = vadd.f32 %v10250_v39, %v2605_v12  ;;  %v3426_v58 = vmax.f32 %v3424_v59, %v3425_v18  ;;  %v3478_v22 = vrot.slane %v3477_v32, 1 }
 0x1f6   :  { %v2658_v2 = vmax.f32 %v2634_v55, 0.0  ;;  %v2657_v17 = vmax.f32 %v2633_v14, 0.0  ;;  %v3432_v3 = vrot.slane %v3431_v4, 4  ;;  %v3439_v21 = vrot.slane %v3438_v46, 4 }
 0x1f7   :  { %v2660_v10 = vmax.f32 %v2636_v44, 0.0  ;;  %v3458_v23 = vmax.f32 %v3456_v29, %v3457_v28  ;;  %v10561_v11 = vmax.f32 %v3470_v5, %v3471_v8  ;;  %v10563_v59 = vmax.f32 %v3463_v7, %v3464_v43 }
 0x1f8   :  { %v2889_v33 = vrot.slane %v2658_v2, %v10253_v45  ;;  %v2865_v16 = vcombine.high %v2657_v17, %v2657_v17  ;;  %v2872_v38 = vrot.slane %v2657_v17, %v10253_v45  ;;  %v2882_v24 = vcombine.high %v2658_v2, %v2658_v2 }
 0x1f9   :  { %v2916_v56 = vcombine.high %v2660_v10, %v2660_v10  ;;  %v3427_v18 = vrot.slane %v3426_v58, 2  ;;  %v10568_v54 = vmax.f32 %v3477_v32, %v3478_v22  ;;  %v10570_v17 = vmax.f32 %v3431_v4, %v3432_v3 }
 0x1fa   :  { %v3508_v31 = vsel %vm3199_vm4, %v2889_v33, -inf  ;;  %v2879_v50 = vrot.slane %v2865_v16, %v10253_v45  ;;  %v2897_v12 = vcombine.high %v2889_v33, %v2889_v33  ;;  %v2880_v14 = vcombine.high %v2872_v38, %v2872_v38 }
 0x1fb   :  { %v3509_v55 = vrot.slane %v3508_v31, 4  ;;  %v3480_v44 = vsel %vm3199_vm4, %v2872_v38, -inf  ;;  %12726 = vst [vmem:[#allocation40_spill] sm:$0xff] %v10568_v54  ;;  %12727 = vst [vmem:[#allocation41_spill] sm:$0xff] %v10570_v17  ;;  %v10572_v29 = vmax.f32 %v3438_v46, %v3439_v21  ;;  %v10575_v7 = vrot.slane %v2882_v24, %v10253_v45 }
 0x1fc   :  { %v2881_v5 = vcombine.high %v2879_v50, %v2879_v50  ;;  %v3481_v28 = vrot.slane %v3480_v44, 4  ;;  %v2923_v8 = vrot.slane %v2660_v10, %v10253_v45  ;;  %v2930_v43 = vrot.slane %v2916_v56, %v10253_v45 }
 0x1fd   :  { %12728 = vst [vmem:[#allocation42_spill] sm:$0xff] %v10572_v29  ;;  %12729 = vst [vmem:[#allocation43_spill] sm:$0xff] %v10575_v7  ;;  %v10581_v2 = vsel %vm3982_vm5, %v10563_v59, %v3458_v23  ;;  %v3487_v32 = vsel %vm3199_vm4, %v2880_v14, -inf  ;;  %v3494_v4 = vsel %vm3199_vm4, %v2879_v50, -inf  ;;  %v10586_v22 = vmax.f32 %v3426_v58, %v3427_v18 }
 0x1fe   :  { %12730 = vst [vmem:[#allocation44_spill] sm:$0xff] %v10581_v2  ;;  %v3501_v46 = vsel %vm3199_vm4, %v2881_v5, -inf  ;;  %v3510_v3 = vmax.f32 %v3508_v31, %v3509_v55  ;;  %v3515_v21 = vsel %vm3199_vm4, %v2897_v12, -inf  ;;  %v2635_v33 = vadd.f32 %v10250_v39, %v2604_v40 }
 0x1ff   :  { %v3482_v10 = vmax.f32 %v3480_v44, %v3481_v28  ;;  %v3488_v16 = vrot.slane %v3487_v32, 4  ;;  %v3495_v38 = vrot.slane %v3494_v4, 4  ;;  %v3502_v24 = vrot.slane %v3501_v46, 4 }
 0x200   :  { %v3522_v23 = vsel %vm3199_vm4, %v10575_v7, -inf  ;;  %v2931_v56 = vcombine.high %v2923_v8, %v2923_v8  ;;  %v2932_v14 = vcombine.high %v2930_v43, %v2930_v43  ;;  %v3564_v50 = vsel %vm3199_vm4, %v2923_v8, -inf }
 0x201   :  { %v3483_v15 = vrot.slane %v3482_v10, 2  ;;  %v3489_v5 = vmax.f32 %v3487_v32, %v3488_v16  ;;  %v3496_v58 = vmax.f32 %v3494_v4, %v3495_v38  ;;  %v3503_v18 = vmax.f32 %v3501_v46, %v3502_v24 }
 0x202   :  { %v3511_v31 = vrot.slane %v3510_v3, 2  ;;  %v3565_v55 = vrot.slane %v3564_v50, 4  ;;  %v3571_v12 = vsel %vm3199_vm4, %v2931_v56, -inf  ;;  %v3578_v40 = vsel %vm3199_vm4, %v2930_v43, -inf }
 0x203   :  { %v3484_v44 = vmax.f32 %v3482_v10, %v3483_v15  ;;  %v3490_v28 = vrot.slane %v3489_v5, 2  ;;  %v3497_v51 = vrot.slane %v3496_v58, 2  ;;  %v3504_v49 = vrot.slane %v3503_v18, 2 }
 0x204   :  { %v3566_v0 = vmax.f32 %v3564_v50, %v3565_v55  ;;  %v3572_v29 = vrot.slane %v3571_v12, 4  ;;  %v3579_v17 = vrot.slane %v3578_v40, 4  ;;  %v2659_v2 = vmax.f32 %v2635_v33, 0.0 }
 0x205   :  { %v3516_v1 = vrot.slane %v3515_v21, 4  ;;  %v3523_v8 = vrot.slane %v3522_v23, 4  ;;  %v3491_v41 = vmax.f32 %v3489_v5, %v3490_v28  ;;  %v3585_v32 = vsel %vm3199_vm4, %v2932_v14, -inf }
 0x206   :  { %v10596_v4 = vmax.f32 %v3510_v3, %v3511_v31  ;;  %v3498_v46 = vmax.f32 %v3496_v58, %v3497_v51  ;;  %v3505_v16 = vmax.f32 %v3503_v18, %v3504_v49  ;;  %v3567_v38 = vrot.slane %v3566_v0, 2 }
 0x207   :  { %v3485_v15 = vrot.slane %v3484_v44, 1  ;;  %v12731_v10 = vmax.f32 %v10331_v20, %v10334_v25  ;;  %v12732_v33 = vmax.f32 %v10336_v27, %v10340_v35  ;;  %v3492_v50 = vrot.slane %v3491_v41, 1 }
 0x208   :  { %v3573_v14 = vmax.f32 %v3571_v12, %v3572_v29  ;;  %v3580_v3 = vmax.f32 %v3578_v40, %v3579_v17  ;;  %v3586_v5 = vrot.slane %v3585_v32, 4  ;;  %v10609_v51 = vmax.f32 %v3515_v21, %v3516_v1 }
 0x209   :  { %v2638_v24 = vadd.f32 %v10250_v39, %v12731_v10  ;;  %v2637_v56 = vadd.f32 %v10250_v39, %v12732_v33  ;;  %v10611_v58 = vmax.f32 %v3522_v23, %v3523_v8  ;;  %v2899_v18 = vcombine.high %v2659_v2, %v2659_v2 }
 0x20a   :  { %12733 = vst [vmem:[#allocation45_spill] sm:$0xff] %v10609_v51  ;;  %v3499_v25 = vrot.slane %v3498_v46, 1  ;;  %v3506_v31 = vrot.slane %v3505_v16, 1  ;;  %v10614_v55 = vmax.f32 %v3566_v0, %v3567_v38  ;;  %v10616_v27 = vmax.f32 %v3484_v44, %v3485_v15 }
 0x20b   :  { %12734 = vst [vmem:[#allocation46_spill] sm:$0xff] %v10611_v58  ;;  %v2906_v39 = vrot.slane %v2659_v2, %v10253_v45  ;;  %v2913_v35 = vrot.slane %v2899_v18, %v10253_v45  ;;  %v2662_v17 = vmax.f32 %v2638_v24, 0.0  ;;  %v10620_v29 = vmax.f32 %v3491_v41, %v3492_v50 }
 0x20c   :  { %12735 = vst [vmem:[#allocation47_spill] sm:$0xff] %v10616_v27  ;;  %v3574_v1 = vrot.slane %v3573_v14, 2  ;;  %v3581_v21 = vrot.slane %v3580_v3, 2  ;;  %v3587_v23 = vmax.f32 %v3585_v32, %v3586_v5  ;;  %v10624_v0 = vmax.f32 %v3498_v46, %v3499_v25 }
 0x20d   :  { %12736 = vst [vmem:[#allocation48_spill] sm:$0xff] %v10620_v29  ;;  %v2914_v12 = vcombine.high %v2906_v39, %v2906_v39  ;;  %v2915_v40 = vcombine.high %v2913_v35, %v2913_v35  ;;  %v3536_v28 = vsel %vm3199_vm4, %v2906_v39, -inf  ;;  %v3550_v8 = vsel %vm3199_vm4, %v2913_v35, -inf }
 0x20e   :  { %12737 = vst [vmem:[#allocation49_spill] sm:$0xff] %v10624_v0  ;;  %v10626_v44 = vmax.f32 %v3505_v16, %v3506_v31  ;;  %v3569_v2 = vrot.slane %v10614_v55, 1  ;;  %v3537_v38 = vrot.slane %v3536_v28, 4  ;;  %v3551_v41 = vrot.slane %v3550_v8, 4 }
 0x20f   :  { %v3543_v15 = vsel %vm3199_vm4, %v2914_v12, -inf  ;;  %v3557_v10 = vsel %vm3199_vm4, %v2915_v40, -inf  ;;  %v2950_v24 = vcombine.high %v2662_v17, %v2662_v17  ;;  %v3575_v32 = vmax.f32 %v3573_v14, %v3574_v1 }
 0x210   :  { %12738 = vst [vmem:[#allocation50_spill] sm:$0xff] %v10626_v44  ;;  %v3538_v33 = vmax.f32 %v3536_v28, %v3537_v38  ;;  %v3544_v50 = vrot.slane %v3543_v15, 4  ;;  %v3558_v5 = vrot.slane %v3557_v10, 4  ;;  %v3588_v18 = vrot.slane %v3587_v23, 2 }
 0x211   :  { %v3552_v39 = vmax.f32 %v3550_v8, %v3551_v41  ;;  %v2957_v46 = vrot.slane %v2662_v17, %v10253_v45  ;;  %v2964_v16 = vrot.slane %v2950_v24, %v10253_v45  ;;  %v3582_v25 = vmax.f32 %v3580_v3, %v3581_v21 }
 0x212   :  { %v3539_v31 = vrot.slane %v3538_v33, 2  ;;  %v3545_v35 = vmax.f32 %v3543_v15, %v3544_v50  ;;  %v3559_v49 = vmax.f32 %v3557_v10, %v3558_v5  ;;  %v2661_v28 = vmax.f32 %v2637_v56, 0.0 }
 0x213   :  { %v3553_v20 = vrot.slane %v3552_v39, 2  ;;  %v2965_v12 = vcombine.high %v2957_v46, %v2957_v46  ;;  %v2966_v43 = vcombine.high %v2964_v16, %v2964_v16  ;;  %v3620_v40 = vsel %vm3199_vm4, %v2957_v46, -inf }
 0x214   :  { %v3546_v7 = vrot.slane %v3545_v35, 2  ;;  %v3560_v14 = vrot.slane %v3559_v49, 2  ;;  %v3621_v1 = vrot.slane %v3620_v40, 4  ;;  %v3589_v38 = vmax.f32 %v3587_v23, %v3588_v18 }
 0x215   :  { %v3627_v8 = vsel %vm3199_vm4, %v2965_v12, -inf  ;;  %v3634_v17 = vsel %vm3199_vm4, %v2964_v16, -inf  ;;  %v3641_v41 = vsel %vm3199_vm4, %v2966_v43, -inf  ;;  %v3540_v3 = vmax.f32 %v3538_v33, %v3539_v31 }
 0x216   :  { %v3547_v21 = vmax.f32 %v3545_v35, %v3546_v7  ;;  %v3554_v15 = vmax.f32 %v3552_v39, %v3553_v20  ;;  %v3622_v10 = vmax.f32 %v3620_v40, %v3621_v1  ;;  %v3561_v24 = vmax.f32 %v3559_v49, %v3560_v14 }
 0x217   :  { %v3628_v50 = vrot.slane %v3627_v8, 4  ;;  %v3635_v5 = vrot.slane %v3634_v17, 4  ;;  %v3642_v58 = vrot.slane %v3641_v41, 4  ;;  %v3576_v46 = vrot.slane %v3575_v32, 1 }
 0x218   :  { %v3623_v51 = vrot.slane %v3622_v10, 2  ;;  %v2933_v44 = vcombine.high %v2661_v28, %v2661_v28  ;;  %v2940_v56 = vrot.slane %v2661_v28, %v10253_v45  ;;  %v3583_v23 = vrot.slane %v3582_v25, 1 }
 0x219   :  { %v3629_v18 = vmax.f32 %v3627_v8, %v3628_v50  ;;  %v3636_v12 = vmax.f32 %v3634_v17, %v3635_v5  ;;  %v3643_v0 = vmax.f32 %v3641_v41, %v3642_v58  ;;  %v3590_v16 = vrot.slane %v3589_v38, 1 }
 0x21a   :  { %v3541_v29 = vrot.slane %v3540_v3, 1  ;;  %v3548_v43 = vrot.slane %v3547_v21, 1  ;;  %v3555_v33 = vrot.slane %v3554_v15, 1  ;;  %v3562_v7 = vrot.slane %v3561_v24, 1 }
 0x21b   :  { %v3630_v20 = vrot.slane %v3629_v18, 2  ;;  %v3637_v39 = vrot.slane %v3636_v12, 2  ;;  %v3644_v49 = vrot.slane %v3643_v0, 2  ;;  %v3624_v31 = vmax.f32 %v3622_v10, %v3623_v51 }
 0x21c   :  { %v10639_v35 = vrot.slane %v2933_v44, %v10253_v45  ;;  %v2948_v40 = vcombine.high %v2940_v56, %v2940_v56  ;;  %v3592_v14 = vsel %vm3199_vm4, %v2940_v56, -inf  ;;  %v10643_v58 = vmax.f32 %v10614_v55, %v3569_v2  ;;  %v10663_v2 = vld [vmem:[%s12556_s3] ss:$0 sm:$0xff] }
 0x21d   :  { %v3631_v1 = vmax.f32 %v3629_v18, %v3630_v20  ;;  %v3638_v28 = vmax.f32 %v3636_v12, %v3637_v39  ;;  %v3645_v8 = vmax.f32 %v3643_v0, %v3644_v49  ;;  %v3593_v17 = vrot.slane %v3592_v14, 4  ;;  %v12747_v12 = vld [vmem:[#allocation7_spill] sm:$0xff] }
 0x21e   :  { %12739 = vst [vmem:[#allocation51_spill] sm:$0xff] %v10639_v35  ;;  %v10645_v41 = vmax.f32 %v3575_v32, %v3576_v46  ;;  %v10647_v50 = vmax.f32 %v3582_v25, %v3583_v23  ;;  %v10649_v5 = vmax.f32 %v3547_v21, %v3548_v43  ;;  %v10651_v51 = vmax.f32 %v3589_v38, %v3590_v16  ;;  %v12748_v16 = vld [vmem:[#allocation9_spill] sm:$0xff]  ;;  %v12749_v39 = vld [vmem:[#allocation15_spill] sm:$0xff] }
 0x21f   :  { %v3542_v44 = vmax.f32 %v3540_v3, %v3541_v29  ;;  %v10653_v10 = vmax.f32 %v3554_v15, %v3555_v33  ;;  %v3632_v27 = vrot.slane %v3631_v1, 1  ;;  %v10655_v56 = vmax.f32 %v3561_v24, %v3562_v7  ;;  %v12761_v24 = vld [vmem:[#allocation8_spill] sm:$0xff] }
 0x220   :  { %12740 = vst [vmem:[#allocation52_spill] sm:$0xff] %v10645_v41  ;;  %12741 = vst [vmem:[#allocation53_spill] sm:$0xff] %v10647_v50  ;;  %v3599_v0 = vsel %vm3199_vm4, %v2948_v40, -inf  ;;  %v3606_v55 = vsel %vm3199_vm4, %v10639_v35, -inf  ;;  %v12745_v32 = vmax.f32 %v10346_v53, %v10348_v62  ;;  %v3625_v25 = vrot.slane %v3624_v31, 1 }
 0x221   :  { %12742 = vst [vmem:[#allocation54_spill] sm:$0xff] %v10651_v51  ;;  %12743 = vst [vmem:[#allocation55_spill] sm:$0xff] %v10653_v10  ;;  %v3639_v38 = vrot.slane %v3638_v28, 1  ;;  %v3646_v3 = vrot.slane %v3645_v8, 1  ;;  %v3594_v21 = vmax.f32 %v3592_v14, %v3593_v17  ;;  %v10671_v15 = vsel %vm3982_vm5, %v10649_v5, %v3542_v44 }
 0x222   :  { %12744 = vst [vmem:[#allocation56_spill] sm:$0xff] %v10655_v56  ;;  %v2640_v29 = vadd.f32 %v10663_v2, %v12745_v32  ;;  %12746 = vst [vmem:[#allocation57_spill] sm:$0xff] %v10671_v15  ;;  %v2608_v23 = vmax.f32 %v10350_v63, %v10355_v60  ;;  %v10677_v18 = vmax.f32 %v3631_v1, %v3632_v27  ;;  %v3600_v53 = vrot.slane %v3599_v0, 4 }
 0x223   :  { %v3607_v62 = vrot.slane %v3606_v55, 4  ;;  %v3983_v43 = vsel %vm3982_vm5, %v12748_v16, %v12747_v12  ;;  %v3626_v40 = vmax.f32 %v3624_v31, %v3625_v25  ;;  %v10686_v14 = vmax.f32 %v3638_v28, %v3639_v38 }
 0x224   :  { %v2664_v46 = vmax.f32 %v2640_v29, 0.0  ;;  %v2639_v20 = vadd.f32 %v10663_v2, %v2608_v23  ;;  %v3985_v49 = vsel %vm3984_vm6, %v12749_v39, %v3983_v43  ;;  %v10688_v63 = vmax.f32 %v3645_v8, %v3646_v3  ;;  %v12757_v43 = vld [vmem:[#allocation4_spill] sm:$0xff] }
 0x225   :  { %v3595_v60 = vrot.slane %v3594_v21, 2  ;;  %v10691_v44 = vmax.f32 %v3599_v0, %v3600_v53  ;;  %v10700_v31 = vsel %vm3982_vm5, %v10677_v18, %v3626_v40  ;;  %v10702_v28 = vmax.f32 %v3606_v55, %v3607_v62 }
 0x226   :  { %v2984_v33 = vcombine.high %v2664_v46, %v2664_v46  ;;  %v2991_v7 = vrot.slane %v2664_v46, %v10253_v45  ;;  %v2663_v17 = vmax.f32 %v2639_v20, 0.0  ;;  %v12752_v46 = vld [vmem:[#allocation3_spill] sm:$0xff]  ;;  %12753 = vst [vmem:[#allocation59_spill] sm:$0xff] %v10700_v31  ;;  %v12755_v3 = vrot.slane %v10434_v47, 1 }
 0x227   :  { %12750 = vst [vmem:[#allocation7_spill] sm:$0xff] %v10691_v44  ;;  %v3987_v23 = vsel %vm3986_vm7, %v12752_v46, %v3985_v49  ;;  %12754 = vst [vmem:[#allocation60_spill] sm:$0xff] %v10702_v28  ;;  %v10705_v38 = vmax.f32 %v3594_v21, %v3595_v60 }
 0x228   :  { %v2999_v27 = vcombine.high %v2991_v7, %v2991_v7  ;;  %v3676_v1 = vsel %vm3199_vm4, %v2991_v7, -inf  ;;  %v10694_v32 = vrot.slane %v2984_v33, %v10253_v45  ;;  %v2967_v25 = vcombine.high %v2663_v17, %v2663_v17 }
 0x229   :  { %v3677_v29 = vrot.slane %v3676_v1, 4  ;;  %v2974_v0 = vrot.slane %v2663_v17, %v10253_v45  ;;  %v10711_v53 = vmax.f32 %v10434_v47, %v12755_v3  ;;  %v3989_v33 = vsel %vm3988_vm8, %v12757_v43, %v3987_v23  ;;  %v12760_v3 = vld [vmem:[#allocation10_spill] sm:$0xff] }
 0x22a   :  { %12751 = vst [vmem:[#allocation58_spill] sm:$0xff] %v10694_v32  ;;  %v3683_v8 = vsel %vm3199_vm4, %v2999_v27, -inf  ;;  %v2981_v12 = vrot.slane %v2967_v25, %v10253_v45  ;;  %v3690_v21 = vsel %vm3199_vm4, %v10694_v32, -inf  ;;  %v12758_v27 = vld [vmem:[#allocation5_spill] sm:$0xff]  ;;  %v2611_v35 = vmax.f32 %v12761_v24, %v12760_v3 }
 0x22b   :  { %12756 = vst [vmem:[#allocation61_spill] sm:$0xff] %v10711_v53  ;;  %v3678_v55 = vmax.f32 %v3676_v1, %v3677_v29  ;;  %v3684_v62 = vrot.slane %v3683_v8, 4  ;;  %v2982_v7 = vcombine.high %v2974_v0, %v2974_v0  ;;  %v3648_v49 = vsel %vm3199_vm4, %v2974_v0, -inf  ;;  %v12759_v29 = vld [vmem:[#allocation6_spill] sm:$0xff] }
 0x22c   :  { %v2983_v20 = vcombine.high %v2981_v12, %v2981_v12  ;;  %v3662_v47 = vsel %vm3199_vm4, %v2981_v12, -inf  ;;  %v3649_v40 = vrot.slane %v3648_v49, 4  ;;  %v3991_v17 = vsel %vm3990_vm9, %v12758_v27, %v3989_v33  ;;  %v12762_v27 = vld [vmem:[#allocation12_spill] sm:$0xff] }
 0x22d   :  { %v3663_v60 = vrot.slane %v3662_v47, 4  ;;  %v3655_v23 = vsel %vm3199_vm4, %v2982_v7, -inf  ;;  %v3993_v25 = vsel %vm3992_vm10, %v12759_v29, %v3991_v17  ;;  %v3691_v28 = vrot.slane %v3690_v21, 4  ;;  %v12763_v7 = vld [vmem:[#allocation11_spill] sm:$0xff] }
 0x22e   :  { %v3669_v1 = vsel %vm3199_vm4, %v2983_v20, -inf  ;;  %v3650_v0 = vmax.f32 %v3648_v49, %v3649_v40  ;;  %v3656_v44 = vrot.slane %v3655_v23, 4  ;;  %v3995_v15 = vsel %vm3994_vm11, %v10711_v53, %v3993_v25 }
 0x22f   :  { %v3664_v12 = vmax.f32 %v3662_v47, %v3663_v60  ;;  %v3670_v31 = vrot.slane %v3669_v1, 4  ;;  %v2642_v33 = vadd.f32 %v10663_v2, %v2611_v35  ;;  %v2610_v43 = vmax.f32 %v12763_v7, %v12762_v27  ;;  %8088 = vmatprep.mubr.msk.f32.mxu0 %vm4045_vm12, %v3995_v15  ;;  %8172 = vmatprep.mubr.msk.f32.mxu1 %vm4045_vm12, %v3995_v15 }
 0x230   :  { %v3651_v20 = vrot.slane %v3650_v0, 2  ;;  %v3657_v46 = vmax.f32 %v3655_v23, %v3656_v44  ;;  %v3997_v24 = vsel %vm3984_vm6, %v10446_v42, %v10457_v6  ;;  %v3679_v27 = vrot.slane %v3678_v55, 2 }
 0x231   :  { %v3665_v39 = vrot.slane %v3664_v12, 2  ;;  %v3671_v49 = vmax.f32 %v3669_v1, %v3670_v31  ;;  %v2666_v47 = vmax.f32 %v2642_v33, 0.0  ;;  %v2641_v40 = vadd.f32 %v10663_v2, %v2610_v43 }
 0x232   :  { %v3998_v35 = vsel %vm3986_vm7, %v10483_v61, %v3997_v24  ;;  %v3652_v44 = vmax.f32 %v3650_v0, %v3651_v20  ;;  %v3658_v17 = vrot.slane %v3657_v46, 2  ;;  %v10745_v6 = vmax.f32 %v3683_v8, %v3684_v62 }
 0x233   :  { %v3666_v15 = vmax.f32 %v3664_v12, %v3665_v39  ;;  %v3018_v25 = vcombine.high %v2666_v47, %v2666_v47  ;;  %v3025_v3 = vrot.slane %v2666_v47, %v10253_v45  ;;  %v10747_v31 = vmax.f32 %v3690_v21, %v3691_v28 }
 0x234   :  { %12764 = vst [vmem:[#allocation10_spill] sm:$0xff] %v10745_v6  ;;  %v3672_v43 = vrot.slane %v3671_v49, 2  ;;  %v3999_v1 = vsel %vm3988_vm8, %v10486_v26, %v3998_v35  ;;  %v2665_v20 = vmax.f32 %v2641_v40, 0.0  ;;  %v10753_v24 = vmax.f32 %v3678_v55, %v3679_v27 }
 0x235   :  { %12765 = vst [vmem:[#allocation8_spill] sm:$0xff] %v10747_v31  ;;  %v3032_v33 = vrot.slane %v3018_v25, %v10253_v45  ;;  %v3033_v7 = vcombine.high %v3025_v3, %v3025_v3  ;;  %v3732_v0 = vsel %vm3199_vm4, %v3025_v3, -inf  ;;  %v3653_v39 = vrot.slane %v3652_v44, 1 }
 0x236   :  { %v3659_v12 = vmax.f32 %v3657_v46, %v3658_v17  ;;  %v3733_v23 = vrot.slane %v3732_v0, 4  ;;  %v3667_v47 = vrot.slane %v3666_v15, 1  ;;  %v4000_v25 = vsel %vm3990_vm9, %v10507_v57, %v3999_v1 }
 0x237   :  { %v3034_v8 = vcombine.high %v3032_v33, %v3032_v33  ;;  %v3739_v28 = vsel %vm3199_vm4, %v3033_v7, -inf  ;;  %v3746_v62 = vsel %vm3199_vm4, %v3032_v33, -inf  ;;  %v3673_v32 = vmax.f32 %v3671_v49, %v3672_v43 }
 0x238   :  { %v3734_v21 = vmax.f32 %v3732_v0, %v3733_v23  ;;  %v3740_v60 = vrot.slane %v3739_v28, 4  ;;  %v3747_v35 = vrot.slane %v3746_v62, 4  ;;  %v3001_v55 = vcombine.high %v2665_v20, %v2665_v20 }
 0x239   :  { %v3753_v40 = vsel %vm3199_vm4, %v3034_v8, -inf  ;;  %v3008_v27 = vrot.slane %v2665_v20, %v10253_v45  ;;  %v10761_v6 = vmax.f32 %v3652_v44, %v3653_v39  ;;  %v3660_v0 = vrot.slane %v3659_v12, 1 }
 0x23a   :  { %v3735_v46 = vrot.slane %v3734_v21, 2  ;;  %v3741_v17 = vmax.f32 %v3739_v28, %v3740_v60  ;;  %v3748_v3 = vmax.f32 %v3746_v62, %v3747_v35  ;;  %v3754_v31 = vrot.slane %v3753_v40, 4 }
 0x23b   :  { %12766 = vst [vmem:[#allocation12_spill] sm:$0xff] %v10761_v6  ;;  %v3015_v33 = vrot.slane %v3001_v55, %v10253_v45  ;;  %v3016_v23 = vcombine.high %v3008_v27, %v3008_v27  ;;  %v3704_v7 = vsel %vm3199_vm4, %v3008_v27, -inf  ;;  %v4001_v44 = vsel %vm3992_vm10, %v10514_v30, %v4000_v25 }
 0x23c   :  { %v3742_v53 = vrot.slane %v3741_v17, 2  ;;  %v3749_v1 = vrot.slane %v3748_v3, 2  ;;  %v3755_v49 = vmax.f32 %v3753_v40, %v3754_v31  ;;  %v3705_v8 = vrot.slane %v3704_v7, 4 }
 0x23d   :  { %v3017_v43 = vcombine.high %v3015_v33, %v3015_v33  ;;  %v3711_v57 = vsel %vm3199_vm4, %v3016_v23, -inf  ;;  %v3718_v20 = vsel %vm3199_vm4, %v3015_v33, -inf  ;;  %v3736_v60 = vmax.f32 %v3734_v21, %v3735_v46 }
 0x23e   :  { %v3743_v28 = vmax.f32 %v3741_v17, %v3742_v53  ;;  %v3756_v62 = vrot.slane %v3755_v49, 2  ;;  %v3706_v39 = vmax.f32 %v3704_v7, %v3705_v8  ;;  %v3712_v35 = vrot.slane %v3711_v57, 4 }
 0x23f   :  { %v3719_v55 = vrot.slane %v3718_v20, 4  ;;  %v3725_v27 = vsel %vm3199_vm4, %v3017_v43, -inf  ;;  %v10770_v26 = vmax.f32 %v3666_v15, %v3667_v47  ;;  %v3674_v31 = vrot.slane %v3673_v32, 1  ;;  %v12769_v47 = vld [vmem:[#allocation18_spill] sm:$0xff] }
 0x240   :  { %v3750_v40 = vmax.f32 %v3748_v3, %v3749_v1  ;;  %v3757_v61 = vmax.f32 %v3755_v49, %v3756_v62  ;;  %v3707_v29 = vrot.slane %v3706_v39, 2  ;;  %v3713_v23 = vmax.f32 %v3711_v57, %v3712_v35  ;;  %v12770_v57 = vld [vmem:[#allocation17_spill] sm:$0xff]  ;;  %v12771_v1 = vld [vmem:[#allocation20_spill] sm:$0xff]  ;;  %v12773_v49 = vld [vmem:[#allocation22_spill] sm:$0xff] }
 0x241   :  { %12767 = vst [vmem:[#allocation11_spill] sm:$0xff] %v10770_v26  ;;  %v3720_v42 = vmax.f32 %v3718_v20, %v3719_v55  ;;  %v3726_v33 = vrot.slane %v3725_v27, 4  ;;  %v10772_v21 = vmax.f32 %v3659_v12, %v3660_v0  ;;  %v3737_v53 = vrot.slane %v3736_v60, 1  ;;  %v12772_v12 = vld [vmem:[#allocation19_spill] sm:$0xff]  ;;  %v12774_v20 = vld [vmem:[#allocation21_spill] sm:$0xff] }
 0x242   :  { %v3744_v46 = vrot.slane %v3743_v28, 1  ;;  %v4002_v25 = vsel %vm3994_vm11, %v10481_v9, %v4001_v44  ;;  %v3708_v17 = vmax.f32 %v3706_v39, %v3707_v29  ;;  %v3714_v7 = vrot.slane %v3713_v23, 2 }
 0x243   :  { %12768 = vst [vmem:[#allocation62_spill] sm:$0xff] %v10772_v21  ;;  %v3721_v8 = vrot.slane %v3720_v42, 2  ;;  %v3727_v43 = vmax.f32 %v3725_v27, %v3726_v33  ;;  %8089 = vmatmul.mubr.msk.f32.vlgmr.msra.gmra.mrb[24].mxu0 %vm4045_vm12, %v4002_v25  ;;  %8173 = vmatmul.mubr.msk.f32.vlgmr.msra.gmra.mrb[24].mxu1 %vm4045_vm12, %v4002_v25  ;;  %v3751_v15 = vrot.slane %v3750_v40, 1  ;;  %v2613_v3 = vmax.f32 %v12770_v57, %v12769_v47  ;;  %v12775_v25 = vld [vmem:[#allocation24_spill] sm:$0xff] }
 0x244   :  { %v2612_v0 = vmax.f32 %v12772_v12, %v12771_v1  ;;  %v2615_v62 = vmax.f32 %v12774_v20, %v12773_v49  ;;  %v3758_v35 = vrot.slane %v3757_v61, 1  ;;  %v3715_v44 = vmax.f32 %v3713_v23, %v3714_v7 }
 0x245   :  { %v3722_v29 = vmax.f32 %v3720_v42, %v3721_v8  ;;  %v3728_v39 = vrot.slane %v3727_v43, 2  ;;  %v2644_v55 = vadd.f32 %v10663_v2, %v2613_v3  ;;  %v2614_v9 = vmax.f32 %v12775_v25, %v10444_v37 }
 0x246   :  { %v2643_v27 = vadd.f32 %v10663_v2, %v2612_v0  ;;  %v2646_v33 = vadd.f32 %v10663_v2, %v2615_v62  ;;  %v10789_v47 = vmax.f32 %v3673_v32, %v3674_v31  ;;  %v3709_v57 = vrot.slane %v3708_v17, 1 }
 0x247   :  { %v3716_v1 = vrot.slane %v3715_v44, 1  ;;  %v3723_v12 = vrot.slane %v3722_v29, 1  ;;  %v10791_v30 = vmax.f32 %v3736_v60, %v3737_v53  ;;  %v10793_v49 = vmax.f32 %v3743_v28, %v3744_v46 }
 0x248   :  { %12776 = vst [vmem:[#allocation18_spill] sm:$0xff] %v10789_v47  ;;  %v2668_v42 = vmax.f32 %v2644_v55, 0.0  ;;  %v2667_v23 = vmax.f32 %v2643_v27, 0.0  ;;  %v10795_v7 = vmax.f32 %v3750_v40, %v3751_v15  ;;  %v10797_v8 = vmax.f32 %v3757_v61, %v3758_v35 }
 0x249   :  { %12777 = vst [vmem:[#allocation17_spill] sm:$0xff] %v10791_v30  ;;  %12778 = vst [vmem:[#allocation20_spill] sm:$0xff] %v10793_v49  ;;  %v3729_v3 = vmax.f32 %v3727_v43, %v3728_v39  ;;  %v2670_v0 = vmax.f32 %v2646_v33, 0.0  ;;  %v3710_v62 = vmax.f32 %v3708_v17, %v3709_v57  ;;  %v10801_v25 = vmax.f32 %v3715_v44, %v3716_v1 }
 0x24a   :  { %12779 = vst [vmem:[#allocation19_spill] sm:$0xff] %v10795_v7  ;;  %12780 = vst [vmem:[#allocation22_spill] sm:$0xff] %v10797_v8  ;;  %v3052_v20 = vcombine.high %v2668_v42, %v2668_v42  ;;  %v3059_v37 = vrot.slane %v2668_v42, %v10253_v45  ;;  %v3035_v32 = vcombine.high %v2667_v23, %v2667_v23 }
 0x24b   :  { %v3042_v31 = vrot.slane %v2667_v23, %v10253_v45  ;;  %v10803_v60 = vmax.f32 %v3722_v29, %v3723_v12  ;;  %v2645_v28 = vadd.f32 %v10663_v2, %v2614_v9  ;;  %v3730_v43 = vrot.slane %v3729_v3, 1 }
 0x24c   :  { %v3066_v40 = vrot.slane %v3052_v20, %v10253_v45  ;;  %v3067_v53 = vcombine.high %v3059_v37, %v3059_v37  ;;  %v3788_v61 = vsel %vm3199_vm4, %v3059_v37, -inf  ;;  %v10809_v46 = vrot.slane %v3035_v32, %v10253_v45 }
 0x24d   :  { %v3789_v15 = vrot.slane %v3788_v61, 4  ;;  %v3050_v35 = vcombine.high %v3042_v31, %v3042_v31  ;;  %v3760_v39 = vsel %vm3199_vm4, %v3042_v31, -inf  ;;  %v3086_v55 = vcombine.high %v2670_v0, %v2670_v0 }
 0x24e   :  { %12781 = vst [vmem:[#allocation21_spill] sm:$0xff] %v10809_v46  ;;  %v3068_v17 = vcombine.high %v3066_v40, %v3066_v40  ;;  %v3795_v44 = vsel %vm3199_vm4, %v3067_v53, -inf  ;;  %v3802_v29 = vsel %vm3199_vm4, %v3066_v40, -inf  ;;  %v3761_v33 = vrot.slane %v3760_v39, 4 }
 0x24f   :  { %v3790_v9 = vmax.f32 %v3788_v61, %v3789_v15  ;;  %v3796_v2 = vrot.slane %v3795_v44, 4  ;;  %v3803_v27 = vrot.slane %v3802_v29, 4  ;;  %v3767_v1 = vsel %vm3199_vm4, %v3050_v35, -inf }
 0x250   :  { %v3809_v57 = vsel %vm3199_vm4, %v3068_v17, -inf  ;;  %v3774_v12 = vsel %vm3199_vm4, %v10809_v46, -inf  ;;  %v3093_v42 = vrot.slane %v2670_v0, %v10253_v45  ;;  %v10819_v31 = vmax.f32 %v3729_v3, %v3730_v43  ;;  %v12792_v46 = vld [vmem:[#allocation36_spill] sm:$0xff] }
 0x251   :  { %v3791_v23 = vrot.slane %v3790_v9, 2  ;;  %v3797_v20 = vmax.f32 %v3795_v44, %v3796_v2  ;;  %v3804_v37 = vmax.f32 %v3802_v29, %v3803_v27  ;;  %v3810_v32 = vrot.slane %v3809_v57, 4 }
 0x252   :  { %v3762_v40 = vmax.f32 %v3760_v39, %v3761_v33  ;;  %v3768_v53 = vrot.slane %v3767_v1, 4  ;;  %v12782_v61 = vrot.slane %v10586_v22, 1  ;;  %v10828_v0 = vsel %vm3982_vm5, %v10801_v25, %v3710_v62 }
 0x253   :  { %v3792_v17 = vmax.f32 %v3790_v9, %v3791_v23  ;;  %v3798_v35 = vrot.slane %v3797_v20, 2  ;;  %v3805_v8 = vrot.slane %v3804_v37, 2  ;;  %v3811_v16 = vmax.f32 %v3809_v57, %v3810_v32  ;;  %12784 = vst [vmem:[#allocation63_spill] sm:$0xff] %v10828_v0 }
 0x254   :  { %v10824_v15 = vmax.f32 %v10586_v22, %v12782_v61  ;;  %v3775_v44 = vrot.slane %v3774_v12, 4  ;;  %v10831_v29 = vrot.slane %v3086_v55, %v10253_v45  ;;  %v3101_v3 = vcombine.high %v3093_v42, %v3093_v42 }
 0x255   :  { %v3793_v43 = vrot.slane %v3792_v17, 1  ;;  %v3799_v39 = vmax.f32 %v3797_v20, %v3798_v35  ;;  %v3806_v2 = vmax.f32 %v3804_v37, %v3805_v8  ;;  %v3812_v27 = vrot.slane %v3811_v16, 2 }
 0x256   :  { %12783 = vst [vmem:[#allocation24_spill] sm:$0xff] %v10824_v15  ;;  %12785 = vst [vmem:[#allocation64_spill] sm:$0xff] %v10831_v29  ;;  %v3763_v9 = vrot.slane %v3762_v40, 2  ;;  %v3844_v33 = vsel %vm3199_vm4, %v3093_v42, -inf  ;;  %v3851_v57 = vsel %vm3199_vm4, %v3101_v3, -inf  ;;  %v10837_v61 = vmax.f32 %v3767_v1, %v3768_v53  ;;  %v3872_v42 = vld [vmem:[%s12554_s4] sm:$0xff] }
 0x257   :  { %v3800_v23 = vrot.slane %v3799_v39, 1  ;;  %v3807_v62 = vrot.slane %v3806_v2, 1  ;;  %v3813_v32 = vmax.f32 %v3811_v16, %v3812_v27  ;;  %v10839_v55 = vmax.f32 %v3774_v12, %v3775_v44  ;;  %v3873_v53 = vld [vmem:[%s12554_s4 + $0x8] sm:$0xff] }
 0x258   :  { %12786 = vst [vmem:[#allocation65_spill] sm:$0xff] %v10837_v61  ;;  %v3845_v0 = vrot.slane %v3844_v33, 4  ;;  %v3852_v7 = vrot.slane %v3851_v57, 4  ;;  %v3858_v8 = vsel %vm3199_vm4, %v10831_v29, -inf  ;;  %v3794_v20 = vmax.f32 %v3792_v17, %v3793_v43  ;;  %v3887_v17 = vld [vmem:[%s12555_s5] sm:$0xff]  ;;  %v3888_v44 = vld [vmem:[%s12555_s5 + $0x8] sm:$0xff] }
 0x259   :  { %12787 = vst [vmem:[#allocation66_spill] sm:$0xff] %v10839_v55  ;;  %v10843_v37 = vmax.f32 %v3799_v39, %v3800_v23  ;;  %v3814_v35 = vrot.slane %v3813_v32, 1  ;;  %v3859_v22 = vrot.slane %v3858_v8, 4  ;;  %v10848_v3 = vmax.f32 %v3762_v40, %v3763_v9  ;;  %v3875_v23 = vld [vmem:[%s12554_s4 + $0x18] sm:$0xff] }
 0x25a   :  { %v3846_v1 = vmax.f32 %v3844_v33, %v3845_v0  ;;  %v2669_v12 = vmax.f32 %v2645_v28, 0.0  ;;  %v10861_v43 = vmax.f32 %v3806_v2, %v3807_v62  ;;  %v10869_v28 = vmax.f32 %v3851_v57, %v3852_v7  ;;  %v3874_v2 = vld [vmem:[%s12554_s4 + $0x10] sm:$0xff]  ;;  %v3879_v55 = vld [vmem:[%s12554_s4 + $0x38] sm:$0xff] }
 0x25b   :  { %v10863_v40 = vmax.f32 %v3813_v32, %v3814_v35  ;;  %v10867_v0 = vsel %vm3982_vm5, %v10843_v37, %v3794_v20  ;;  %v4003_v33 = vsel %vm3982_vm5, %v10529_v34, %v10511_v19  ;;  %v10881_v62 = vmax.f32 %v3858_v8, %v3859_v22 }
 0x25c   :  { %12788 = vst [vmem:[#allocation67_spill] sm:$0xff] %v10869_v28  ;;  %v3847_v39 = vrot.slane %v3846_v1, 2  ;;  %v3069_v27 = vcombine.high %v2669_v12, %v2669_v12  ;;  %v3076_v9 = vrot.slane %v2669_v12, %v10253_v45  ;;  %v4004_v7 = vsel %vm3984_vm6, %v10531_v36, %v4003_v33 }
 0x25d   :  { %12789 = vst [vmem:[#allocation68_spill] sm:$0xff] %v10881_v62  ;;  %v8715_v57 = vpack.c.bf16 %v3873_v53, %v3872_v42  ;;  %v8771_v32 = vpack.c.bf16 %v3888_v44, %v3887_v17  ;;  %v12790_v12 = vrot.slane %v10596_v4, 1  ;;  %v4005_v22 = vsel %vm3986_vm7, %v10516_v52, %v4004_v7  ;;  %v3889_v53 = vld [vmem:[%s12555_s5 + $0x10] sm:$0xff]  ;;  %v3876_v7 = vld [vmem:[%s12554_s4 + $0x20] sm:$0xff]  ;;  %v12793_v62 = vld [vmem:[#allocation47_spill] sm:$0xff] }
 0x25e   :  { %v3083_v20 = vrot.slane %v3069_v27, %v10253_v45  ;;  %v3084_v35 = vcombine.high %v3076_v9, %v3076_v9  ;;  %v3816_v19 = vsel %vm3199_vm4, %v3076_v9, -inf  ;;  %v4010_v8 = vsel %vm3982_vm5, %v10561_v11, %v10563_v59  ;;  %v3892_v45 = vld [vmem:[%s12555_s5 + $0x28] sm:$0xff] }
 0x25f   :  { %v10890_v16 = vmax.f32 %v10596_v4, %v12790_v12  ;;  %v3817_v29 = vrot.slane %v3816_v19, 4  ;;  %8716 = vmatprep.subr.bf16.mxu0 %v8715_v57  ;;  %8772 = vmatprep.subr.bf16.mxu1 %v8771_v32  ;;  %v8719_v42 = vpack.c.bf16 %v3875_v23, %v3874_v2  ;;  %v3890_v4 = vld [vmem:[%s12555_s5 + $0x18] sm:$0xff]  ;;  %v10903_v17 = vmax.f32 %v3846_v1, %v3847_v39  ;;  %v3877_v1 = vld [vmem:[%s12554_s4 + $0x28] sm:$0xff] }
 0x260   :  { %v3085_v44 = vcombine.high %v3083_v20, %v3083_v20  ;;  %v3823_v27 = vsel %vm3199_vm4, %v3084_v35, -inf  ;;  %v3830_v9 = vsel %vm3199_vm4, %v3083_v20, -inf  ;;  %8718 = vmatpush3.bf16.msra.mxu0 %v8715_v57  ;;  %8774 = vmatpush3.bf16.msra.mxu1 %v8771_v32  ;;  %v4006_v23 = vsel %vm3988_vm8, %v10520_v48, %v4005_v22  ;;  %v3891_v22 = vld [vmem:[%s12555_s5 + $0x20] sm:$0xff] }
 0x261   :  { %12791 = vst [vmem:[#allocation69_spill] sm:$0xff] %v10890_v16  ;;  %v3818_v33 = vmax.f32 %v3816_v19, %v3817_v29  ;;  %v3824_v59 = vrot.slane %v3823_v27, 4  ;;  %v3831_v2 = vrot.slane %v3830_v9, 4  ;;  %8720 = vmatprep.subr.bf16.mxu0 %v8719_v42  ;;  %v4007_v57 = vsel %vm3990_vm9, %v10522_v13, %v4006_v23 }
 0x262   :  { %v3837_v39 = vsel %vm3199_vm4, %v3085_v44, -inf  ;;  %v4011_v29 = vsel %vm3984_vm6, %v10568_v54, %v4010_v8  ;;  %v8775_v32 = vpack.c.bf16 %v3890_v4, %v3889_v53  ;;  %v3681_v44 = vrot.slane %v10753_v24, 1 }
 0x263   :  { %v3819_v20 = vrot.slane %v3818_v33, 2  ;;  %v3825_v35 = vmax.f32 %v3823_v27, %v3824_v59  ;;  %v3832_v19 = vmax.f32 %v3830_v9, %v3831_v2  ;;  %v3838_v12 = vrot.slane %v3837_v39, 4  ;;  %v3878_v2 = vld [vmem:[%s12554_s4 + $0x30] sm:$0xff] }
 0x264   :  { %v4008_v23 = vsel %vm3992_vm10, %v12792_v46, %v4007_v57  ;;  %v4012_v8 = vsel %vm3986_vm7, %v12793_v62, %v4011_v29  ;;  %8776 = vmatprep.subr.bf16.mxu1 %v8775_v32  ;;  %8722 = vmatpush3.bf16.msra.mxu0 %v8719_v42  ;;  %v8723_v53 = vpack.c.bf16 %v3877_v1, %v3876_v7  ;;  %v12794_v29 = vld [vmem:[#allocation48_spill] sm:$0xff]  ;;  %v12795_v7 = vrot.slane %v10705_v38, 1 }
 0x265   :  { %v3820_v4 = vmax.f32 %v3818_v33, %v3819_v20  ;;  %v3826_v27 = vrot.slane %v3825_v35, 2  ;;  %v3833_v9 = vrot.slane %v3832_v19, 2  ;;  %v3839_v59 = vmax.f32 %v3837_v39, %v3838_v12  ;;  %8778 = vmatpush3.bf16.msra.mxu1 %v8775_v32 }
 0x266   :  { %v4009_v57 = vsel %vm3994_vm11, %v10824_v15, %v4008_v23  ;;  %v4013_v42 = vsel %vm3988_vm8, %v12794_v29, %v4012_v8  ;;  %8724 = vmatprep.subr.bf16.mxu0 %v8723_v53  ;;  %v8779_v33 = vpack.c.bf16 %v3892_v45, %v3891_v22  ;;  %v10944_v1 = vmax.f32 %v10705_v38, %v12795_v7  ;;  %v3893_v23 = vld [vmem:[%s12555_s5 + $0x30] sm:$0xff]  ;;  %v3894_v45 = vld [vmem:[%s12555_s5 + $0x38] sm:$0xff]  ;;  %v3880_v7 = vld [vmem:[%s12554_s4 + $0x40] sm:$0xff] }
 0x267   :  { %v3821_v39 = vrot.slane %v3820_v4, 1  ;;  %v3827_v32 = vmax.f32 %v3825_v35, %v3826_v27  ;;  %v3834_v20 = vmax.f32 %v3832_v19, %v3833_v9  ;;  %v3840_v12 = vrot.slane %v3839_v59, 2  ;;  %8091 = vmatprep.mubr.msk.f32.mxu0 %vm4045_vm12, %v4009_v57  ;;  %8175 = vmatprep.mubr.msk.f32.mxu1 %vm4045_vm12, %v4009_v57  ;;  %v12797_v22 = vld [vmem:[#allocation49_spill] sm:$0xff] }
 0x268   :  { %12796 = vst [vmem:[#allocation70_spill] sm:$0xff] %v10944_v1  ;;  %v4014_v38 = vsel %vm3990_vm9, %v12797_v22, %v4013_v42  ;;  %8780 = vmatprep.subr.bf16.mxu1 %v8779_v33  ;;  %8726 = vmatpush3.bf16.msra.mxu0 %v8723_v53  ;;  %v4017_v35 = vsel %vm3982_vm5, %v10653_v10, %v10649_v5  ;;  %v3881_v42 = vld [vmem:[%s12554_s4 + $0x48] sm:$0xff]  ;;  %v12799_v53 = vld [vmem:[#allocation50_spill] sm:$0xff] }
 0x269   :  { %v8727_v19 = vpack.c.bf16 %v3879_v55, %v3878_v2  ;;  %v10959_v8 = vmax.f32 %v3820_v4, %v3821_v39  ;;  %v3828_v27 = vrot.slane %v3827_v32, 1  ;;  %v3835_v9 = vrot.slane %v3834_v20, 1  ;;  %8782 = vmatpush3.bf16.msra.mxu1 %v8779_v33 }
 0x26a   :  { %v3841_v57 = vmax.f32 %v3839_v59, %v3840_v12  ;;  %v4015_v28 = vsel %vm3992_vm10, %v12799_v53, %v4014_v38  ;;  %v4018_v5 = vsel %vm3984_vm6, %v10655_v56, %v4017_v35  ;;  %v8783_v55 = vpack.c.bf16 %v3894_v45, %v3893_v23  ;;  %v3895_v12 = vld [vmem:[%s12555_s5 + $0x40] sm:$0xff]  ;;  %v3896_v38 = vld [vmem:[%s12555_s5 + $0x48] sm:$0xff]  ;;  %v3883_v23 = vld [vmem:[%s12554_s4 + $0x58] sm:$0xff] }
 0x26b   :  { %12798 = vst [vmem:[#allocation71_spill] sm:$0xff] %v10959_v8  ;;  %8728 = vmatprep.subr.bf16.mxu0 %v8727_v19  ;;  %v10972_v4 = vmax.f32 %v10753_v24, %v3681_v44  ;;  %v10974_v59 = vmax.f32 %v3827_v32, %v3828_v27  ;;  %v10976_v2 = vmax.f32 %v3834_v20, %v3835_v9  ;;  %v3882_v24 = vld [vmem:[%s12554_s4 + $0x50] sm:$0xff]  ;;  %v3765_v44 = vrot.slane %v10848_v3, 1  ;;  %v3898_v35 = vld [vmem:[%s12555_s5 + $0x58] sm:$0xff] }
 0x26c   :  { %v3842_v33 = vrot.slane %v3841_v57, 1  ;;  %v4016_v39 = vsel %vm3994_vm11, %v10890_v16, %v4015_v28  ;;  %v4019_v28 = vsel %vm3986_vm7, %v10643_v58, %v4018_v5  ;;  %v4024_v32 = vsel %vm3982_vm5, %v10686_v14, %v10677_v18  ;;  %v3897_v45 = vld [vmem:[%s12555_s5 + $0x50] sm:$0xff]  ;;  %8784 = vmatprep.subr.bf16.mxu1 %v8783_v55  ;;  %8730 = vmatpush3.bf16.msra.mxu0 %v8727_v19  ;;  %v3885_v19 = vld [vmem:[%s12554_s4 + $0x68] sm:$0xff] }
 0x26d   :  { %12800 = vst [vmem:[#allocation72_spill] sm:$0xff] %v10972_v4  ;;  %12801 = vst [vmem:[#allocation73_spill] sm:$0xff] %v10974_v59  ;;  %8092 = vmatmul.mubr.msk.f32.gmra.mrb[26].mxu0 %vm4045_vm12, %v4016_v39  ;;  %8176 = vmatmul.mubr.msk.f32.gmra.mrb[26].mxu1 %vm4045_vm12, %v4016_v39  ;;  %v8731_v20 = vpack.c.bf16 %v3881_v42, %v3880_v7  ;;  %v4020_v9 = vsel %vm3988_vm8, %v10645_v41, %v4019_v28  ;;  %v3849_v7 = vrot.slane %v10903_v17, 1 }
 0x26e   :  { %12802 = vst [vmem:[#allocation74_spill] sm:$0xff] %v10976_v2  ;;  %v11006_v27 = vmax.f32 %v3841_v57, %v3842_v33  ;;  %v4025_v18 = vsel %vm3984_vm6, %v10688_v63, %v4024_v32  ;;  %v4021_v42 = vsel %vm3990_vm9, %v10647_v50, %v4020_v9  ;;  %8786 = vmatpush3.bf16.msra.mxu1 %v8783_v55  ;;  %v3884_v33 = vld [vmem:[%s12554_s4 + $0x60] sm:$0xff] }
 0x26f   :  { %v4026_v5 = vsel %vm3986_vm7, %v10761_v6, %v4025_v18  ;;  %8732 = vmatprep.subr.bf16.mxu0 %v8731_v20  ;;  %v8787_v57 = vpack.c.bf16 %v3896_v38, %v3895_v12  ;;  %v4022_v39 = vsel %vm3992_vm10, %v10651_v51, %v4021_v42  ;;  %v8735_v55 = vpack.c.bf16 %v3883_v23, %v3882_v24  ;;  %v3899_v12 = vld [vmem:[%s12555_s5 + $0x60] sm:$0xff]  ;;  %v3900_v38 = vld [vmem:[%s12555_s5 + $0x68] sm:$0xff] }
 0x270   :  { %12803 = vst [vmem:[#allocation75_spill] sm:$0xff] %v11006_v27  ;;  %v4027_v28 = vsel %vm3988_vm8, %v10772_v21, %v4026_v5  ;;  %v8791_v32 = vpack.c.bf16 %v3898_v35, %v3897_v45  ;;  %v4023_v9 = vsel %vm3994_vm11, %v10944_v1, %v4022_v39  ;;  %v11038_v42 = vmax.f32 %v10848_v3, %v3765_v44  ;;  %v6879_v44 = vld [vmem:[%s12554_s4 + $0xf0] sm:$0xff]  ;;  %v6880_v39 = vld [vmem:[%s12554_s4 + $0xf8] sm:$0xff] }
 0x271   :  { %v4028_v18 = vsel %vm3990_vm9, %v10770_v26, %v4027_v28  ;;  %8788 = vmatprep.subr.bf16.mxu1 %v8787_v57  ;;  %v4031_v24 = vsel %vm3982_vm5, %v10803_v60, %v10801_v25  ;;  %8094 = vmatprep.mubr.msk.f32.mxu0 %vm4045_vm12, %v4023_v9  ;;  %v8739_v35 = vpack.c.bf16 %v3885_v19, %v3884_v33  ;;  %v12806_v19 = vld [vmem:[#allocation19_spill] sm:$0xff]  ;;  %v12817_v1 = vld [vmem:[#allocation32_spill] sm:$0xff] }
 0x272   :  { %12804 = vst [vmem:[#allocation76_spill] sm:$0xff] %v11038_v42  ;;  %8178 = vmatprep.mubr.msk.f32.mxu1 %vm4045_vm12, %v4023_v9  ;;  %v4029_v23 = vsel %vm3992_vm10, %v10789_v47, %v4028_v18  ;;  %v4032_v45 = vsel %vm3984_vm6, %v10819_v31, %v4031_v24  ;;  %8734 = vmatpush3.bf16.msra.mxu0 %v8731_v20  ;;  %v12808_v9 = vld [vmem:[#allocation9_spill] sm:$0xff] }
 0x273   :  { %v4030_v5 = vsel %vm3994_vm11, %v10972_v4, %v4029_v23  ;;  %8790 = vmatpush3.bf16.msra.mxu1 %v8787_v57  ;;  %v4033_v3 = vsel %vm3986_vm7, %v10791_v30, %v4032_v45  ;;  %v8795_v25 = vpack.c.bf16 %v3900_v38, %v3899_v12  ;;  %v11064_v57 = vmax.f32 %v10903_v17, %v3849_v7  ;;  %v12807_v38 = vld [vmem:[#allocation16_spill] sm:$0xff]  ;;  %v12809_v7 = vld [vmem:[#allocation22_spill] sm:$0xff]  ;;  %v12810_v45 = vld [vmem:[#allocation15_spill] sm:$0xff] }
 0x274   :  { %8095 = vmatmul.mubr.msk.f32.gmra.mrb[28].mxu0 %vm4045_vm12, %v4030_v5  ;;  %8179 = vmatmul.mubr.msk.f32.gmra.mrb[28].mxu1 %vm4045_vm12, %v4030_v5  ;;  %v4034_v20 = vsel %vm3988_vm8, %v10793_v49, %v4033_v3  ;;  %v4038_v33 = vsel %vm3982_vm5, %v10861_v43, %v10843_v37  ;;  %v4176_v18 = vsel %vm3984_vm6, %v12808_v9, %v12807_v38  ;;  %v6902_v17 = vld [vmem:[%s12555_s5 + $0xf0] sm:$0xff]  ;;  %v6903_v37 = vld [vmem:[%s12555_s5 + $0xf8] sm:$0xff]  ;;  %v12811_v38 = vld [vmem:[#allocation3_spill] sm:$0xff] }
 0x275   :  { %12805 = vst [vmem:[#allocation77_spill] sm:$0xff] %v11064_v57  ;;  %8736 = vmatprep.subr.bf16.mxu0 %v8735_v55  ;;  %8792 = vmatprep.subr.bf16.mxu1 %v8791_v32  ;;  %v4035_v28 = vsel %vm3990_vm9, %v12806_v19, %v4034_v20  ;;  %v4039_v12 = vsel %vm3984_vm6, %v10863_v40, %v4038_v33 }
 0x276   :  { %v4036_v24 = vsel %vm3992_vm10, %v12809_v7, %v4035_v28  ;;  %v4040_v23 = vsel %vm3986_vm7, %v10959_v8, %v4039_v12  ;;  %v4177_v5 = vsel %vm3986_vm7, %v12810_v45, %v4176_v18  ;;  %v11088_v3 = vpack.c.bf16 %v6880_v39, %v6879_v44  ;;  %8738 = vmatpush3.bf16.msra.mxu0 %v8735_v55  ;;  %v12812_v44 = vld [vmem:[#allocation4_spill] sm:$0xff]  ;;  %v6881_v39 = vld [vmem:[%s12554_s4 + $0x100] sm:$0xff]  ;;  %v6882_v12 = vld [vmem:[%s12554_s4 + $0x108] sm:$0xff] }
 0x277   :  { %8794 = vmatpush3.bf16.msra.mxu1 %v8791_v32  ;;  %v4037_v20 = vsel %vm3994_vm11, %v11038_v42, %v4036_v24  ;;  %v4041_v33 = vsel %vm3988_vm8, %v10974_v59, %v4040_v23  ;;  %v4178_v4 = vsel %vm3988_vm8, %v12811_v38, %v4177_v5  ;;  %v8827_v32 = vpack.c.bf16 %v6903_v37, %v6902_v17  ;;  %v12813_v24 = vld [vmem:[#allocation5_spill] sm:$0xff]  ;;  %v12814_v5 = vld [vmem:[#allocation14_spill] sm:$0xff]  ;;  %v6905_v37 = vld [vmem:[%s12555_s5 + $0x108] sm:$0xff] }
 0x278   :  { %8097 = vmatprep.mubr.msk.f32.mxu0 %vm4045_vm12, %v4037_v20  ;;  %8181 = vmatprep.mubr.msk.f32.mxu1 %vm4045_vm12, %v4037_v20  ;;  %v4042_v28 = vsel %vm3990_vm9, %v10976_v2, %v4041_v33  ;;  %v4179_v55 = vsel %vm3990_vm9, %v12812_v44, %v4178_v4  ;;  %v12815_v20 = vld [vmem:[#allocation25_spill] sm:$0xff]  ;;  %v6904_v17 = vld [vmem:[%s12555_s5 + $0x100] sm:$0xff] }
 0x279   :  { %8740 = vmatprep.subr.bf16.mxu0 %v8739_v35  ;;  %8796 = vmatprep.subr.bf16.mxu1 %v8795_v25  ;;  %v4043_v18 = vsel %vm3992_vm10, %v11006_v27, %v4042_v28  ;;  %v4180_v23 = vsel %vm3992_vm10, %v12813_v24, %v4179_v55  ;;  %v4184_v4 = vsel %vm3986_vm7, %v12815_v20, %v12814_v5  ;;  %v3886_v28 = vld [vmem:[%s12554_s4 + $0x70] sm:$0xff]  ;;  %v12816_v55 = vld [vmem:[#allocation6_spill] sm:$0xff]  ;;  %v12818_v20 = vld [vmem:[#allocation39_spill] sm:$0xff] }
 0x27a   :  { %v4044_v33 = vsel %vm3994_vm11, %v11064_v57, %v4043_v18  ;;  %v4181_v42 = vsel %vm3994_vm11, %v12816_v55, %v4180_v23  ;;  %v4185_v5 = vsel %vm3988_vm8, %v12817_v1, %v4184_v4  ;;  %v4190_v61 = vsel %vm3984_vm6, %v10529_v34, %v12818_v20  ;;  %8742 = vmatpush3.bf16.msra.mxu0 %v8739_v35  ;;  %v3901_v18 = vld [vmem:[%s12555_s5 + $0x70] sm:$0xff]  ;;  %v12819_v57 = vld [vmem:[#allocation33_spill] sm:$0xff]  ;;  %v12820_v4 = vld [vmem:[#allocation34_spill] sm:$0xff] }
 0x27b   :  { %8798 = vmatpush3.bf16.msra.mxu1 %v8795_v25  ;;  %v4186_v16 = vsel %vm3990_vm9, %v12819_v57, %v4185_v5  ;;  %v4191_v15 = vsel %vm3986_vm7, %v10531_v36, %v4190_v61  ;;  %v8803_v23 = vpack.c.bf16 %v6882_v12, %v6881_v39  ;;  %8098 = vmatmul.mubr.msk.f32.gmra.mrb[30].mxu0 %vm4045_vm12, %v4044_v33  ;;  %v12821_v34 = vld [vmem:[#allocation35_spill] sm:$0xff]  ;;  %v12822_v39 = vld [vmem:[#allocation44_spill] sm:$0xff] }
 0x27c   :  { %8182 = vmatmul.mubr.msk.f32.gmra.mrb[30].mxu1 %vm4045_vm12, %v4044_v33  ;;  %v4187_v20 = vsel %vm3992_vm10, %v12820_v4, %v4186_v16  ;;  %v4192_v35 = vsel %vm3988_vm8, %v10516_v52, %v4191_v15  ;;  %v8831_v25 = vpack.c.bf16 %v6905_v37, %v6904_v17  ;;  %8128 = vmatprep.subr.mxu0 %v3886_v28  ;;  %v6883_v16 = vld [vmem:[%s12554_s4 + $0x110] sm:$0xff]  ;;  %v6884_v15 = vld [vmem:[%s12554_s4 + $0x118] sm:$0xff] }
 0x27d   :  { %8130 = vmatprep.mubr.msk.f32.mxu0 %vm4045_vm12, %v4181_v42  ;;  %v4188_v5 = vsel %vm3994_vm11, %v12821_v34, %v4187_v20  ;;  %v4193_v61 = vsel %vm3990_vm9, %v10520_v48, %v4192_v35  ;;  %v4197_v12 = vsel %vm3984_vm6, %v10561_v11, %v12822_v39  ;;  %8212 = vmatprep.subr.mxu1 %v3901_v18  ;;  %v12823_v33 = vld [vmem:[#allocation57_spill] sm:$0xff]  ;;  %v6906_v35 = vld [vmem:[%s12555_s5 + $0x110] sm:$0xff] }
 0x27e   :  { %8214 = vmatprep.mubr.msk.f32.mxu1 %vm4045_vm12, %v4181_v42  ;;  %v4194_v17 = vsel %vm3992_vm10, %v10522_v13, %v4193_v61  ;;  %v4198_v37 = vsel %vm3986_vm7, %v10568_v54, %v4197_v12  ;;  %v4204_v20 = vsel %vm3984_vm6, %v10653_v10, %v12823_v33  ;;  %v6907_v39 = vld [vmem:[%s12555_s5 + $0x118] sm:$0xff]  ;;  %8129 = vmatpush3.msra.mxu0 %v3886_v28 }
 0x27f   :  { %8213 = vmatpush3.msra.mxu1 %v3901_v18  ;;  %v4195_v42 = vsel %vm3994_vm11, %v12792_v46, %v4194_v17  ;;  %v4199_v61 = vsel %vm3988_vm8, %v12793_v62, %v4198_v37  ;;  %v4205_v12 = vsel %vm3986_vm7, %v10655_v56, %v4204_v20  ;;  %8800 = vmatprep.subr.bf16.mxu0 %v11088_v3  ;;  %v6885_v20 = vld [vmem:[%s12554_s4 + $0x120] sm:$0xff] }
 0x280   :  { %8828 = vmatprep.subr.bf16.mxu1 %v8827_v32  ;;  %v4200_v33 = vsel %vm3990_vm9, %v12794_v29, %v4199_v61  ;;  %v4206_v10 = vsel %vm3988_vm8, %v10643_v58, %v4205_v12  ;;  %v8807_v28 = vpack.c.bf16 %v6884_v15, %v6883_v16  ;;  %8131 = vmatmul.mubr.msk.f32.vlgmr.msra.gmra.mrb[24].mxu0 %vm4045_vm12, %v4188_v5  ;;  %v6886_v61 = vld [vmem:[%s12554_s4 + $0x128] sm:$0xff] }
 0x281   :  { %8215 = vmatmul.mubr.msk.f32.vlgmr.msra.gmra.mrb[24].mxu1 %vm4045_vm12, %v4188_v5  ;;  %v4201_v18 = vsel %vm3992_vm10, %v12797_v22, %v4200_v33  ;;  %v4207_v17 = vsel %vm3990_vm9, %v10645_v41, %v4206_v10  ;;  %v8835_v37 = vpack.c.bf16 %v6907_v39, %v6906_v35  ;;  %8802 = vmatpush3.bf16.msra.mxu0 %v11088_v3  ;;  %v12824_v15 = vld [vmem:[#allocation59_spill] sm:$0xff]  ;;  %v6908_v35 = vld [vmem:[%s12555_s5 + $0x120] sm:$0xff] }
 0x282   :  { %8830 = vmatpush3.bf16.msra.mxu1 %v8827_v32  ;;  %v4202_v5 = vsel %vm3994_vm11, %v12799_v53, %v4201_v18  ;;  %v4208_v16 = vsel %vm3992_vm10, %v10647_v50, %v4207_v17  ;;  %v4211_v10 = vsel %vm3984_vm6, %v10686_v14, %v12824_v15  ;;  %v6909_v39 = vld [vmem:[%s12555_s5 + $0x128] sm:$0xff]  ;;  %8133 = vmatprep.mubr.msk.f32.mxu0 %vm4045_vm12, %v4195_v42 }
 0x283   :  { %8217 = vmatprep.mubr.msk.f32.mxu1 %vm4045_vm12, %v4195_v42  ;;  %v4209_v3 = vsel %vm3994_vm11, %v10651_v51, %v4208_v16  ;;  %v4212_v32 = vsel %vm3986_vm7, %v10688_v63, %v4211_v10  ;;  %v12825_v12 = vld [vmem:[#allocation63_spill] sm:$0xff]  ;;  %8804 = vmatprep.subr.bf16.mxu0 %v8803_v23  ;;  %v11224_v15 = vpack.c.bf16 %v6886_v61, %v6885_v20 }
 0x284   :  { %v4218_v33 = vsel %vm3984_vm6, %v10803_v60, %v12825_v12  ;;  %8832 = vmatprep.subr.bf16.mxu1 %v8831_v25  ;;  %v4213_v18 = vsel %vm3988_vm8, %v10761_v6, %v4212_v32  ;;  %v12826_v42 = vld [vmem:[#allocation23_spill] sm:$0xff]  ;;  %8134 = vmatmul.mubr.msk.f32.gmra.mrb[26].mxu0 %vm4045_vm12, %v4202_v5  ;;  %v8839_v12 = vpack.c.bf16 %v6909_v39, %v6908_v35  ;;  %v6888_v35 = vld [vmem:[%s12554_s4 + $0x138] sm:$0xff]  ;;  %v6910_v39 = vld [vmem:[%s12555_s5 + $0x130] sm:$0xff] }
 0x285   :  { %v4219_v17 = vsel %vm3986_vm7, %v10819_v31, %v4218_v33  ;;  %v3266_v50 = vrot.slane %v12826_v42, 2  ;;  %8218 = vmatmul.mubr.msk.f32.gmra.mrb[26].mxu1 %vm4045_vm12, %v4202_v5  ;;  %v4214_v16 = vsel %vm3990_vm9, %v10772_v21, %v4213_v18  ;;  %8806 = vmatpush3.bf16.msra.mxu0 %v8803_v23  ;;  %v4225_v61 = vsel %vm3984_vm6, %v10861_v43, %v10867_v0  ;;  %v6887_v5 = vld [vmem:[%s12554_s4 + $0x130] sm:$0xff]  ;;  %v6911_v33 = vld [vmem:[%s12555_s5 + $0x138] sm:$0xff] }
 0x286   :  { %v4220_v10 = vsel %vm3988_vm8, %v10791_v30, %v4219_v17  ;;  %8834 = vmatpush3.bf16.msra.mxu1 %v8831_v25  ;;  %v4215_v32 = vsel %vm3992_vm10, %v10770_v26, %v4214_v16  ;;  %8136 = vmatprep.mubr.msk.f32.mxu0 %vm4045_vm12, %v4209_v3  ;;  %v4226_v0 = vsel %vm3986_vm7, %v10863_v40, %v4225_v61  ;;  %v6889_v16 = vld [vmem:[%s12554_s4 + $0x140] sm:$0xff] }
 0x287   :  { %v4221_v20 = vsel %vm3990_vm9, %v10793_v49, %v4220_v10  ;;  %8220 = vmatprep.mubr.msk.f32.mxu1 %vm4045_vm12, %v4209_v3  ;;  %v4216_v23 = vsel %vm3994_vm11, %v10789_v47, %v4215_v32  ;;  %8808 = vmatprep.subr.bf16.mxu0 %v8807_v28  ;;  %v4227_v18 = vsel %vm3988_vm8, %v10959_v8, %v4226_v0  ;;  %v6890_v10 = vld [vmem:[%s12554_s4 + $0x148] sm:$0xff]  ;;  %v12827_v32 = vld [vmem:[#allocation28_spill] sm:$0xff] }
 0x288   :  { %v4222_v25 = vsel %vm3992_vm10, %v12806_v19, %v4221_v20  ;;  %8836 = vmatprep.subr.bf16.mxu1 %v8835_v37  ;;  %v3267_v17 = vmax.f32 %v12826_v42, %v3266_v50  ;;  %v3352_v20 = vrot.slane %v12827_v32, 1  ;;  %8137 = vmatmul.mubr.msk.f32.gmra.mrb[28].mxu0 %vm4045_vm12, %v4216_v23  ;;  %v4228_v61 = vsel %vm3990_vm9, %v10974_v59, %v4227_v18  ;;  %v6913_v0 = vld [vmem:[%s12555_s5 + $0x148] sm:$0xff] }
 0x289   :  { %v4223_v3 = vsel %vm3994_vm11, %v12809_v7, %v4222_v25  ;;  %8221 = vmatmul.mubr.msk.f32.gmra.mrb[28].mxu1 %vm4045_vm12, %v4216_v23  ;;  %v4602_v50 = vsel %vm3982_vm5, %v12810_v45, %v12808_v9  ;;  %v8815_v42 = vpack.c.bf16 %v6888_v35, %v6887_v5  ;;  %v6912_v25 = vld [vmem:[%s12555_s5 + $0x140] sm:$0xff]  ;;  %v6891_v23 = vld [vmem:[%s12554_s4 + $0x150] sm:$0xff]  ;;  %8810 = vmatpush3.bf16.msra.mxu0 %v8807_v28  ;;  %v6892_v35 = vld [vmem:[%s12554_s4 + $0x158] sm:$0xff] }
 0x28a   :  { %8838 = vmatpush3.bf16.msra.mxu1 %v8835_v37  ;;  %v4229_v18 = vsel %vm3992_vm10, %v10976_v2, %v4228_v61  ;;  %v3268_v59 = vrot.slane %v3267_v17, 1  ;;  %v4603_v9 = vsel %vm3984_vm6, %v12811_v38, %v4602_v50  ;;  %v8843_v5 = vpack.c.bf16 %v6911_v33, %v6910_v39  ;;  %v6914_v45 = vld [vmem:[%s12555_s5 + $0x150] sm:$0xff]  ;;  %v6915_v28 = vld [vmem:[%s12555_s5 + $0x158] sm:$0xff]  ;;  %8139 = vmatprep.mubr.msk.f32.mxu0 %vm4045_vm12, %v4223_v3 }
 0x28b   :  { %8223 = vmatprep.mubr.msk.f32.mxu1 %vm4045_vm12, %v4223_v3  ;;  %v4230_v37 = vsel %vm3994_vm11, %v11006_v27, %v4229_v18  ;;  %v4604_v39 = vsel %vm3986_vm7, %v12812_v44, %v4603_v9  ;;  %v8819_v33 = vpack.c.bf16 %v6890_v10, %v6889_v16  ;;  %8812 = vmatprep.subr.bf16.mxu0 %v11224_v15  ;;  %v6925_v3 = vld [vmem:[%s12554_s4 + $0x168] sm:$0xff]  ;;  %v6926_v18 = vld [vmem:[%s12554_s4 + $0x170] sm:$0xff]  ;;  %v12828_v27 = vld [vmem:[#allocation41_spill] sm:$0xff] }
 0x28c   :  { %8840 = vmatprep.subr.bf16.mxu1 %v8839_v12  ;;  %v11308_v61 = vmax.f32 %v3267_v17, %v3268_v59  ;;  %v4605_v50 = vsel %vm3988_vm8, %v12813_v24, %v4604_v39  ;;  %v8847_v38 = vpack.c.bf16 %v6913_v0, %v6912_v25  ;;  %v3434_v9 = vrot.slane %v12828_v27, 2  ;;  %8140 = vmatmul.mubr.msk.f32.gmra.mrb[30].mxu0 %vm4045_vm12, %v4230_v37  ;;  %v6948_v10 = vld [vmem:[%s12555_s5 + $0x168] sm:$0xff]  ;;  %v6949_v25 = vld [vmem:[%s12555_s5 + $0x170] sm:$0xff]  ;;  %v12829_v0 = vld [vmem:[#allocation45_spill] sm:$0xff] }
 0x28d   :  { %8224 = vmatmul.mubr.msk.f32.gmra.mrb[30].mxu1 %vm4045_vm12, %v4230_v37  ;;  %v4606_v59 = vsel %vm3990_vm9, %v12816_v55, %v4605_v50  ;;  %v11323_v17 = vpack.c.bf16 %v6892_v35, %v6891_v23  ;;  %v11325_v16 = vpack.c.bf16 %v6915_v28, %v6914_v45  ;;  %v3518_v39 = vrot.slane %v12829_v0, 2  ;;  %8814 = vmatpush3.bf16.msra.mxu0 %v11224_v15  ;;  %v12830_v37 = vld [vmem:[#allocation61_spill] sm:$0xff]  ;;  %v12832_v45 = vld [vmem:[#allocation27_spill] sm:$0xff] }
 0x28e   :  { %8842 = vmatpush3.bf16.msra.mxu1 %v8839_v12  ;;  %v4607_v50 = vsel %vm3992_vm10, %v12830_v37, %v4606_v59  ;;  %v11338_v23 = vmax.f32 %v12827_v32, %v3352_v20  ;;  %v4610_v35 = vsel %vm3984_vm6, %v12817_v1, %v12832_v45  ;;  %8816 = vmatprep.subr.bf16.mxu0 %v8815_v42  ;;  %v12833_v12 = vld [vmem:[#allocation7_spill] sm:$0xff] }
 0x28f   :  { %v4608_v28 = vsel %vm3994_vm11, %v11308_v61, %v4607_v50  ;;  %8844 = vmatprep.subr.bf16.mxu1 %v8843_v5  ;;  %v4611_v55 = vsel %vm3986_vm7, %v12819_v57, %v4610_v35  ;;  %v11347_v15 = vpack.c.bf16 %v6926_v18, %v6925_v3  ;;  %v3602_v24 = vrot.slane %v12833_v12, 2  ;;  %v12834_v50 = vld [vmem:[#allocation10_spill] sm:$0xff] }
 0x290   :  { %12831 = vst [vmem:[#allocation16_spill] sm:$0xff] %v11338_v23  ;;  %8256 = vmatprep.mubr.msk.f32.mxu0 %vm4045_vm12, %v4608_v28  ;;  %8298 = vmatprep.mubr.msk.f32.mxu1 %vm4045_vm12, %v4608_v28  ;;  %v4612_v32 = vsel %vm3988_vm8, %v12820_v4, %v4611_v55  ;;  %v11354_v20 = vpack.c.bf16 %v6949_v25, %v6948_v10  ;;  %v3686_v45 = vrot.slane %v12834_v50, 2  ;;  %v12835_v3 = vld [vmem:[#allocation38_spill] sm:$0xff]  ;;  %v6927_v55 = vld [vmem:[%s12554_s4 + $0x178] sm:$0xff] }
 0x291   :  { %v3435_v59 = vmax.f32 %v12828_v27, %v3434_v9  ;;  %v4613_v35 = vsel %vm3990_vm9, %v12821_v34, %v4612_v32  ;;  %v4616_v18 = vsel %vm3982_vm5, %v10531_v36, %v12835_v3  ;;  %v3519_v57 = vmax.f32 %v12829_v0, %v3518_v39  ;;  %v6928_v27 = vld [vmem:[%s12554_s4 + $0x180] sm:$0xff]  ;;  %8818 = vmatpush3.bf16.msra.mxu0 %v8815_v42  ;;  %v12836_v9 = vld [vmem:[#allocation31_spill] sm:$0xff]  ;;  %v6950_v39 = vld [vmem:[%s12555_s5 + $0x178] sm:$0xff] }
 0x292   :  { %v4623_v28 = vsel %vm3982_vm5, %v10568_v54, %v10561_v11  ;;  %8846 = vmatpush3.bf16.msra.mxu1 %v8843_v5  ;;  %v4614_v10 = vsel %vm3992_vm10, %v12836_v9, %v4613_v35  ;;  %v4617_v0 = vsel %vm3984_vm6, %v10516_v52, %v4616_v18  ;;  %v6951_v32 = vld [vmem:[%s12555_s5 + $0x180] sm:$0xff]  ;;  %8820 = vmatprep.subr.bf16.mxu0 %v8819_v33 }
 0x293   :  { %v3436_v25 = vrot.slane %v3435_v59, 1  ;;  %v4624_v11 = vsel %vm3984_vm6, %v12793_v62, %v4623_v28  ;;  %8848 = vmatprep.subr.bf16.mxu1 %v8847_v38  ;;  %v11387_v42 = vsel %vm3994_vm11, %v11338_v23, %v4614_v10  ;;  %v4618_v5 = vsel %vm3986_vm7, %v10520_v48, %v4617_v0 }
 0x294   :  { %v3520_v35 = vrot.slane %v3519_v57, 1  ;;  %v4625_v3 = vsel %vm3986_vm7, %v12794_v29, %v4624_v11  ;;  %v4619_v28 = vsel %vm3988_vm8, %v10522_v13, %v4618_v5  ;;  %v11399_v62 = vpack.c.bf16 %v6928_v27, %v6927_v55  ;;  %v12839_v27 = vld [vmem:[#allocation69_spill] sm:$0xff]  ;;  %v12841_v5 = vld [vmem:[#allocation55_spill] sm:$0xff] }
 0x295   :  { %v11393_v18 = vmax.f32 %v3435_v59, %v3436_v25  ;;  %v4626_v9 = vsel %vm3988_vm8, %v12797_v22, %v4625_v3  ;;  %v4620_v10 = vsel %vm3990_vm9, %v12792_v46, %v4619_v28  ;;  %v11407_v54 = vpack.c.bf16 %v6951_v32, %v6950_v39  ;;  %v6929_v59 = vld [vmem:[%s12554_s4 + $0x188] sm:$0xff]  ;;  %8822 = vmatpush3.bf16.msra.mxu0 %v8819_v33  ;;  %v12838_v25 = vld [vmem:[#allocation24_spill] sm:$0xff]  ;;  %v12840_v33 = vld [vmem:[#allocation65_spill] sm:$0xff] }
 0x296   :  { %v11403_v23 = vmax.f32 %v3519_v57, %v3520_v35  ;;  %v4627_v0 = vsel %vm3990_vm9, %v12799_v53, %v4626_v9  ;;  %8850 = vmatpush3.bf16.msra.mxu1 %v8847_v38  ;;  %v4621_v55 = vsel %vm3992_vm10, %v12838_v25, %v4620_v10  ;;  %v3603_v57 = vmax.f32 %v12833_v12, %v3602_v24  ;;  %v6930_v9 = vld [vmem:[%s12554_s4 + $0x190] sm:$0xff]  ;;  %v6952_v39 = vld [vmem:[%s12555_s5 + $0x188] sm:$0xff]  ;;  %v6893_v10 = vld [vmem:[%s12554_s4 + $0x160] sm:$0xff] }
 0x297   :  { %v4628_v11 = vsel %vm3992_vm10, %v12839_v27, %v4627_v0  ;;  %v6953_v38 = vld [vmem:[%s12555_s5 + $0x190] sm:$0xff]  ;;  %v3770_v32 = vrot.slane %v12840_v33, 2  ;;  %8824 = vmatprep.subr.bf16.mxu0 %v11323_v17  ;;  %8852 = vmatprep.subr.bf16.mxu1 %v11325_v16  ;;  %v4622_v24 = vsel %vm3994_vm11, %v11393_v18, %v4621_v55  ;;  %v4630_v35 = vsel %vm3982_vm5, %v10655_v56, %v12841_v5  ;;  %v12842_v3 = vld [vmem:[#allocation67_spill] sm:$0xff]  ;;  %v6916_v0 = vld [vmem:[%s12555_s5 + $0x160] sm:$0xff] }
 0x298   :  { %12837 = vst [vmem:[#allocation9_spill] sm:$0xff] %v11403_v23  ;;  %v11433_v12 = vsel %vm3994_vm11, %v11403_v23, %v4628_v11  ;;  %v3854_v28 = vrot.slane %v12842_v3, 2  ;;  %v3604_v27 = vrot.slane %v3603_v57, 1  ;;  %v4631_v55 = vsel %vm3984_vm6, %v10643_v58, %v4630_v35 }
 0x299   :  { %v3687_v11 = vmax.f32 %v12834_v50, %v3686_v45  ;;  %v4637_v5 = vsel %vm3982_vm5, %v10688_v63, %v10686_v14  ;;  %v4632_v23 = vsel %vm3986_vm7, %v10645_v41, %v4631_v55  ;;  %v11455_v53 = vpack.c.bf16 %v6930_v9, %v6929_v59  ;;  %8826 = vmatpush3.bf16.msra.mxu0 %v11323_v17  ;;  %v12843_v50 = vld [vmem:[#allocation53_spill] sm:$0xff] }
 0x29a   :  { %v4638_v56 = vsel %vm3984_vm6, %v10761_v6, %v4637_v5  ;;  %v11457_v22 = vpack.c.bf16 %v6953_v38, %v6952_v39  ;;  %8854 = vmatpush3.bf16.msra.mxu1 %v11325_v16  ;;  %v11461_v35 = vmax.f32 %v3603_v57, %v3604_v27  ;;  %v4633_v45 = vsel %vm3988_vm8, %v12843_v50, %v4632_v23  ;;  %v12844_v16 = vld [vmem:[#allocation70_spill] sm:$0xff]  ;;  %v12846_v38 = vld [vmem:[#allocation72_spill] sm:$0xff] }
 0x29b   :  { %v3688_v14 = vrot.slane %v3687_v11, 1  ;;  %v4639_v55 = vsel %vm3986_vm7, %v10772_v21, %v4638_v56  ;;  %8254 = vmatprep.subr.mxu0 %v6893_v10  ;;  %8296 = vmatprep.subr.mxu1 %v6916_v0  ;;  %v4634_v59 = vsel %vm3990_vm9, %v10651_v51, %v4633_v45  ;;  %v3771_v17 = vmax.f32 %v12840_v33, %v3770_v32  ;;  %v6931_v32 = vld [vmem:[%s12554_s4 + $0x198] sm:$0xff] }
 0x29c   :  { %v4640_v9 = vsel %vm3988_vm8, %v10770_v26, %v4639_v55  ;;  %v4635_v27 = vsel %vm3992_vm10, %v12844_v16, %v4634_v59  ;;  %v4644_v56 = vsel %vm3982_vm5, %v10819_v31, %v10803_v60  ;;  %v3855_v55 = vmax.f32 %v12842_v3, %v3854_v28  ;;  %v6954_v59 = vld [vmem:[%s12555_s5 + $0x198] sm:$0xff]  ;;  %v12848_v28 = vld [vmem:[#allocation26_spill] sm:$0xff] }
 0x29d   :  { %v11474_v57 = vmax.f32 %v3687_v11, %v3688_v14  ;;  %v4641_v23 = vsel %vm3990_vm9, %v10789_v47, %v4640_v9  ;;  %v4636_v39 = vsel %vm3994_vm11, %v11461_v35, %v4635_v27  ;;  %v3772_v45 = vrot.slane %v3771_v17, 1  ;;  %v6932_v11 = vld [vmem:[%s12554_s4 + $0x1a0] sm:$0xff]  ;;  %8255 = vmatpush3.msra.mxu0 %v6893_v10 }
 0x29e   :  { %v4642_v5 = vsel %vm3992_vm10, %v12846_v38, %v4641_v23  ;;  %v4645_v33 = vsel %vm3984_vm6, %v10791_v30, %v4644_v56  ;;  %8297 = vmatpush3.msra.mxu1 %v6916_v0  ;;  %v6955_v9 = vld [vmem:[%s12555_s5 + $0x1a0] sm:$0xff]  ;;  %8257 = vmatmul.mubr.msk.f32.vlgmr.msra.gmra.mrb[24].mxu0 %vm4045_vm12, %v11387_v42  ;;  %v4651_v3 = vsel %vm3982_vm5, %v10863_v40, %v10861_v43  ;;  %v3273_v27 = vrot.slane %v12848_v28, 2  ;;  %v12849_v43 = vld [vmem:[#allocation76_spill] sm:$0xff] }
 0x29f   :  { %12845 = vst [vmem:[#allocation14_spill] sm:$0xff] %v11474_v57  ;;  %v11495_v60 = vsel %vm3994_vm11, %v11474_v57, %v4642_v5  ;;  %v4646_v14 = vsel %vm3986_vm7, %v10793_v49, %v4645_v33  ;;  %8299 = vmatmul.mubr.msk.f32.vlgmr.msra.gmra.mrb[24].mxu1 %vm4045_vm12, %v11387_v42  ;;  %v11510_v10 = vmax.f32 %v3771_v17, %v3772_v45  ;;  %v3856_v56 = vrot.slane %v3855_v55, 1  ;;  %v12850_v45 = vld [vmem:[#allocation73_spill] sm:$0xff] }
 0x2a0   :  { %v4647_v0 = vsel %vm3988_vm8, %v12806_v19, %v4646_v14  ;;  %8856 = vmatprep.subr.bf16.mxu0 %v11347_v15  ;;  %8884 = vmatprep.subr.bf16.mxu1 %v11354_v20  ;;  %v4652_v42 = vsel %vm3984_vm6, %v10959_v8, %v4651_v3  ;;  %v11524_v17 = vpack.c.bf16 %v6932_v11, %v6931_v32  ;;  %v6934_v32 = vld [vmem:[%s12554_s4 + $0x1b0] sm:$0xff] }
 0x2a1   :  { %12847 = vst [vmem:[#allocation32_spill] sm:$0xff] %v11510_v10  ;;  %v4648_v23 = vsel %vm3990_vm9, %v12809_v7, %v4647_v0  ;;  %8259 = vmatprep.mubr.msk.f32.mxu0 %vm4045_vm12, %v4622_v24  ;;  %8301 = vmatprep.mubr.msk.f32.mxu1 %vm4045_vm12, %v4622_v24  ;;  %v4653_v33 = vsel %vm3986_vm7, %v12850_v45, %v4652_v42  ;;  %v6933_v0 = vld [vmem:[%s12554_s4 + $0x1a8] sm:$0xff]  ;;  %v6957_v3 = vld [vmem:[%s12555_s5 + $0x1b0] sm:$0xff]  ;;  %v12859_v45 = vld [vmem:[#allocation5_spill] sm:$0xff] }
 0x2a2   :  { %v4649_v5 = vsel %vm3992_vm10, %v12849_v43, %v4648_v23  ;;  %v11532_v14 = vpack.c.bf16 %v6955_v9, %v6954_v59  ;;  %8858 = vmatpush3.bf16.msra.mxu0 %v11347_v15  ;;  %8886 = vmatpush3.bf16.msra.mxu1 %v11354_v20  ;;  %v11544_v11 = vmax.f32 %v3855_v55, %v3856_v56  ;;  %v6956_v9 = vld [vmem:[%s12555_s5 + $0x1a8] sm:$0xff]  ;;  %v6935_v15 = vld [vmem:[%s12554_s4 + $0x1b8] sm:$0xff]  ;;  %v6938_v7 = vld [vmem:[%s12554_s4 + $0x1d0] sm:$0xff] }
 0x2a3   :  { %v4650_v24 = vsel %vm3994_vm11, %v11510_v10, %v4649_v5  ;;  %v4654_v59 = vsel %vm3988_vm8, %v10976_v2, %v4653_v33  ;;  %v12852_v20 = vld [vmem:[#allocation13_spill] sm:$0xff]  ;;  %8260 = vmatmul.mubr.msk.f32.gmra.mrb[26].mxu0 %vm4045_vm12, %v11433_v12  ;;  %8302 = vmatmul.mubr.msk.f32.gmra.mrb[26].mxu1 %vm4045_vm12, %v11433_v12  ;;  %v12854_v56 = vld [vmem:[#allocation75_spill] sm:$0xff]  ;;  %v3274_v5 = vmax.f32 %v12848_v28, %v3273_v27  ;;  %v6959_v12 = vld [vmem:[%s12555_s5 + $0x1c0] sm:$0xff] }
 0x2a4   :  { %12851 = vst [vmem:[#allocation39_spill] sm:$0xff] %v11544_v11  ;;  %v12853_v23 = vcombine.high %v12852_v20, %v12852_v20  ;;  %v4655_v42 = vsel %vm3990_vm9, %v12854_v56, %v4654_v59  ;;  %v12855_v33 = vld [vmem:[#allocation15_spill] sm:$0xff]  ;;  %v6936_v20 = vld [vmem:[%s12554_s4 + $0x1c0] sm:$0xff]  ;;  %v12857_v2 = vld [vmem:[#allocation29_spill] sm:$0xff]  ;;  %8860 = vmatprep.subr.bf16.mxu0 %v11399_v62  ;;  %8888 = vmatprep.subr.bf16.mxu1 %v11407_v54 }
 0x2a5   :  { %v12856_v10 = vld [vmem:[#allocation3_spill] sm:$0xff]  ;;  %v3359_v59 = vrot.slane %v12857_v2, 1  ;;  %v12858_v28 = vld [vmem:[#allocation77_spill] sm:$0xff]  ;;  %8262 = vmatprep.mubr.msk.f32.mxu0 %vm4045_vm12, %v4636_v39  ;;  %8304 = vmatprep.mubr.msk.f32.mxu1 %vm4045_vm12, %v4636_v39  ;;  %v12860_v39 = vld [vmem:[#allocation6_spill] sm:$0xff] }
 0x2a6   :  { %v11561_v55 = vsel %vm3199_vm4, %v12853_v23, -inf  ;;  %v4940_v43 = vsel %vm3982_vm5, %v12856_v10, %v12855_v33  ;;  %v6958_v23 = vld [vmem:[%s12555_s5 + $0x1b8] sm:$0xff]  ;;  %v4656_v27 = vsel %vm3992_vm10, %v12858_v28, %v4655_v42  ;;  %v11589_v10 = vpack.c.bf16 %v6934_v32, %v6933_v0  ;;  %v6937_v56 = vld [vmem:[%s12554_s4 + $0x1c8] sm:$0xff]  ;;  %8862 = vmatpush3.bf16.msra.mxu0 %v11399_v62  ;;  %8890 = vmatpush3.bf16.msra.mxu1 %v11407_v54 }
 0x2a7   :  { %v4941_v33 = vsel %vm3984_vm6, %v12812_v44, %v4940_v43  ;;  %v4657_v42 = vsel %vm3994_vm11, %v11544_v11, %v4656_v27  ;;  %v3275_v28 = vrot.slane %v3274_v5, 1  ;;  %v11603_v0 = vpack.c.bf16 %v6957_v3, %v6956_v9  ;;  %v6960_v32 = vld [vmem:[%s12555_s5 + $0x1c8] sm:$0xff]  ;;  %v6961_v44 = vld [vmem:[%s12555_s5 + $0x1d0] sm:$0xff]  ;;  %v6971_v9 = vld [vmem:[%s12554_s4 + $0x1e0] sm:$0xff]  ;;  %8263 = vmatmul.mubr.msk.f32.gmra.mrb[28].mxu0 %vm4045_vm12, %v11495_v60  ;;  %8305 = vmatmul.mubr.msk.f32.gmra.mrb[28].mxu1 %vm4045_vm12, %v11495_v60 }
 0x2a8   :  { %v4942_v43 = vsel %vm3986_vm7, %v12859_v45, %v4941_v33  ;;  %v11615_v11 = vpack.c.bf16 %v6936_v20, %v6935_v15  ;;  %v11617_v33 = vpack.c.bf16 %v6959_v12, %v6958_v23  ;;  %v6972_v3 = vld [vmem:[%s12554_s4 + $0x1e8] sm:$0xff]  ;;  %v12861_v45 = vld [vmem:[#allocation42_spill] sm:$0xff]  ;;  %v11634_v15 = vpack.c.bf16 %v6938_v7, %v6937_v56  ;;  %8864 = vmatprep.subr.bf16.mxu0 %v11455_v53  ;;  %v12873_v56 = vld [vmem:[#allocation8_spill] sm:$0xff] }
 0x2a9   :  { %v4943_v27 = vsel %vm3988_vm8, %v12860_v39, %v4942_v43  ;;  %v3441_v19 = vrot.slane %v12861_v45, 2  ;;  %v11630_v54 = vmax.f32 %v3274_v5, %v3275_v28  ;;  %v6994_v20 = vld [vmem:[%s12555_s5 + $0x1e0] sm:$0xff]  ;;  %v6995_v23 = vld [vmem:[%s12555_s5 + $0x1e8] sm:$0xff]  ;;  %8892 = vmatprep.subr.bf16.mxu1 %v11457_v22  ;;  %v11647_v5 = vpack.c.bf16 %v6961_v44, %v6960_v32  ;;  %8265 = vmatprep.mubr.msk.f32.mxu0 %vm4045_vm12, %v4650_v24  ;;  %v12865_v44 = vld [vmem:[#allocation37_spill] sm:$0xff] }
 0x2aa   :  { %v4944_v62 = vsel %vm3990_vm9, %v12830_v37, %v4943_v27  ;;  %v12862_v12 = vld [vmem:[#allocation46_spill] sm:$0xff]  ;;  %v11650_v7 = vmax.f32 %v12857_v2, %v3359_v59  ;;  %8307 = vmatprep.mubr.msk.f32.mxu1 %vm4045_vm12, %v4650_v24  ;;  %v12864_v27 = vld [vmem:[#allocation25_spill] sm:$0xff]  ;;  %v11660_v39 = vpack.c.bf16 %v6972_v3, %v6971_v9  ;;  %v12866_v32 = vcombine.high %v12865_v44, %v12865_v44  ;;  %v12868_v3 = vld [vmem:[#allocation60_spill] sm:$0xff] }
 0x2ab   :  { %v3525_v43 = vrot.slane %v12862_v12, 2  ;;  %v4945_v60 = vsel %vm3992_vm10, %v11308_v61, %v4944_v62  ;;  %v4947_v37 = vsel %vm3982_vm5, %v12817_v1, %v12864_v27  ;;  %8866 = vmatpush3.bf16.msra.mxu0 %v11455_v53  ;;  %8894 = vmatpush3.bf16.msra.mxu1 %v11457_v22  ;;  %v12867_v24 = vld [vmem:[#allocation33_spill] sm:$0xff]  ;;  %v11672_v62 = vpack.c.bf16 %v6995_v23, %v6994_v20  ;;  %v12870_v20 = vld [vmem:[#allocation47_spill] sm:$0xff] }
 0x2ac   :  { %12863 = vst [vmem:[#allocation34_spill] sm:$0xff] %v11650_v7  ;;  %v4946_v28 = vsel %vm3994_vm11, %v11630_v54, %v4945_v60  ;;  %v11666_v2 = vsel %vm3199_vm4, %v12866_v32, -inf  ;;  %v4948_v59 = vsel %vm3984_vm6, %v12867_v24, %v4947_v37  ;;  %v3442_v60 = vmax.f32 %v12861_v45, %v3441_v19  ;;  %8266 = vmatmul.mubr.msk.f32.gmra.mrb[30].mxu0 %vm4045_vm12, %v4657_v42 }
 0x2ad   :  { %8308 = vmatmul.mubr.msk.f32.gmra.mrb[30].mxu1 %vm4045_vm12, %v4657_v42  ;;  %v4949_v9 = vsel %vm3986_vm7, %v12820_v4, %v4948_v59  ;;  %v4954_v53 = vsel %vm3982_vm5, %v10516_v52, %v10531_v36  ;;  %v3526_v22 = vmax.f32 %v12862_v12, %v3525_v43  ;;  %v3609_v27 = vrot.slane %v12868_v3, 2  ;;  %8868 = vmatprep.subr.bf16.mxu0 %v11524_v17  ;;  %v12869_v42 = vld [vmem:[#allocation40_spill] sm:$0xff]  ;;  %v12871_v12 = vld [vmem:[#allocation31_spill] sm:$0xff] }
 0x2ae   :  { %8896 = vmatprep.subr.bf16.mxu1 %v11532_v14  ;;  %v4950_v19 = vsel %vm3988_vm8, %v12821_v34, %v4949_v9  ;;  %v3443_v37 = vrot.slane %v3442_v60, 1  ;;  %v4955_v45 = vsel %vm3984_vm6, %v10520_v48, %v4954_v53  ;;  %v4961_v23 = vsel %vm3982_vm5, %v12870_v20, %v12869_v42  ;;  %v6973_v36 = vld [vmem:[%s12554_s4 + $0x1f0] sm:$0xff]  ;;  %8340 = vmatprep.mubr.msk.f32.mxu0 %vm4045_vm12, %v4946_v28  ;;  %v6974_v9 = vld [vmem:[%s12554_s4 + $0x1f8] sm:$0xff] }
 0x2af   :  { %8382 = vmatprep.mubr.msk.f32.mxu1 %vm4045_vm12, %v4946_v28  ;;  %v4951_v43 = vsel %vm3990_vm9, %v12871_v12, %v4950_v19  ;;  %v4956_v44 = vsel %vm3986_vm7, %v10522_v13, %v4955_v45  ;;  %v3527_v32 = vrot.slane %v3526_v22, 1  ;;  %v4962_v59 = vsel %vm3984_vm6, %v12794_v29, %v4961_v23  ;;  %v6996_v53 = vld [vmem:[%s12555_s5 + $0x1f0] sm:$0xff]  ;;  %v6997_v28 = vld [vmem:[%s12555_s5 + $0x1f8] sm:$0xff]  ;;  %8870 = vmatpush3.bf16.msra.mxu0 %v11524_v17 }
 0x2b0   :  { %8898 = vmatpush3.bf16.msra.mxu1 %v11532_v14  ;;  %v12872_v19 = vld [vmem:[#allocation16_spill] sm:$0xff]  ;;  %v11717_v42 = vmax.f32 %v3442_v60, %v3443_v37  ;;  %v4957_v23 = vsel %vm3988_vm8, %v12792_v46, %v4956_v44  ;;  %v3693_v29 = vrot.slane %v12873_v56, 2  ;;  %8872 = vmatprep.subr.bf16.mxu0 %v11589_v10  ;;  %v12874_v60 = vld [vmem:[#allocation66_spill] sm:$0xff]  ;;  %v12875_v44 = vld [vmem:[#allocation49_spill] sm:$0xff]  ;;  %v11737_v46 = vpack.c.bf16 %v6974_v9, %v6973_v36 }
 0x2b1   :  { %v4952_v45 = vsel %vm3992_vm10, %v12872_v19, %v4951_v43  ;;  %8900 = vmatprep.subr.bf16.mxu1 %v11603_v0  ;;  %v4958_v17 = vsel %vm3990_vm9, %v12838_v25, %v4957_v23  ;;  %v11730_v14 = vmax.f32 %v3526_v22, %v3527_v32  ;;  %v3777_v37 = vrot.slane %v12874_v60, 2  ;;  %v12877_v23 = vld [vmem:[#allocation56_spill] sm:$0xff]  ;;  %v12878_v36 = vld [vmem:[#allocation69_spill] sm:$0xff] }
 0x2b2   :  { %v11726_v20 = vsel %vm3994_vm11, %v11650_v7, %v4952_v45  ;;  %v4959_v43 = vsel %vm3992_vm10, %v11393_v18, %v4958_v17  ;;  %v4963_v19 = vsel %vm3986_vm7, %v12875_v44, %v4962_v59  ;;  %v11739_v12 = vpack.c.bf16 %v6997_v28, %v6996_v53  ;;  %v12876_v7 = vld [vmem:[#allocation50_spill] sm:$0xff]  ;;  %v12879_v28 = vld [vmem:[#allocation68_spill] sm:$0xff] }
 0x2b3   :  { %v11743_v45 = vsel %vm3994_vm11, %v11717_v42, %v4959_v43  ;;  %v4964_v22 = vsel %vm3988_vm8, %v12876_v7, %v4963_v19  ;;  %v3610_v32 = vmax.f32 %v12868_v3, %v3609_v27  ;;  %v4968_v17 = vsel %vm3982_vm5, %v10643_v58, %v12877_v23  ;;  %8874 = vmatpush3.bf16.msra.mxu0 %v11589_v10  ;;  %v6975_v3 = vld [vmem:[%s12554_s4 + $0x200] sm:$0xff]  ;;  %v6976_v27 = vld [vmem:[%s12554_s4 + $0x208] sm:$0xff] }
 0x2b4   :  { %8902 = vmatpush3.bf16.msra.mxu1 %v11603_v0  ;;  %v4965_v59 = vsel %vm3990_vm9, %v12878_v36, %v4964_v22  ;;  %v4969_v9 = vsel %vm3984_vm6, %v10645_v41, %v4968_v17  ;;  %v3694_v53 = vmax.f32 %v12873_v56, %v3693_v29  ;;  %v3861_v10 = vrot.slane %v12879_v28, 2  ;;  %8876 = vmatprep.subr.bf16.mxu0 %v11615_v11  ;;  %v12880_v0 = vld [vmem:[#allocation9_spill] sm:$0xff] }
 0x2b5   :  { %8904 = vmatprep.subr.bf16.mxu1 %v11617_v33  ;;  %v4966_v19 = vsel %vm3992_vm10, %v12880_v0, %v4965_v59  ;;  %v3611_v43 = vrot.slane %v3610_v32, 1  ;;  %v4970_v29 = vsel %vm3986_vm7, %v12843_v50, %v4969_v9  ;;  %v4975_v56 = vsel %vm3982_vm5, %v10761_v6, %v10688_v63  ;;  %v6998_v59 = vld [vmem:[%s12555_s5 + $0x200] sm:$0xff]  ;;  %v6999_v9 = vld [vmem:[%s12555_s5 + $0x208] sm:$0xff] }
 0x2b6   :  { %v11776_v22 = vsel %vm3994_vm11, %v11730_v14, %v4966_v19  ;;  %v4971_v23 = vsel %vm3988_vm8, %v10651_v51, %v4970_v29  ;;  %v3695_v17 = vrot.slane %v3694_v53, 1  ;;  %v4976_v41 = vsel %vm3984_vm6, %v10772_v21, %v4975_v56 }
 0x2b7   :  { %v11788_v63 = vmax.f32 %v3610_v32, %v3611_v43  ;;  %v4972_v19 = vsel %vm3990_vm9, %v12844_v16, %v4971_v23  ;;  %v4977_v29 = vsel %vm3986_vm7, %v10770_v26, %v4976_v41  ;;  %v11794_v6 = vpack.c.bf16 %v6976_v27, %v6975_v3  ;;  %8878 = vmatpush3.bf16.msra.mxu0 %v11615_v11  ;;  %v6977_v41 = vld [vmem:[%s12554_s4 + $0x210] sm:$0xff]  ;;  %v6978_v3 = vld [vmem:[%s12554_s4 + $0x218] sm:$0xff]  ;;  %v12882_v27 = vld [vmem:[#allocation43_spill] sm:$0xff] }
 0x2b8   :  { %8906 = vmatpush3.bf16.msra.mxu1 %v11617_v33  ;;  %v4973_v21 = vsel %vm3992_vm10, %v11461_v35, %v4972_v19  ;;  %v11801_v51 = vmax.f32 %v3694_v53, %v3695_v17  ;;  %v4978_v32 = vsel %vm3988_vm8, %v10789_v47, %v4977_v29  ;;  %v12883_v11 = vcombine.high %v12882_v27, %v12882_v27  ;;  %v6939_v53 = vld [vmem:[%s12554_s4 + $0x1d8] sm:$0xff] }
 0x2b9   :  { %8880 = vmatprep.subr.bf16.mxu0 %v11634_v15  ;;  %8908 = vmatprep.subr.bf16.mxu1 %v11647_v5  ;;  %v11824_v43 = vsel %vm3994_vm11, %v11788_v63, %v4973_v21  ;;  %v4979_v23 = vsel %vm3990_vm9, %v12846_v38, %v4978_v32  ;;  %v11828_v17 = vpack.c.bf16 %v6999_v9, %v6998_v59  ;;  %v6962_v19 = vld [vmem:[%s12555_s5 + $0x1d8] sm:$0xff]  ;;  %v7000_v59 = vld [vmem:[%s12555_s5 + $0x210] sm:$0xff] }
 0x2ba   :  { %12881 = vst [vmem:[#allocation35_spill] sm:$0xff] %v11801_v51  ;;  %v11815_v33 = vsel %vm3199_vm4, %v12883_v11, -inf  ;;  %v4980_v29 = vsel %vm3992_vm10, %v11474_v57, %v4979_v23  ;;  %v3778_v27 = vmax.f32 %v12874_v60, %v3777_v37  ;;  %v4982_v11 = vsel %vm3982_vm5, %v10791_v30, %v10819_v31  ;;  %v7001_v9 = vld [vmem:[%s12555_s5 + $0x218] sm:$0xff]  ;;  %v12886_v57 = vld [vmem:[#allocation51_spill] sm:$0xff] }
 0x2bb   :  { %v3862_v21 = vmax.f32 %v12879_v28, %v3861_v10  ;;  %v11848_v32 = vsel %vm3994_vm11, %v11801_v51, %v4980_v29  ;;  %v4983_v60 = vsel %vm3984_vm6, %v10793_v49, %v4982_v11  ;;  %v4989_v31 = vsel %vm3982_vm5, %v10959_v8, %v10863_v40  ;;  %8882 = vmatpush3.bf16.msra.mxu0 %v11634_v15  ;;  %v12884_v10 = vld [vmem:[#allocation19_spill] sm:$0xff]  ;;  %v12885_v29 = vld [vmem:[#allocation73_spill] sm:$0xff]  ;;  %v12888_v40 = vld [vmem:[#allocation22_spill] sm:$0xff] }
 0x2bc   :  { %v11855_v37 = vpack.c.bf16 %v6978_v3, %v6977_v41  ;;  %8910 = vmatpush3.bf16.msra.mxu1 %v11647_v5  ;;  %v3779_v28 = vrot.slane %v3778_v27, 1  ;;  %v4984_v23 = vsel %vm3986_vm7, %v12884_v10, %v4983_v60  ;;  %v4990_v51 = vsel %vm3984_vm6, %v12885_v29, %v4989_v31  ;;  %8338 = vmatprep.subr.mxu0 %v6939_v53  ;;  %v12889_v5 = vld [vmem:[#allocation74_spill] sm:$0xff]  ;;  %v12891_v8 = vld [vmem:[#allocation76_spill] sm:$0xff] }
 0x2bd   :  { %v3863_v56 = vrot.slane %v3862_v21, 1  ;;  %v12887_v11 = vcombine.high %v12886_v57, %v12886_v57  ;;  %8380 = vmatprep.subr.mxu1 %v6962_v19  ;;  %v4985_v15 = vsel %vm3988_vm8, %v12888_v40, %v4984_v23  ;;  %v4991_v41 = vsel %vm3986_vm7, %v12889_v5, %v4990_v51  ;;  %v12893_v57 = vld [vmem:[#allocation75_spill] sm:$0xff]  ;;  %v6979_v10 = vld [vmem:[%s12554_s4 + $0x220] sm:$0xff] }
 0x2be   :  { %v11873_v3 = vpack.c.bf16 %v7001_v9, %v7000_v59  ;;  %v11875_v60 = vmax.f32 %v3778_v27, %v3779_v28  ;;  %v4986_v31 = vsel %vm3990_vm9, %v12891_v8, %v4985_v15  ;;  %v6980_v51 = vld [vmem:[%s12554_s4 + $0x228] sm:$0xff]  ;;  %v7002_v27 = vld [vmem:[%s12555_s5 + $0x220] sm:$0xff]  ;;  %v12894_v59 = vld [vmem:[#allocation32_spill] sm:$0xff]  ;;  %v12896_v28 = vrot.slane %v11561_v55, 4 }
 0x2bf   :  { %v11867_v38 = vsel %vm3199_vm4, %v12887_v11, -inf  ;;  %v11879_v29 = vmax.f32 %v3862_v21, %v3863_v56  ;;  %v4992_v11 = vsel %vm3988_vm8, %v12893_v57, %v4991_v41  ;;  %v4987_v9 = vsel %vm3992_vm10, %v12894_v59, %v4986_v31  ;;  %v12895_v56 = vld [vmem:[#allocation77_spill] sm:$0xff]  ;;  %v12897_v15 = vld [vmem:[#allocation3_spill] sm:$0xff]  ;;  %v12898_v41 = vld [vmem:[#allocation4_spill] sm:$0xff]  ;;  %8339 = vmatpush3.msra.mxu0 %v6939_v53 }
 0x2c0   :  { %12890 = vst [vmem:[#allocation44_spill] sm:$0xff] %v11875_v60  ;;  %v4993_v21 = vsel %vm3990_vm9, %v12895_v56, %v4992_v11  ;;  %v3279_v23 = vmax.f32 %v11561_v55, %v12896_v28  ;;  %v5278_v57 = vsel %vm3982_vm5, %v12898_v41, %v12897_v15  ;;  %v7003_v5 = vld [vmem:[%s12555_s5 + $0x228] sm:$0xff]  ;;  %v6981_v8 = vld [vmem:[%s12554_s4 + $0x230] sm:$0xff]  ;;  %v6982_v31 = vld [vmem:[%s12554_s4 + $0x238] sm:$0xff]  ;;  %8381 = vmatpush3.msra.mxu1 %v6962_v19 }
 0x2c1   :  { %12892 = vst [vmem:[#allocation57_spill] sm:$0xff] %v11879_v29  ;;  %v11913_v55 = vsel %vm3994_vm11, %v11875_v60, %v4987_v9  ;;  %v12899_v11 = vld [vmem:[#allocation39_spill] sm:$0xff]  ;;  %v12900_v15 = vld [vmem:[#allocation5_spill] sm:$0xff]  ;;  %v7004_v56 = vld [vmem:[%s12555_s5 + $0x230] sm:$0xff]  ;;  %8341 = vmatmul.mubr.msk.f32.vlgmr.msra.gmra.mrb[24].mxu0 %vm4045_vm12, %v11726_v20  ;;  %8383 = vmatmul.mubr.msk.f32.vlgmr.msra.gmra.mrb[24].mxu1 %vm4045_vm12, %v11726_v20  ;;  %v11939_v60 = vpack.c.bf16 %v6980_v51, %v6979_v10 }
 0x2c2   :  { %v4994_v28 = vsel %vm3992_vm10, %v12899_v11, %v4993_v21  ;;  %v5279_v41 = vsel %vm3984_vm6, %v12900_v15, %v5278_v57  ;;  %v7005_v59 = vld [vmem:[%s12555_s5 + $0x238] sm:$0xff]  ;;  %v6983_v53 = vld [vmem:[%s12554_s4 + $0x240] sm:$0xff]  ;;  %v3280_v21 = vrot.slane %v3279_v23, 2  ;;  %v6984_v40 = vld [vmem:[%s12554_s4 + $0x248] sm:$0xff]  ;;  %8912 = vmatprep.subr.bf16.mxu0 %v11660_v39  ;;  %8940 = vmatprep.subr.bf16.mxu1 %v11672_v62 }
 0x2c3   :  { %v12901_v19 = vld [vmem:[#allocation30_spill] sm:$0xff]  ;;  %v11935_v57 = vsel %vm3994_vm11, %v11879_v29, %v4994_v28  ;;  %v7007_v20 = vld [vmem:[%s12555_s5 + $0x248] sm:$0xff]  ;;  %v3530_v28 = vrot.slane %v11815_v33, 4  ;;  %v12903_v10 = vld [vmem:[#allocation61_spill] sm:$0xff]  ;;  %8343 = vmatprep.mubr.msk.f32.mxu0 %vm4045_vm12, %v11743_v45  ;;  %8385 = vmatprep.mubr.msk.f32.mxu1 %vm4045_vm12, %v11743_v45 }
 0x2c4   :  { %v3366_v9 = vrot.slane %v12901_v19, 1  ;;  %v12902_v15 = vld [vmem:[#allocation6_spill] sm:$0xff]  ;;  %v3281_v26 = vmax.f32 %v3279_v23, %v3280_v21  ;;  %8914 = vmatpush3.bf16.msra.mxu0 %v11660_v39  ;;  %8942 = vmatpush3.bf16.msra.mxu1 %v11672_v62  ;;  %v5285_v39 = vsel %vm3982_vm5, %v12867_v24, %v12817_v1  ;;  %v12906_v62 = vrot.slane %v11666_v2, 4  ;;  %v12914_v21 = vld [vmem:[#allocation64_spill] sm:$0xff] }
 0x2c5   :  { %v5280_v11 = vsel %vm3986_vm7, %v12902_v15, %v5279_v41  ;;  %v7006_v49 = vld [vmem:[%s12555_s5 + $0x240] sm:$0xff]  ;;  %v11955_v41 = vpack.c.bf16 %v7003_v5, %v7002_v27  ;;  %v11957_v15 = vpack.c.bf16 %v6982_v31, %v6981_v8  ;;  %v11971_v5 = vpack.c.bf16 %v7005_v59, %v7004_v56  ;;  %8344 = vmatmul.mubr.msk.f32.gmra.mrb[26].mxu0 %vm4045_vm12, %v11776_v22 }
 0x2c6   :  { %v5281_v51 = vsel %vm3988_vm8, %v12903_v10, %v5280_v11  ;;  %v12904_v29 = vld [vmem:[#allocation58_spill] sm:$0xff]  ;;  %v3614_v8 = vrot.slane %v11867_v38, 4  ;;  %v11980_v27 = vpack.c.bf16 %v7007_v20, %v7006_v49  ;;  %8386 = vmatmul.mubr.msk.f32.gmra.mrb[26].mxu1 %vm4045_vm12, %v11776_v22  ;;  %v3367_v45 = vmax.f32 %v12901_v19, %v3366_v9  ;;  %8916 = vmatprep.subr.bf16.mxu0 %v11737_v46 }
 0x2c7   :  { %v12905_v30 = vcombine.high %v12904_v29, %v12904_v29  ;;  %v5282_v11 = vsel %vm3990_vm9, %v11308_v61, %v5281_v51  ;;  %v11978_v29 = vpack.c.bf16 %v6984_v40, %v6983_v53  ;;  %v3282_v61 = vrot.slane %v3281_v26, 1  ;;  %8944 = vmatprep.subr.bf16.mxu1 %v11739_v12  ;;  %8346 = vmatprep.mubr.msk.f32.mxu0 %vm4045_vm12, %v11824_v43  ;;  %v12916_v10 = vld [vmem:[#allocation34_spill] sm:$0xff] }
 0x2c8   :  { %v5286_v22 = vsel %vm3984_vm6, %v12820_v4, %v5285_v39  ;;  %v5292_v40 = vsel %vm3982_vm5, %v10520_v48, %v10516_v52  ;;  %v3531_v59 = vmax.f32 %v11815_v33, %v3530_v28  ;;  %8388 = vmatprep.mubr.msk.f32.mxu1 %vm4045_vm12, %v11824_v43  ;;  %8918 = vmatpush3.bf16.msra.mxu0 %v11737_v46  ;;  %v12907_v52 = vld [vmem:[#allocation31_spill] sm:$0xff]  ;;  %v12908_v33 = vld [vmem:[#allocation36_spill] sm:$0xff] }
 0x2c9   :  { %v11963_v47 = vsel %vm3199_vm4, %v12905_v30, -inf  ;;  %v5283_v30 = vsel %vm3992_vm10, %v11630_v54, %v5282_v11  ;;  %v3447_v54 = vmax.f32 %v11666_v2, %v12906_v62  ;;  %v3283_v1 = vmax.f32 %v3281_v26, %v3282_v61  ;;  %8946 = vmatpush3.bf16.msra.mxu1 %v11739_v12  ;;  %v12909_v43 = vld [vmem:[#allocation47_spill] sm:$0xff]  ;;  %v12910_v26 = vld [vmem:[#allocation48_spill] sm:$0xff]  ;;  %8347 = vmatmul.mubr.msk.f32.gmra.mrb[28].mxu0 %vm4045_vm12, %v11848_v32 }
 0x2ca   :  { %v3698_v49 = vrot.slane %v11963_v47, 4  ;;  %v5287_v2 = vsel %vm3986_vm7, %v12821_v34, %v5286_v22  ;;  %v5293_v4 = vsel %vm3984_vm6, %v10522_v13, %v5292_v40  ;;  %v3532_v23 = vrot.slane %v3531_v59, 2  ;;  %v12911_v34 = vld [vmem:[#allocation21_spill] sm:$0xff]  ;;  %8389 = vmatmul.mubr.msk.f32.gmra.mrb[28].mxu1 %vm4045_vm12, %v11848_v32  ;;  %v12913_v12 = vld [vmem:[#allocation16_spill] sm:$0xff]  ;;  %8920 = vmatprep.subr.bf16.mxu0 %v11794_v6  ;;  %v12918_v40 = vld [vmem:[#allocation54_spill] sm:$0xff] }
 0x2cb   :  { %v3448_v24 = vrot.slane %v3447_v54, 2  ;;  %v5288_v48 = vsel %vm3988_vm8, %v12907_v52, %v5287_v2  ;;  %v5294_v56 = vsel %vm3986_vm7, %v12908_v33, %v5293_v4  ;;  %v5299_v31 = vsel %vm3982_vm5, %v12910_v26, %v12909_v43  ;;  %8948 = vmatprep.subr.bf16.mxu1 %v11828_v17  ;;  %8349 = vmatprep.mubr.msk.f32.mxu0 %vm4045_vm12, %v11913_v55  ;;  %v12919_v2 = vld [vmem:[#allocation12_spill] sm:$0xff]  ;;  %v12923_v43 = vld [vmem:[#allocation17_spill] sm:$0xff] }
 0x2cc   :  { %v12912_v53 = vcombine.high %v12911_v34, %v12911_v34  ;;  %v5284_v46 = vsel %vm3994_vm11, %v3283_v1, %v5283_v30  ;;  %v5289_v19 = vsel %vm3990_vm9, %v12913_v12, %v5288_v48  ;;  %v12915_v20 = vcombine.high %v12914_v21, %v12914_v21  ;;  %8391 = vmatprep.mubr.msk.f32.mxu1 %vm4045_vm12, %v11913_v55  ;;  %v12924_v26 = vld [vmem:[#allocation20_spill] sm:$0xff]  ;;  %v12928_v21 = vld [vmem:[#allocation22_spill] sm:$0xff] }
 0x2cd   :  { %v3449_v9 = vmax.f32 %v3447_v54, %v3448_v24  ;;  %v5290_v51 = vsel %vm3992_vm10, %v12916_v10, %v5289_v19  ;;  %v5295_v32 = vsel %vm3988_vm8, %v12838_v25, %v5294_v56  ;;  %v3533_v11 = vmax.f32 %v3531_v59, %v3532_v23  ;;  %8922 = vmatpush3.bf16.msra.mxu0 %v11794_v6  ;;  %v12922_v23 = vld [vmem:[#allocation18_spill] sm:$0xff]  ;;  %v12925_v34 = vld [vmem:[#allocation72_spill] sm:$0xff] }
 0x2ce   :  { %v3781_v13 = vsel %vm3199_vm4, %v12912_v53, -inf  ;;  %v3865_v28 = vsel %vm3199_vm4, %v12915_v20, -inf  ;;  %v12045_v30 = vsel %vm3994_vm11, %v3367_v45, %v5290_v51  ;;  %v5296_v39 = vsel %vm3990_vm9, %v11393_v18, %v5295_v32  ;;  %8950 = vmatpush3.bf16.msra.mxu1 %v11828_v17  ;;  %8350 = vmatmul.mubr.msk.f32.gmra.mrb[30].mxu0 %vm4045_vm12, %v11935_v57  ;;  %v12927_v19 = vld [vmem:[#allocation14_spill] sm:$0xff]  ;;  %v12930_v32 = vld [vmem:[#allocation76_spill] sm:$0xff] }
 0x2cf   :  { %v3450_v61 = vrot.slane %v3449_v9, 1  ;;  %v5300_v62 = vsel %vm3984_vm6, %v12875_v44, %v5299_v31  ;;  %v5297_v25 = vsel %vm3992_vm10, %v11717_v42, %v5296_v39  ;;  %v3534_v54 = vrot.slane %v3533_v11, 1  ;;  %8392 = vmatmul.mubr.msk.f32.gmra.mrb[30].mxu1 %vm4045_vm12, %v11935_v57  ;;  %v12917_v44 = vld [vmem:[#allocation52_spill] sm:$0xff]  ;;  %8924 = vmatprep.subr.bf16.mxu0 %v11855_v37 }
 0x2d0   :  { %v5301_v55 = vsel %vm3986_vm7, %v12876_v7, %v5300_v62  ;;  %v3615_v45 = vmax.f32 %v11867_v38, %v3614_v8  ;;  %v3782_v22 = vrot.slane %v3781_v13, 4  ;;  %v5306_v42 = vsel %vm3982_vm5, %v12917_v44, %v10643_v58  ;;  %8952 = vmatprep.subr.bf16.mxu1 %v11873_v3  ;;  %8424 = vmatprep.mubr.msk.f32.mxu0 %vm4045_vm12, %v5284_v46  ;;  %v12931_v39 = vld [vmem:[#allocation32_spill] sm:$0xff]  ;;  %v12935_v44 = vld [vmem:[#allocation74_spill] sm:$0xff] }
 0x2d1   :  { %v3451_v18 = vmax.f32 %v3449_v9, %v3450_v61  ;;  %v5302_v6 = vsel %vm3988_vm8, %v12878_v36, %v5301_v55  ;;  %v3535_v38 = vmax.f32 %v3533_v11, %v3534_v54  ;;  %v5307_v57 = vsel %vm3984_vm6, %v12843_v50, %v5306_v42  ;;  %8466 = vmatprep.mubr.msk.f32.mxu1 %vm4045_vm12, %v5284_v46  ;;  %v12926_v46 = vld [vmem:[#allocation19_spill] sm:$0xff]  ;;  %v12933_v55 = vld [vmem:[#allocation73_spill] sm:$0xff] }
 0x2d2   :  { %v5303_v7 = vsel %vm3990_vm9, %v12880_v0, %v5302_v6  ;;  %v3616_v17 = vrot.slane %v3615_v45, 2  ;;  %v3866_v8 = vrot.slane %v3865_v28, 4  ;;  %v5308_v59 = vsel %vm3986_vm7, %v12918_v40, %v5307_v57  ;;  %8926 = vmatpush3.bf16.msra.mxu0 %v11855_v37  ;;  %8954 = vmatpush3.bf16.msra.mxu1 %v11873_v3  ;;  %v12920_v3 = vld [vmem:[#allocation62_spill] sm:$0xff]  ;;  %v12932_v54 = vld [vmem:[#allocation71_spill] sm:$0xff] }
 0x2d3   :  { %v12076_v36 = vsel %vm3994_vm11, %v3451_v18, %v5297_v25  ;;  %v5304_v58 = vsel %vm3992_vm10, %v11730_v14, %v5303_v7  ;;  %v5309_v1 = vsel %vm3988_vm8, %v12844_v16, %v5308_v59  ;;  %8928 = vmatprep.subr.bf16.mxu0 %v11939_v60  ;;  %8956 = vmatprep.subr.bf16.mxu1 %v11955_v41  ;;  %v12921_v16 = vld [vmem:[#allocation11_spill] sm:$0xff]  ;;  %v12934_v18 = vld [vmem:[#allocation44_spill] sm:$0xff] }
 0x2d4   :  { %v12085_v50 = vsel %vm3994_vm11, %v3535_v38, %v5304_v58  ;;  %v3617_v0 = vmax.f32 %v3615_v45, %v3616_v17  ;;  %v5310_v14 = vsel %vm3990_vm9, %v11461_v35, %v5309_v1  ;;  %v3699_v37 = vmax.f32 %v11963_v47, %v3698_v49  ;;  %v12936_v17 = vld [vmem:[#allocation75_spill] sm:$0xff]  ;;  %v12937_v58 = vld [vmem:[#allocation77_spill] sm:$0xff] }
 0x2d5   :  { %v5313_v24 = vsel %vm3982_vm5, %v12920_v3, %v12919_v2  ;;  %v5311_v52 = vsel %vm3992_vm10, %v11788_v63, %v5310_v14  ;;  %v3783_v33 = vmax.f32 %v3781_v13, %v3782_v22  ;;  %v5320_v47 = vsel %vm3982_vm5, %v12924_v26, %v12923_v43  ;;  %v12938_v1 = vld [vmem:[#allocation39_spill] sm:$0xff]  ;;  %v12939_v2 = vld [vmem:[#allocation57_spill] sm:$0xff]  ;;  %v6028_v26 = vld [vmem:[%s12557_s7 + $0x20] sm:$0xff] }
 0x2d6   :  { %v3618_v4 = vrot.slane %v3617_v0, 1  ;;  %v5314_v48 = vsel %vm3984_vm6, %v12921_v16, %v5313_v24  ;;  %v3700_v56 = vrot.slane %v3699_v37, 2  ;;  %v3867_v49 = vmax.f32 %v3865_v28, %v3866_v8  ;;  %8930 = vmatpush3.bf16.msra.mxu0 %v11939_v60  ;;  %8958 = vmatpush3.bf16.msra.mxu1 %v11955_v41  ;;  %v12929_v28 = vld [vmem:[#allocation35_spill] sm:$0xff]  ;;  %v6027_v16 = vld [vmem:[%s12557_s7 + $0x18] sm:$0xff] }
 0x2d7   :  { %v5315_v35 = vsel %vm3986_vm7, %v12922_v23, %v5314_v48  ;;  %v3784_v53 = vrot.slane %v3783_v33, 2  ;;  %v5321_v13 = vsel %vm3984_vm6, %v12926_v46, %v5320_v47  ;;  %8932 = vmatprep.subr.bf16.mxu0 %v11957_v15  ;;  %8960 = vmatprep.subr.bf16.mxu1 %v11971_v5  ;;  %v5327_v45 = vsel %vm3982_vm5, %v12933_v55, %v12932_v54  ;;  %v7021_v23 = vld [vmem:[%s12557_s7 + $0x68] sm:$0xff]  ;;  %v6031_v46 = vld [vmem:[%s12557_s7 + $0x38] sm:$0xff] }
 0x2d8   :  { %v3619_v31 = vmax.f32 %v3617_v0, %v3618_v4  ;;  %v5316_v63 = vsel %vm3988_vm8, %v12925_v34, %v5315_v35  ;;  %v3701_v12 = vmax.f32 %v3699_v37, %v3700_v56  ;;  %v5322_v60 = vsel %vm3986_vm7, %v12928_v21, %v5321_v13  ;;  %v7019_v4 = vld [vmem:[%s12557_s7 + $0x58] sm:$0xff]  ;;  %v7020_v56 = vld [vmem:[%s12557_s7 + $0x60] sm:$0xff]  ;;  %v6029_v47 = vld [vmem:[%s12557_s7 + $0x28] sm:$0xff] }
 0x2d9   :  { %v5317_v9 = vsel %vm3990_vm9, %v12927_v19, %v5316_v63  ;;  %v3868_v41 = vrot.slane %v3867_v49, 2  ;;  %v3785_v51 = vmax.f32 %v3783_v33, %v3784_v53  ;;  %v5323_v11 = vsel %vm3988_vm8, %v12930_v32, %v5322_v60  ;;  %v6030_v53 = vld [vmem:[%s12557_s7 + $0x30] sm:$0xff]  ;;  %v7024_v13 = vld [vmem:[%s12557_s7 + $0x80] sm:$0xff]  ;;  %v6033_v60 = vld [vmem:[%s12557_s7 + $0x48] sm:$0xff] }
 0x2da   :  { %v5312_v20 = vsel %vm3994_vm11, %v3619_v31, %v5311_v52  ;;  %v5318_v10 = vsel %vm3992_vm10, %v12929_v28, %v5317_v9  ;;  %v3702_v61 = vrot.slane %v3701_v12, 1  ;;  %v5324_v62 = vsel %vm3990_vm9, %v12931_v39, %v5323_v11  ;;  %8934 = vmatpush3.bf16.msra.mxu0 %v11957_v15  ;;  %8962 = vmatpush3.bf16.msra.mxu1 %v11971_v5  ;;  %v6985_v15 = vld [vmem:[%s12554_s4 + $0x250] sm:$0xff]  ;;  %v7023_v31 = vld [vmem:[%s12557_s7 + $0x78] sm:$0xff]  ;;  %v6032_v21 = vld [vmem:[%s12557_s7 + $0x40] sm:$0xff] }
 0x2db   :  { %v3869_v25 = vmax.f32 %v3867_v49, %v3868_v41  ;;  %v3786_v22 = vrot.slane %v3785_v51, 1  ;;  %v5325_v6 = vsel %vm3992_vm10, %v12934_v18, %v5324_v62  ;;  %v5328_v42 = vsel %vm3984_vm6, %v12935_v44, %v5327_v45  ;;  %8936 = vmatprep.subr.bf16.mxu0 %v11978_v29  ;;  %8964 = vmatprep.subr.bf16.mxu1 %v11980_v27  ;;  %v7008_v5 = vld [vmem:[%s12555_s5 + $0x250] sm:$0xff]  ;;  %v12256_v11 = vld [vmem:[%s12558_s6] ss:$0 sm:$0xff] }
 0x2dc   :  { %v3703_v38 = vmax.f32 %v3701_v12, %v3702_v61  ;;  %v5329_v57 = vsel %vm3986_vm7, %v12936_v17, %v5328_v42  ;;  %v6026_v52 = vld [vmem:[%s12557_s7 + $0x10] sm:$0xff]  ;;  %v9306_v48 = vmov 0.0   ;;  %v8971_v43 = vpack.c.bf16 %v7021_v23, %v7020_v56  ;;  %v7025_v12 = vld [vmem:[%s12557_s7 + $0x88] sm:$0xff] }
 0x2dd   :  { %v3870_v7 = vrot.slane %v3869_v25, 1  ;;  %v3787_v8 = vmax.f32 %v3785_v51, %v3786_v22  ;;  %v5330_v40 = vsel %vm3988_vm8, %v12937_v58, %v5329_v57  ;;  %v8986_v35 = vpack.c.bf16 %v6027_v16, %v6026_v52  ;;  %v7022_v49 = vld [vmem:[%s12557_s7 + $0x70] sm:$0xff]  ;;  %v12940_v57 = vld [vmem:[#allocation2_spill] sm:$0xff] }
 0x2de   :  { %v5319_v59 = vsel %vm3994_vm11, %v3703_v38, %v5318_v10  ;;  %v5331_v14 = vsel %vm3990_vm9, %v12938_v1, %v5330_v40  ;;  %8938 = vmatpush3.bf16.msra.mxu0 %v11978_v29  ;;  %8966 = vmatpush3.bf16.msra.mxu1 %v11980_v27  ;;  %v9304_v29 = vmov 0.0|0.0   ;;  %v6024_v27 = vld [vmem:[%s12557_s7] sm:$0xff]  ;;  %v8989_v34 = vpack.c.bf16 %v6029_v47, %v6028_v26  ;;  %v7026_v41 = vld [vmem:[%s12557_s7 + $0x90] sm:$0xff] }
 0x2df   :  { %v3871_v0 = vmax.f32 %v3869_v25, %v3870_v7  ;;  %v5326_v37 = vsel %vm3994_vm11, %v3787_v8, %v5325_v6  ;;  %v5332_v3 = vsel %vm3992_vm10, %v12939_v2, %v5331_v14  ;;  %8422 = vmatprep.subr.mxu0 %v6985_v15  ;;  %8464 = vmatprep.subr.mxu1 %v7008_v5 }
 0x2e0   :  { %v8974_v63 = vpack.c.bf16 %v7023_v31, %v7022_v49  ;;  %v8992_v19 = vpack.c.bf16 %v6031_v46, %v6030_v53  ;;  %v8977_v9 = vpack.c.bf16 %v7025_v12, %v7024_v13  ;;  %v8995_v28 = vpack.c.bf16 %v6033_v60, %v6032_v21 }
 0x2e1   :  { %v5333_v24 = vsel %vm3994_vm11, %v3871_v0, %v5332_v3 }
 0x2e2   :  { %8423 = vmatpush3.msra.mxu0 %v6985_v15  ;;  %8465 = vmatpush3.msra.mxu1 %v7008_v5 }
 0x2e3   :  { %8425 = vmatmul.mubr.msk.f32.vlgmr.msra.gmra.mrb[24].mxu0 %vm4045_vm12, %v12045_v30  ;;  %8467 = vmatmul.mubr.msk.f32.vlgmr.msra.gmra.mrb[24].mxu1 %vm4045_vm12, %v12045_v30  ;;  %v6025_v30 = vld [vmem:[%s12557_s7 + $0x8] sm:$0xff] }
 0x2e4   :  { %8427 = vmatprep.mubr.msk.f32.mxu0 %vm4045_vm12, %v12076_v36  ;;  %8469 = vmatprep.mubr.msk.f32.mxu1 %vm4045_vm12, %v12076_v36  ;;  %v7018_v36 = vld [vmem:[%s12557_s7 + $0x50] sm:$0xff] }
 0x2e5   :  { %8982 = vmatprep.subr.bf16.mxu1 %v9304_v29  ;;  %8967 = vmatprep.subr.bf16.mxu0 %v9304_v29  ;;  %v8968_v33 = vpack.c.bf16 %v7019_v4, %v7018_v36 }
 0x2e7   :  { %8428 = vmatmul.mubr.msk.f32.gmra.mrb[26].mxu0 %vm4045_vm12, %v12085_v50  ;;  %8470 = vmatmul.mubr.msk.f32.gmra.mrb[26].mxu1 %vm4045_vm12, %v12085_v50  ;;  %v8983_v50 = vpack.c.bf16 %v6025_v30, %v6024_v27 }
 0x2e8   :  { %8430 = vmatprep.mubr.msk.f32.mxu0 %vm4045_vm12, %v5312_v20  ;;  %8472 = vmatprep.mubr.msk.f32.mxu1 %vm4045_vm12, %v5312_v20  ;;  %v7027_v20 = vld [vmem:[%s12557_s7 + $0x98] sm:$0xff] }
 0x2e9   :  { %8984 = vmatpush3.bf16.msra.mxu1 %v8983_v50  ;;  %8969 = vmatpush3.bf16.msra.mxu0 %v8968_v33  ;;  %v8980_v10 = vpack.c.bf16 %v7027_v20, %v7026_v41 }
 0x2ea   :  { %8985 = vmatprep.subr.bf16.mxu1 %v9304_v29  ;;  %8970 = vmatprep.subr.bf16.mxu0 %v9304_v29 }
 0x2eb   :  { %8431 = vmatmul.mubr.msk.f32.gmra.mrb[28].mxu0 %vm4045_vm12, %v5319_v59  ;;  %8473 = vmatmul.mubr.msk.f32.gmra.mrb[28].mxu1 %vm4045_vm12, %v5319_v59 }
 0x2ec   :  { %8433 = vmatprep.mubr.msk.f32.mxu0 %vm4045_vm12, %v5326_v37  ;;  %8475 = vmatprep.mubr.msk.f32.mxu1 %vm4045_vm12, %v5326_v37 }
 0x2ed   :  { %8987 = vmatpush3.bf16.msra.mxu1 %v8986_v35  ;;  %8972 = vmatpush3.bf16.msra.mxu0 %v8971_v43 }
 0x2ee   :  { %8988 = vmatprep.subr.bf16.mxu1 %v9304_v29  ;;  %8973 = vmatprep.subr.bf16.mxu0 %v9304_v29 }
 0x2ef   :  { %8434 = vmatmul.mubr.msk.f32.gmra.mrb[30].mxu0 %vm4045_vm12, %v5333_v24  ;;  %8476 = vmatmul.mubr.msk.f32.gmra.mrb[30].mxu1 %vm4045_vm12, %v5333_v24 }
 0x2f0   :  { %8521 = vmatprep.mubr.msk.f32.mxu1 %vm9305_vm13, %v9306_v48  ;;  %8498 = vmatprep.mubr.msk.f32.mxu0 %vm9305_vm13, %v9306_v48 }
 0x2f1   :  { %8990 = vmatpush3.bf16.msra.mxu1 %v8989_v34  ;;  %8975 = vmatpush3.bf16.msra.mxu0 %v8974_v63 }
 0x2f2   :  { %8991 = vmatprep.subr.bf16.mxu1 %v9304_v29  ;;  %8976 = vmatprep.subr.bf16.mxu0 %v9304_v29 }
 0x2f5   :  { %8993 = vmatpush3.bf16.msra.mxu1 %v8992_v19  ;;  %8978 = vmatpush3.bf16.msra.mxu0 %v8977_v9 }
 0x2f6   :  { %8994 = vmatprep.subr.bf16.mxu1 %v9304_v29  ;;  %8979 = vmatprep.subr.bf16.mxu0 %v9304_v29 }
 0x2f9   :  { %8996 = vmatpush3.bf16.msra.mxu1 %v8995_v28  ;;  %8981 = vmatpush3.bf16.msra.mxu0 %v8980_v10 }
 0x2fa   :  { %9012 = vmatprep.subr.bf16.mxu1 %v9304_v29  ;;  %8997 = vmatprep.subr.bf16.mxu0 %v9304_v29 }
 0x3b6   :  { %v8426_v51 = vpop.f32.mrb[24].mxu0  ;;  %v8468_v32 = vpop.f32.mrb[24].mxu1 }
 0x3b7   :  { %v5593_v61 = vmax.f32 %v8426_v51, %v8468_v32  ;;  %v5416_v39 = vpop.f32.mrb[25].mxu0  ;;  %v5545_v62 = vpop.f32.mrb[25].mxu1 }
 0x3b8   :  { %v5592_v25 = vmax.f32 %v5416_v39, %v5545_v62 }
 0x3b9   :  { %v5608_v54 = vadd.f32 %v12256_v11, %v5593_v61 }
 0x3ba   :  { %v5607_v55 = vadd.f32 %v12256_v11, %v5592_v25  ;;  %v8429_v45 = vpop.f32.mrb[26].mxu0  ;;  %v8471_v22 = vpop.f32.mrb[26].mxu1 }
 0x3bb   :  { %v5616_v18 = vmax.f32 %v5608_v54, 0.0  ;;  %v5595_v6 = vmax.f32 %v8429_v45, %v8471_v22  ;;  %v5426_v44 = vpop.f32.mrb[27].mxu0  ;;  %v5555_v42 = vpop.f32.mrb[27].mxu1 }
 0x3bc   :  { %v5615_v38 = vmax.f32 %v5607_v55, 0.0  ;;  %v5594_v7 = vmax.f32 %v5426_v44, %v5555_v42 }
 0x3bd   :  { %v5648_v17 = vcombine.high %v5616_v18, %v5616_v18  ;;  %v5655_v15 = vrot.slane %v5616_v18, %v12940_v57  ;;  %v5610_v5 = vadd.f32 %v12256_v11, %v5595_v6 }
 0x3be   :  { %v5631_v8 = vcombine.high %v5615_v38, %v5615_v38  ;;  %v5638_v58 = vrot.slane %v5615_v38, %v12940_v57  ;;  %v12264_v40 = vadd.f32 %v12256_v11, %v5594_v7  ;;  %v12266_v59 = vpop.f32.mrb[28].mxu0  ;;  %v12268_v0 = vpop.f32.mrb[28].mxu1 }
 0x3bf   :  { %v5662_v1 = vrot.slane %v5648_v17, %v12940_v57  ;;  %v5663_v14 = vcombine.high %v5655_v15, %v5655_v15  ;;  %v5828_v37 = vsel %vm5799_vm14, %v5655_v15, -inf  ;;  %v12272_v2 = vmax.f32 %v5610_v5, 0.0  ;;  %v12274_v3 = vpop.f32.mrb[29].mxu0  ;;  %v12276_v24 = vpop.f32.mrb[29].mxu1 }
 0x3c0   :  { %v5829_v27 = vrot.slane %v5828_v37, 4  ;;  %v5645_v30 = vrot.slane %v5631_v8, %v12940_v57  ;;  %v5646_v36 = vcombine.high %v5638_v58, %v5638_v58  ;;  %v5800_v50 = vsel %vm5799_vm14, %v5638_v58, -inf }
 0x3c1   :  { %v5664_v4 = vcombine.high %v5662_v1, %v5662_v1  ;;  %v5835_v52 = vsel %vm5799_vm14, %v5663_v14, -inf  ;;  %v5842_v16 = vsel %vm5799_vm14, %v5662_v1, -inf  ;;  %v5801_v33 = vrot.slane %v5800_v50, 4  ;;  %v12299_v14 = vld [vmem:[%s12557_s7 + $0xf0] sm:$0xff] }
 0x3c2   :  { %v5830_v56 = vmax.f32 %v5828_v37, %v5829_v27  ;;  %v5836_v23 = vrot.slane %v5835_v52, 4  ;;  %v5843_v35 = vrot.slane %v5842_v16, 4  ;;  %v5647_v43 = vcombine.high %v5645_v30, %v5645_v30  ;;  %v12282_v26 = vpop.f32.mrb[30].mxu0  ;;  %v12284_v47 = vpop.f32.mrb[30].mxu1  ;;  %v12304_v37 = vld [vmem:[%s12557_s7 + $0xf8] sm:$0xff] }
 0x3c3   :  { %v5849_v49 = vsel %vm5799_vm14, %v5664_v4, -inf  ;;  %v5802_v31 = vmax.f32 %v5800_v50, %v5801_v33  ;;  %v5807_v34 = vsel %vm5799_vm14, %v5646_v36, -inf  ;;  %v5814_v63 = vsel %vm5799_vm14, %v5645_v30, -inf  ;;  %v12289_v53 = vpop.f32.mrb[31].mxu0  ;;  %v12291_v46 = vpop.f32.mrb[31].mxu1 }
 0x3c4   :  { %v5831_v13 = vrot.slane %v5830_v56, 2  ;;  %v5837_v12 = vmax.f32 %v5835_v52, %v5836_v23  ;;  %v5844_v19 = vmax.f32 %v5842_v16, %v5843_v35  ;;  %v5850_v9 = vrot.slane %v5849_v49, 4 }
 0x3c5   :  { %v5803_v21 = vrot.slane %v5802_v31, 2  ;;  %v5808_v60 = vrot.slane %v5807_v34, 4  ;;  %v5815_v41 = vrot.slane %v5814_v63, 4  ;;  %v5821_v20 = vsel %vm5799_vm14, %v5647_v43, -inf }
 0x3c6   :  { %v5832_v28 = vmax.f32 %v5830_v56, %v5831_v13  ;;  %v5838_v10 = vrot.slane %v5837_v12, 2  ;;  %v5845_v51 = vrot.slane %v5844_v19, 2  ;;  %v5851_v32 = vmax.f32 %v5849_v49, %v5850_v9 }
 0x3c7   :  { %v5804_v61 = vmax.f32 %v5802_v31, %v5803_v21  ;;  %v5809_v39 = vmax.f32 %v5807_v34, %v5808_v60  ;;  %v5816_v62 = vmax.f32 %v5814_v63, %v5815_v41  ;;  %v5822_v25 = vrot.slane %v5821_v20, 4 }
 0x3c8   :  { %v5833_v54 = vrot.slane %v5832_v28, 1  ;;  %v5839_v55 = vmax.f32 %v5837_v12, %v5838_v10  ;;  %v5846_v45 = vmax.f32 %v5844_v19, %v5845_v51  ;;  %v5852_v22 = vrot.slane %v5851_v32, 2 }
 0x3c9   :  { %v5805_v18 = vrot.slane %v5804_v61, 1  ;;  %v5810_v6 = vrot.slane %v5809_v39, 2  ;;  %v5817_v44 = vrot.slane %v5816_v62, 2  ;;  %v5823_v42 = vmax.f32 %v5821_v20, %v5822_v25 }
 0x3ca   :  { %v5834_v38 = vmax.f32 %v5832_v28, %v5833_v54  ;;  %v5840_v7 = vrot.slane %v5839_v55, 1  ;;  %v5847_v17 = vrot.slane %v5846_v45, 1  ;;  %v12294_v15 = vmax.f32 %v5851_v32, %v5852_v22 }
 0x3cb   :  { %v5806_v5 = vmax.f32 %v5804_v61, %v5805_v18  ;;  %v5811_v8 = vmax.f32 %v5809_v39, %v5810_v6  ;;  %v5818_v58 = vmax.f32 %v5816_v62, %v5817_v44  ;;  %v5824_v1 = vrot.slane %v5823_v42, 2 }
 0x3cc   :  { %v5841_v27 = vmax.f32 %v5839_v55, %v5840_v7  ;;  %v5848_v30 = vmax.f32 %v5846_v45, %v5847_v17  ;;  %v5682_v36 = vcombine.high %v12272_v2, %v12272_v2  ;;  %v5689_v33 = vrot.slane %v12272_v2, %v12940_v57 }
 0x3cd   :  { %v5812_v50 = vrot.slane %v5811_v8, 1  ;;  %v5819_v4 = vrot.slane %v5818_v58, 1  ;;  %v5825_v52 = vmax.f32 %v5823_v42, %v5824_v1  ;;  %v12309_v16 = vsel %vm3982_vm5, %v5834_v38, %v5806_v5  ;;  %v12340_v5 = vld [vmem:[%s12557_s7 + $0xa0] sm:$0xff] }
 0x3ce   :  { %v5696_v56 = vrot.slane %v5682_v36, %v12940_v57  ;;  %v5617_v23 = vmax.f32 %v12264_v40, 0.0  ;;  %v9013_v35 = vpack.c.bf16 %v12304_v37, %v12299_v14  ;;  %v5854_v43 = vrot.slane %v12294_v15, 1  ;;  %v7046_v14 = vld [vmem:[%s12557_s7 + $0x118] sm:$0xff] }
 0x3cf   :  { %v5813_v49 = vmax.f32 %v5811_v8, %v5812_v50  ;;  %v5820_v31 = vmax.f32 %v5818_v58, %v5819_v4  ;;  %v5597_v34 = vmax.f32 %v12266_v59, %v12268_v0  ;;  %v5697_v63 = vcombine.high %v5689_v33, %v5689_v33 }
 0x3d0   :  { %v5698_v13 = vcombine.high %v5696_v56, %v5696_v56  ;;  %v5884_v12 = vsel %vm5799_vm14, %v5689_v33, -inf  ;;  %v5898_v2 = vsel %vm5799_vm14, %v5696_v56, -inf  ;;  %v5826_v19 = vrot.slane %v5825_v52, 1 }
 0x3d1   :  { %v12323_v9 = vsel %vm3982_vm5, %v5841_v27, %v5813_v49  ;;  %v12326_v40 = vsel %vm3982_vm5, %v5848_v30, %v5820_v31  ;;  %v5885_v21 = vrot.slane %v5884_v12, 4  ;;  %v5891_v60 = vsel %vm5799_vm14, %v5697_v63, -inf }
 0x3d2   :  { %v5899_v41 = vrot.slane %v5898_v2, 4  ;;  %v5905_v20 = vsel %vm5799_vm14, %v5698_v13, -inf  ;;  %v5665_v59 = vcombine.high %v5617_v23, %v5617_v23  ;;  %v5892_v28 = vrot.slane %v5891_v60, 4 }
 0x3d3   :  { %v5886_v0 = vmax.f32 %v5884_v12, %v5885_v21  ;;  %v5906_v10 = vrot.slane %v5905_v20, 4  ;;  %v5672_v51 = vrot.slane %v5617_v23, %v12940_v57  ;;  %v5612_v39 = vadd.f32 %v12256_v11, %v5597_v34 }
 0x3d4   :  { %v5900_v32 = vmax.f32 %v5898_v2, %v5899_v41  ;;  %v5679_v61 = vrot.slane %v5665_v59, %v12940_v57  ;;  %v5596_v62 = vmax.f32 %v12274_v3, %v12276_v24  ;;  %v5893_v54 = vmax.f32 %v5891_v60, %v5892_v28  ;;  %v12345_v3 = vld [vmem:[%s12557_s7 + $0xa8] sm:$0xff] }
 0x3d5   :  { %v5887_v25 = vrot.slane %v5886_v0, 2  ;;  %v5907_v55 = vmax.f32 %v5905_v20, %v5906_v10  ;;  %v5680_v45 = vcombine.high %v5672_v51, %v5672_v51  ;;  %v5856_v6 = vsel %vm5799_vm14, %v5672_v51, -inf }
 0x3d6   :  { %v5901_v22 = vrot.slane %v5900_v32, 2  ;;  %v5681_v18 = vcombine.high %v5679_v61, %v5679_v61  ;;  %v5870_v44 = vsel %vm5799_vm14, %v5679_v61, -inf  ;;  %v5894_v38 = vrot.slane %v5893_v54, 2 }
 0x3d7   :  { %v5888_v42 = vmax.f32 %v5886_v0, %v5887_v25  ;;  %v5908_v7 = vrot.slane %v5907_v55, 2  ;;  %v5857_v17 = vrot.slane %v5856_v6, 4  ;;  %v5863_v8 = vsel %vm5799_vm14, %v5680_v45, -inf }
 0x3d8   :  { %v5902_v24 = vmax.f32 %v5900_v32, %v5901_v22  ;;  %v5871_v58 = vrot.slane %v5870_v44, 4  ;;  %v5877_v1 = vsel %vm5799_vm14, %v5681_v18, -inf  ;;  %v5895_v30 = vmax.f32 %v5893_v54, %v5894_v38 }
 0x3d9   :  { %v5889_v27 = vrot.slane %v5888_v42, 1  ;;  %v12349_v36 = vmax.f32 %v5907_v55, %v5908_v7  ;;  %v5858_v50 = vmax.f32 %v5856_v6, %v5857_v17  ;;  %v5864_v4 = vrot.slane %v5863_v8, 4 }
 0x3da   :  { %v5872_v33 = vmax.f32 %v5870_v44, %v5871_v58  ;;  %v5878_v56 = vrot.slane %v5877_v1, 4  ;;  %v8998_v23 = vpack.c.bf16 %v12345_v3, %v12340_v5  ;;  %v12354_v49 = vmax.f32 %v12294_v15, %v5854_v43  ;;  %v7047_v5 = vld [vmem:[%s12557_s7 + $0x120] sm:$0xff]  ;;  %v7048_v3 = vld [vmem:[%s12557_s7 + $0x128] sm:$0xff] }
 0x3db   :  { %v12356_v31 = vmax.f32 %v5825_v52, %v5826_v19  ;;  %v5903_v34 = vrot.slane %v5902_v24, 1  ;;  %v5859_v63 = vrot.slane %v5858_v50, 2  ;;  %v12358_v13 = vmax.f32 %v5888_v42, %v5889_v27 }
 0x3dc   :  { %v5865_v12 = vmax.f32 %v5863_v8, %v5864_v4  ;;  %v5873_v2 = vrot.slane %v5872_v33, 2  ;;  %v5879_v21 = vmax.f32 %v5877_v1, %v5878_v56  ;;  %v5896_v60 = vrot.slane %v5895_v30, 1 }
 0x3dd   :  { %v5910_v41 = vrot.slane %v12349_v36, 1  ;;  %v5860_v20 = vmax.f32 %v5858_v50, %v5859_v63  ;;  %v5620_v59 = vmax.f32 %v5612_v39, 0.0  ;;  %v5611_v15 = vadd.f32 %v12256_v11, %v5596_v62 }
 0x3de   :  { %v5866_v0 = vrot.slane %v5865_v12, 2  ;;  %v5874_v28 = vmax.f32 %v5872_v33, %v5873_v2  ;;  %v5880_v10 = vrot.slane %v5879_v21, 2  ;;  %v5599_v51 = vmax.f32 %v12282_v26, %v12284_v47 }
 0x3df   :  { %v5861_v43 = vrot.slane %v5860_v20, 1  ;;  %v5716_v52 = vcombine.high %v5620_v59, %v5620_v59  ;;  %v5723_v19 = vrot.slane %v5620_v59, %v12940_v57  ;;  %v12365_v32 = vmax.f32 %v5902_v24, %v5903_v34 }
 0x3e0   :  { %v5867_v61 = vmax.f32 %v5865_v12, %v5866_v0  ;;  %v5881_v25 = vmax.f32 %v5879_v21, %v5880_v10  ;;  %v5619_v54 = vmax.f32 %v5611_v15, 0.0  ;;  %v12369_v18 = vmax.f32 %v5895_v30, %v5896_v60 }
 0x3e1   :  { %v5862_v55 = vmax.f32 %v5860_v20, %v5861_v43  ;;  %v5730_v39 = vrot.slane %v5716_v52, %v12940_v57  ;;  %v5731_v45 = vcombine.high %v5723_v19, %v5723_v19  ;;  %v5940_v22 = vsel %vm5799_vm14, %v5723_v19, -inf }
 0x3e2   :  { %v5868_v62 = vrot.slane %v5867_v61, 1  ;;  %v5875_v6 = vrot.slane %v5874_v28, 1  ;;  %v5941_v44 = vrot.slane %v5940_v22, 4  ;;  %v5882_v17 = vrot.slane %v5881_v25, 1 }
 0x3e3   :  { %v6142_v42 = vsel %vm3984_vm6, %v5862_v55, %v12309_v16  ;;  %v5732_v26 = vcombine.high %v5730_v39, %v5730_v39  ;;  %v5947_v47 = vsel %vm5799_vm14, %v5731_v45, -inf  ;;  %v5954_v38 = vsel %vm5799_vm14, %v5730_v39, -inf }
 0x3e4   :  { %v5869_v7 = vmax.f32 %v5867_v61, %v5868_v62  ;;  %v5942_v24 = vmax.f32 %v5940_v22, %v5941_v44  ;;  %v5948_v8 = vrot.slane %v5947_v47, 4  ;;  %v5955_v58 = vrot.slane %v5954_v38, 4 }
 0x3e5   :  { %v5961_v1 = vsel %vm5799_vm14, %v5732_v26, -inf  ;;  %v5699_v27 = vcombine.high %v5619_v54, %v5619_v54  ;;  %v5706_v30 = vrot.slane %v5619_v54, %v12940_v57  ;;  %v12387_v45 = vmax.f32 %v5874_v28, %v5875_v6 }
 0x3e6   :  { %v6054_v50 = vsel %vm3984_vm6, %v5869_v7, %v12323_v9  ;;  %v5943_v4 = vrot.slane %v5942_v24, 2  ;;  %v5949_v16 = vmax.f32 %v5947_v47, %v5948_v8  ;;  %v5962_v33 = vrot.slane %v5961_v1, 4 }
 0x3e7   :  { %v5956_v56 = vmax.f32 %v5954_v38, %v5955_v58  ;;  %v5713_v34 = vrot.slane %v5699_v27, %v12940_v57  ;;  %v5714_v63 = vcombine.high %v5706_v30, %v5706_v30  ;;  %v5912_v12 = vsel %vm5799_vm14, %v5706_v30, -inf }
 0x3e8   :  { %v5944_v2 = vmax.f32 %v5942_v24, %v5943_v4  ;;  %v5950_v21 = vrot.slane %v5949_v16, 2  ;;  %v5963_v60 = vmax.f32 %v5961_v1, %v5962_v33  ;;  %v5913_v20 = vrot.slane %v5912_v12, 4 }
 0x3e9   :  { %v5957_v59 = vrot.slane %v5956_v56, 2  ;;  %v5715_v0 = vcombine.high %v5713_v34, %v5713_v34  ;;  %v5919_v10 = vsel %vm5799_vm14, %v5714_v63, -inf  ;;  %v5926_v15 = vsel %vm5799_vm14, %v5713_v34, -inf }
 0x3ea   :  { %v12384_v9 = vmax.f32 %v12349_v36, %v5910_v41  ;;  %v5951_v43 = vmax.f32 %v5949_v16, %v5950_v21  ;;  %v5964_v52 = vrot.slane %v5963_v60, 2  ;;  %v5914_v19 = vmax.f32 %v5912_v12, %v5913_v20 }
 0x3eb   :  { %v5958_v61 = vmax.f32 %v5956_v56, %v5957_v59  ;;  %v5920_v54 = vrot.slane %v5919_v10, 4  ;;  %v5927_v55 = vrot.slane %v5926_v15, 4  ;;  %v5933_v39 = vsel %vm5799_vm14, %v5715_v0, -inf }
 0x3ec   :  { %v12389_v22 = vmax.f32 %v5881_v25, %v5882_v17  ;;  %v5965_v62 = vmax.f32 %v5963_v60, %v5964_v52  ;;  %v5915_v44 = vrot.slane %v5914_v19, 2  ;;  %v5945_v26 = vrot.slane %v5944_v2, 1 }
 0x3ed   :  { %v5921_v47 = vmax.f32 %v5919_v10, %v5920_v54  ;;  %v5928_v38 = vmax.f32 %v5926_v15, %v5927_v55  ;;  %v5934_v7 = vrot.slane %v5933_v39, 4  ;;  %v5952_v36 = vrot.slane %v5951_v43, 1 }
 0x3ee   :  { %v5959_v41 = vrot.slane %v5958_v61, 1  ;;  %v5916_v24 = vmax.f32 %v5914_v19, %v5915_v44  ;;  %v5614_v8 = vadd.f32 %v12256_v11, %v5599_v51  ;;  %v5966_v58 = vrot.slane %v5965_v62, 1 }
 0x3ef   :  { %v5922_v1 = vrot.slane %v5921_v47, 2  ;;  %v5929_v27 = vrot.slane %v5928_v38, 2  ;;  %v5935_v30 = vmax.f32 %v5933_v39, %v5934_v7  ;;  %v5598_v25 = vmax.f32 %v12289_v53, %v12291_v46 }
 0x3f0   :  { %v5917_v4 = vrot.slane %v5916_v24, 1  ;;  %v5622_v28 = vmax.f32 %v5614_v8, 0.0  ;;  %v6143_v6 = vsel %vm3986_vm7, %v12358_v13, %v6142_v42  ;;  %v6055_v56 = vsel %vm3986_vm7, %v12369_v18, %v6054_v50 }
 0x3f1   :  { %v5923_v17 = vmax.f32 %v5921_v47, %v5922_v1  ;;  %v5930_v16 = vmax.f32 %v5928_v38, %v5929_v27  ;;  %v5936_v33 = vrot.slane %v5935_v30, 2  ;;  %v5946_v34 = vmax.f32 %v5944_v2, %v5945_v26 }
 0x3f2   :  { %v5750_v51 = vcombine.high %v5622_v28, %v5622_v28  ;;  %v5757_v63 = vrot.slane %v5622_v28, %v12940_v57  ;;  %v5613_v12 = vadd.f32 %v12256_v11, %v5598_v25  ;;  %v5953_v21 = vmax.f32 %v5951_v43, %v5952_v36 }
 0x3f3   :  { %v12400_v60 = vmax.f32 %v5958_v61, %v5959_v41  ;;  %v5918_v20 = vmax.f32 %v5916_v24, %v5917_v4  ;;  %v5937_v53 = vmax.f32 %v5935_v30, %v5936_v33  ;;  %v5924_v0 = vrot.slane %v5923_v17, 1 }
 0x3f4   :  { %v5764_v46 = vrot.slane %v5750_v51, %v12940_v57  ;;  %v5765_v13 = vcombine.high %v5757_v63, %v5757_v63  ;;  %v5996_v42 = vsel %vm5799_vm14, %v5757_v63, -inf  ;;  %v5621_v59 = vmax.f32 %v5613_v12, 0.0 }
 0x3f5   :  { %v5931_v10 = vrot.slane %v5930_v16, 1  ;;  %v5997_v18 = vrot.slane %v5996_v42, 4  ;;  %v12404_v50 = vmax.f32 %v5965_v62, %v5966_v58  ;;  %v5938_v52 = vrot.slane %v5937_v53, 1 }
 0x3f6   :  { %v5766_v2 = vcombine.high %v5764_v46, %v5764_v46  ;;  %v6003_v15 = vsel %vm5799_vm14, %v5765_v13, -inf  ;;  %v6010_v11 = vsel %vm5799_vm14, %v5764_v46, -inf  ;;  %v5733_v43 = vcombine.high %v5621_v59, %v5621_v59 }
 0x3f7   :  { %v5998_v19 = vmax.f32 %v5996_v42, %v5997_v18  ;;  %v6004_v61 = vrot.slane %v6003_v15, 4  ;;  %v6011_v54 = vrot.slane %v6010_v11, 4  ;;  %v5740_v39 = vrot.slane %v5621_v59, %v12940_v57 }
 0x3f8   :  { %v6017_v55 = vsel %vm5799_vm14, %v5766_v2, -inf  ;;  %v5747_v44 = vrot.slane %v5733_v43, %v12940_v57  ;;  %v6144_v26 = vsel %vm3988_vm8, %v5918_v20, %v6143_v6  ;;  %v5925_v58 = vmax.f32 %v5923_v17, %v5924_v0 }
 0x3f9   :  { %v5999_v62 = vrot.slane %v5998_v19, 2  ;;  %v6005_v47 = vmax.f32 %v6003_v15, %v6004_v61  ;;  %v6012_v38 = vmax.f32 %v6010_v11, %v6011_v54  ;;  %v6018_v7 = vrot.slane %v6017_v55, 4 }
 0x3fa   :  { %v5748_v36 = vcombine.high %v5740_v39, %v5740_v39  ;;  %v5749_v41 = vcombine.high %v5747_v44, %v5747_v44  ;;  %v5968_v24 = vsel %vm5799_vm14, %v5740_v39, -inf  ;;  %v5982_v8 = vsel %vm5799_vm14, %v5747_v44, -inf }
 0x3fb   :  { %v6000_v1 = vmax.f32 %v5998_v19, %v5999_v62  ;;  %v6013_v27 = vrot.slane %v6012_v38, 2  ;;  %v6019_v30 = vmax.f32 %v6017_v55, %v6018_v7  ;;  %v5969_v4 = vrot.slane %v5968_v24, 4 }
 0x3fc   :  { %v5975_v28 = vsel %vm5799_vm14, %v5748_v36, -inf  ;;  %v5983_v57 = vrot.slane %v5982_v8, 4  ;;  %v5989_v25 = vsel %vm5799_vm14, %v5749_v41, -inf  ;;  %v5932_v6 = vmax.f32 %v5930_v16, %v5931_v10 }
 0x3fd   :  { %v5939_v33 = vmax.f32 %v5937_v53, %v5938_v52  ;;  %v6006_v51 = vrot.slane %v6005_v47, 2  ;;  %v6020_v63 = vrot.slane %v6019_v30, 2  ;;  %v5970_v12 = vmax.f32 %v5968_v24, %v5969_v4 }
 0x3fe   :  { %v5976_v20 = vrot.slane %v5975_v28, 4  ;;  %v5984_v46 = vmax.f32 %v5982_v8, %v5983_v57  ;;  %v5990_v13 = vrot.slane %v5989_v25, 4  ;;  %v6001_v42 = vrot.slane %v6000_v1, 1 }
 0x3ff   :  { %v6014_v59 = vmax.f32 %v6012_v38, %v6013_v27  ;;  %v6145_v17 = vsel %vm3990_vm9, %v5946_v34, %v6144_v26  ;;  %v6056_v0 = vsel %vm3988_vm8, %v5925_v58, %v6055_v56  ;;  %v5971_v18 = vrot.slane %v5970_v12, 2 }
 0x400   :  { %v5977_v2 = vmax.f32 %v5975_v28, %v5976_v20  ;;  %v5985_v15 = vrot.slane %v5984_v46, 2  ;;  %v5991_v11 = vmax.f32 %v5989_v25, %v5990_v13  ;;  %v6007_v43 = vmax.f32 %v6005_v47, %v6006_v51  ;;  %v7035_v13 = vld [vmem:[%s12557_s7 + $0xc8] sm:$0xff] }
 0x401   :  { %v6057_v16 = vsel %vm3990_vm9, %v5953_v21, %v6056_v0  ;;  %v6021_v53 = vmax.f32 %v6019_v30, %v6020_v63  ;;  %v6338_v10 = vsel %vm3982_vm5, %v12354_v49, %v12356_v31  ;;  %v5972_v52 = vmax.f32 %v5970_v12, %v5971_v18  ;;  %v7049_v18 = vld [vmem:[%s12557_s7 + $0x130] sm:$0xff] }
 0x402   :  { %v5978_v19 = vrot.slane %v5977_v2, 2  ;;  %v5986_v61 = vmax.f32 %v5984_v46, %v5985_v15  ;;  %v5992_v54 = vrot.slane %v5991_v11, 2  ;;  %v6002_v55 = vmax.f32 %v6000_v1, %v6001_v42  ;;  %v7045_v46 = vld [vmem:[%s12557_s7 + $0x110] sm:$0xff] }
 0x403   :  { %v6339_v56 = vsel %vm3984_vm6, %v12389_v22, %v6338_v10  ;;  %v6015_v34 = vrot.slane %v6014_v59, 1  ;;  %v6240_v39 = vsel %vm3984_vm6, %v12387_v45, %v12326_v40  ;;  %v5973_v44 = vrot.slane %v5972_v52, 1  ;;  %v6427_v10 = vld [vmem:[%s12559_s9] sm:$0xff] }
 0x404   :  { %v5979_v21 = vmax.f32 %v5977_v2, %v5978_v19  ;;  %v5987_v26 = vrot.slane %v5986_v61, 1  ;;  %v5993_v62 = vmax.f32 %v5991_v11, %v5992_v54  ;;  %v6008_v47 = vrot.slane %v6007_v43, 1  ;;  %v7050_v2 = vld [vmem:[%s12557_s7 + $0x138] sm:$0xff]  ;;  %v7038_v11 = vld [vmem:[%s12557_s7 + $0xe0] sm:$0xff] }
 0x405   :  { %v6022_v38 = vrot.slane %v6021_v53, 1  ;;  %v6340_v49 = vsel %vm3986_vm7, %v12384_v9, %v6339_v56  ;;  %v6241_v31 = vsel %vm3986_vm7, %v12365_v32, %v6240_v39  ;;  %v5974_v7 = vmax.f32 %v5972_v52, %v5973_v44  ;;  %v7043_v9 = vld [vmem:[%s12557_s7 + $0x100] sm:$0xff]  ;;  %v7044_v32 = vld [vmem:[%s12557_s7 + $0x108] sm:$0xff]  ;;  %v6430_v54 = vld [vmem:[%s12559_s9 + $0x18] sm:$0xff] }
 0x406   :  { %v5980_v36 = vrot.slane %v5979_v21, 1  ;;  %v5994_v22 = vrot.slane %v5993_v62, 1  ;;  %v6341_v41 = vsel %vm3988_vm8, %v5939_v33, %v6340_v49  ;;  %v5988_v45 = vmax.f32 %v5986_v61, %v5987_v26  ;;  %v7033_v33 = vld [vmem:[%s12557_s7 + $0xb8] sm:$0xff]  ;;  %v6428_v52 = vld [vmem:[%s12559_s9 + $0x8] sm:$0xff]  ;;  %v6429_v61 = vld [vmem:[%s12559_s9 + $0x10] sm:$0xff] }
 0x407   :  { %v6342_v40 = vsel %vm3990_vm9, %v12404_v50, %v6341_v41  ;;  %v6016_v24 = vmax.f32 %v6014_v59, %v6015_v34  ;;  %v6242_v8 = vsel %vm3988_vm8, %v5932_v6, %v6241_v31  ;;  %v6146_v1 = vsel %vm3992_vm10, %v5974_v7, %v6145_v17  ;;  %v7032_v6 = vld [vmem:[%s12557_s7 + $0xb0] sm:$0xff]  ;;  %v7037_v17 = vld [vmem:[%s12557_s7 + $0xd8] sm:$0xff]  ;;  %v6432_v34 = vld [vmem:[%s12559_s9 + $0x28] sm:$0xff] }
 0x408   :  { %v5981_v58 = vmax.f32 %v5979_v21, %v5980_v36  ;;  %v5995_v27 = vmax.f32 %v5993_v62, %v5994_v22  ;;  %v6243_v30 = vsel %vm3990_vm9, %v12400_v60, %v6242_v8  ;;  %v6147_v50 = vsel %vm3994_vm11, %v6002_v55, %v6146_v1  ;;  %v7036_v59 = vld [vmem:[%s12557_s7 + $0xd0] sm:$0xff]  ;;  %v6431_v55 = vld [vmem:[%s12559_s9 + $0x20] sm:$0xff] }
 0x409   :  { %v6009_v4 = vmax.f32 %v6007_v43, %v6008_v47  ;;  %v6023_v28 = vmax.f32 %v6021_v53, %v6022_v38  ;;  %v6244_v57 = vsel %vm3992_vm10, %v5988_v45, %v6243_v30  ;;  %8522 = vmatmul.mubr.msk.f32.vlgmr.msra.gmra.mrb[32].mxu1 %vm6060_vm15, %v6147_v50  ;;  %v9016_v12 = vpack.c.bf16 %v7044_v32, %v7043_v9  ;;  %v7039_v43 = vld [vmem:[%s12557_s7 + $0xe8] sm:$0xff]  ;;  %v6433_v44 = vld [vmem:[%s12559_s9 + $0x30] sm:$0x3]  ;;  %v7053_v45 = vld [vmem:[%s12561_s10] ss:$0 sm:$0xff] }
 0x40a   :  { %v6058_v25 = vsel %vm3992_vm10, %v5981_v58, %v6057_v16  ;;  %v6343_v60 = vsel %vm3992_vm10, %v5995_v27, %v6342_v40  ;;  %v6245_v51 = vsel %vm3994_vm11, %v6016_v24, %v6244_v57  ;;  %9014 = vmatpush3.bf16.msra.mxu1 %v9013_v35  ;;  %8567 = vmatprep.mubr.msk.f32.mxu1 %vm9305_vm13, %v9306_v48  ;;  %v7034_v35 = vld [vmem:[%s12557_s7 + $0xc0] sm:$0xff] }
 0x40b   :  { %v6059_v63 = vsel %vm3994_vm11, %v6009_v4, %v6058_v25  ;;  %v6344_v20 = vsel %vm3994_vm11, %v6023_v28, %v6343_v60  ;;  %9015 = vmatprep.subr.bf16.mxu1 %v9304_v29  ;;  %v9001_v37 = vpack.c.bf16 %v7033_v33, %v7032_v6  ;;  %v9019_v42 = vpack.c.bf16 %v7046_v14, %v7045_v46 }
 0x40c   :  { %8499 = vmatmul.mubr.msk.f32.vlgmr.msra.gmra.mrb[32].mxu0 %vm6060_vm15, %v6059_v63  ;;  %v9022_v0 = vpack.c.bf16 %v7048_v3, %v7047_v5  ;;  %v9007_v15 = vpack.c.bf16 %v7037_v17, %v7036_v59  ;;  %v9025_v16 = vpack.c.bf16 %v7050_v2, %v7049_v18  ;;  %v9010_v53 = vpack.c.bf16 %v7039_v43, %v7038_v11 }
 0x40d   :  { %8999 = vmatpush3.bf16.msra.mxu0 %v8998_v23  ;;  %8544 = vmatprep.mubr.msk.f32.mxu0 %vm9305_vm13, %v9306_v48  ;;  %v9004_v23 = vpack.c.bf16 %v7035_v13, %v7034_v35  ;;  %v9028_v19 = vpack.c.bf16 %v6428_v52, %v6427_v10  ;;  %v9031_v56 = vpack.c.bf16 %v6430_v54, %v6429_v61 }
 0x40e   :  { %9000 = vmatprep.subr.bf16.mxu0 %v9304_v29  ;;  %9017 = vmatpush3.bf16.msra.mxu1 %v9016_v12  ;;  %v9034_v39 = vpack.c.bf16 %v6432_v34, %v6431_v55 }
 0x40f   :  { %9018 = vmatprep.subr.bf16.mxu1 %v9304_v29 }
 0x411   :  { %9002 = vmatpush3.bf16.msra.mxu0 %v9001_v37 }
 0x412   :  { %9003 = vmatprep.subr.bf16.mxu0 %v9304_v29  ;;  %9020 = vmatpush3.bf16.msra.mxu1 %v9019_v42 }
 0x413   :  { %9021 = vmatprep.subr.bf16.mxu1 %v9304_v29 }
 0x415   :  { %9005 = vmatpush3.bf16.msra.mxu0 %v9004_v23 }
 0x416   :  { %9006 = vmatprep.subr.bf16.mxu0 %v9304_v29  ;;  %9023 = vmatpush3.bf16.msra.mxu1 %v9022_v0 }
 0x417   :  { %9024 = vmatprep.subr.bf16.mxu1 %v9304_v29 }
 0x419   :  { %9008 = vmatpush3.bf16.msra.mxu0 %v9007_v15 }
 0x41a   :  { %9009 = vmatprep.subr.bf16.mxu0 %v9304_v29  ;;  %9026 = vmatpush3.bf16.msra.mxu1 %v9025_v16 }
 0x41d   :  { %9011 = vmatpush3.bf16.msra.mxu0 %v9010_v53  ;;  %8568 = vmatmul.mubr.msk.f32.vlgmr.msra.gmra.mrb[34].mxu1 %vm6060_vm15, %v6344_v20 }
 0x41e   :  { %9027 = vmatprep.subr.bf16.mxu0 %v9304_v29 }
 0x420   :  { %8545 = vmatmul.mubr.msk.f32.vlgmr.msra.gmra.mrb[34].mxu0 %vm6060_vm15, %v6245_v51 }
 0x421   :  { %8584 = vmatprep.mubr.msk.f32.mxu0 %vm9305_vm13, %v9306_v48  ;;  %9029 = vmatpush3.bf16.msra.mxu0 %v9028_v19 }
 0x422   :  { %9030 = vmatprep.subr.bf16.mxu0 %v9304_v29 }
 0x425   :  { %9032 = vmatpush3.bf16.msra.mxu0 %v9031_v56 }
 0x426   :  { %9033 = vmatprep.subr.bf16.mxu0 %v9304_v29  ;;  %v7052_v29 = vld [vmem:[%s12560_s8] ss:$0 sm:$0xff] }
 0x429   :  { %9035 = vmatpush3.bf16.msra.mxu0 %v9034_v39 }
 0x42a   :  { %8582 = vmatprep.subr.mxu0 %v9306_v48 }
 0x42d   :  { %8583 = vmatpush3.msk.msra.mxu0 %vm6445_vm0, %v6433_v44 }
 0x4dc   :  { %v6216_v21 = vpop.f32.mrb[32].mxu1 }
 0x4dd   :  { %v8523_v26 = vpop.f32.mrb[33].mxu1 }
 0x4df   :  { %v6129_v62 = vpop.f32.mrb[32].mxu0 }
 0x4e0   :  { %v6217_v47 = vadd.f32 %v6216_v21, %v6129_v62  ;;  %v8500_v38 = vpop.f32.mrb[33].mxu0 }
 0x4f0   :  { %v6413_v49 = vpop.f32.mrb[34].mxu1 }
 0x4f1   :  { %v8569_v31 = vpop.f32.mrb[35].mxu1 }
 0x4f3   :  { %v6314_v7 = vpop.f32.mrb[34].mxu0 }
 0x4f4   :  { %v6318_v36 = vadd.f32 %v6314_v7, %v6217_v47  ;;  %v8546_v22 = vpop.f32.mrb[35].mxu0 }
 0x4f6   :  { %v6417_v48 = vadd.f32 %v6413_v49, %v6318_v36 }
 0x4f8   :  { %v6425_v41 = vadd.f32 %v7052_v29, %v6417_v48 }
 0x4fa   :  { %v6426_v40 = vmax.f32 %v6425_v41, 0.0 }
 0x4fc   :  { %8585 = vmatmul.mubr.msk.f32.vlgmr.msra.gmra.mrb[36].mxu0 %vm6441_vm1, %v6426_v40 }
 0x5cf   :  { %v6515_v24 = vpop.f32.mrb[36].mxu0 }
 0x5d0   :  { %v6516_v8 = vadd.f32 %v7053_v45, %v6515_v24  ;;  %v8586_v58 = vpop.f32.mrb[37].mxu0 }
 0x5d2   :  { %6519 = vmax.xlane.f32.xlu0 %v6516_v8 }
 0x65f   :  { %v6520_v1 = vpop.xlane.xlu0 %6519 }
 0x660   :  { %v6521_v9 = vsub.f32 %v6516_v8, %v6520_v1 }
 0x662   :  { %v6522_v32 = vmul.f32 1.442695, %v6521_v9 }
 0x664   :  { %9297 = vpow2.f32 %v6522_v32 }
 0x66e   :  { %v9298_v27 = vpop.eup %9297 }
 0x66f   :  { %6524 = vadd.xlane.f32.xlu0 %v9298_v27 }
 0x6fc   :  { %v6525_v30 = vpop.xlane.xlu0 %6524 }
 0x6fd   :  { %9299 = vlog2.f32 %v6525_v30 }
 0x707   :  { %v9300_v50 = vpop.eup %9299 }
 0x708   :  { %v6527_v4 = vmul.f32 0.6931472, %v9300_v50 }
 0x70a   :  { %v6528_v28 = vsub.f32 %v6521_v9, %v6527_v4 }
 0x70c   :  { %6529 = vst [vmem:[%s12562_s11] sm:$0xff] %v6528_v28 }

</bundles_post_ra>
